<compile_context>
chip_gen: v5e
topology: v5e:2x2
jax: 0.10.0
libtpu: 0.0.40
codegen_flags: <defaults>
</compile_context>

<pallas_src>
import functools

import jax
import jax.numpy as jnp
from jax.experimental import pallas as pl
from jax.experimental.pallas import tpu as pltpu


def bottleneck_kernel(x_ref, w1sc_ref, b1sc_ref, w2_ref, b2_ref, w3_ref,
                      b3_ref, o_ref, pad_ref, patch_ref, *, H, W, NB):
    """One grid step == NB images; everything stays resident in VMEM.

    x_ref     : (NB*H*W, Cin)      channels-last activations (row-major)
    w1sc_ref  : (Cin, P + Cout)    conv1 and shortcut 1x1 weights fused,
                                   BN scales pre-folded into the columns
    b1sc_ref  : (1, P + Cout)      fused BN1 / shortcut-BN biases
    w2_ref    : (9*P, P)           3x3 conv weights, HWIO flattened + scaled
    w3_ref    : (P, Cout)          conv3 1x1 weights, scaled
    o_ref     : (NB*H*W, Cout)
    pad_ref   : (NB, H+2, W+2, P)  zero-padded staging for conv2  (VMEM scratch)
    patch_ref : (NB*H*W, 9*P)      im2col patches                 (VMEM scratch)
    """
    HW = H * W
    P = w2_ref.shape[1]
    cdt = x_ref.dtype

    xf = x_ref[...]                                            # (NB*HW, Cin)

    # ---- conv1 (1x1) + shortcut conv (1x1): one fused MXU matmul ---------
    # (xf is read once; the MXU sees a single wider-N push.)
    y = jnp.dot(xf, w1sc_ref[...], preferred_element_type=jnp.float32)
    y = y + b1sc_ref[...]
    h1 = jnp.maximum(y[:, :P], 0.0)                            # bn1 + relu
    sc = y[:, P:]                                              # shortcut + bn

    # ---- conv2 (3x3, pad=1, stride=1) + bn2 + relu -----------------------
    # Zero only the 1-pixel halo (the interior is fully overwritten every
    # step).  It is re-zeroed every step rather than only at program_id == 0
    # because the batch axis is "parallel": under megacore sharding a core may
    # never execute step 0, and scratch is per-core/uninitialized.
    zrow = jnp.zeros((NB, 1, W + 2, P), cdt)
    zcol = jnp.zeros((NB, H + 2, 1, P), cdt)
    pad_ref[:, 0:1, :, :] = zrow
    pad_ref[:, H + 1:H + 2, :, :] = zrow
    pad_ref[:, :, 0:1, :] = zcol
    pad_ref[:, :, W + 1:W + 2, :] = zcol
    pad_ref[:, 1:H + 1, 1:W + 1, :] = h1.astype(cdt).reshape(NB, H, W, P)

    # im2col: gather the 9 shifted taps into a (NB*HW, 9P) slab and do a
    # single contraction with K = 9*P instead of 9 matmuls with K = P.
    for kh in range(3):
        for kw in range(3):
            t = kh * 3 + kw
            tap = pad_ref[:, kh:kh + H, kw:kw + W, :].reshape(NB * HW, P)
            patch_ref[:, t * P:(t + 1) * P] = tap

    h2 = jnp.dot(patch_ref[...], w2_ref[...],
                 preferred_element_type=jnp.float32)
    h2 = jnp.maximum(h2 + b2_ref[...], 0.0)                    # bn2 + relu

    # ---- conv3 (1x1) + bn3 + residual add + final relu -------------------
    h3 = jnp.dot(h2.astype(cdt), w3_ref[...],
                 preferred_element_type=jnp.float32)
    o_ref[...] = jnp.maximum(h3 + b3_ref[...] + sc, 0.0).astype(o_ref.dtype)


def _replicated_spec(shape):
    ndim = len(shape)
    return pl.BlockSpec(shape, lambda n: (0,) * ndim)


def bottleneck_pallas(x, params, *, images_per_block=1,
                      compute_dtype=jnp.float32):
    """Fused Bottleneck forward.  x is NHWC.  compute_dtype may be bfloat16
    (matmul inputs are cast; accumulation and the bias/ReLU epilogue stay in
    f32, which also suits v5e's f32-only VPU/EUP)."""
    w1, s1, b1, w2, s2, b2, w3, s3, b3, ws, ss, bs = params
    N, H, W, Cin = x.shape
    P = w1.shape[1]
    Cout = w3.shape[1]
    NB = images_per_block
    assert N % NB == 0, "batch must be divisible by images_per_block"

    # Fold BN scales into the conv weights once at wrapper level (tiny,
    # one-time XLA ops); only the per-channel biases remain in the kernel.
    w1sc = jnp.concatenate([w1 * s1, ws * ss], axis=1).astype(compute_dtype)
    b1sc = jnp.concatenate([b1, bs], axis=1).astype(jnp.float32)
    w2s = (w2 * s2).reshape(9 * P, P).astype(compute_dtype)     # HWIO flat
    w3s = (w3 * s3).astype(compute_dtype)
    b2f = b2.astype(jnp.float32)
    b3f = b3.astype(jnp.float32)

    xf = x.reshape(N * H * W, Cin).astype(compute_dtype)

    kernel = functools.partial(bottleneck_kernel, H=H, W=W, NB=NB)

    out = pl.pallas_call(
        kernel,
        out_shape=jax.ShapeDtypeStruct((N * H * W, Cout), jnp.float32),
        grid=(N // NB,),
        in_specs=[
            pl.BlockSpec((NB * H * W, Cin), lambda n: (n, 0)),
            _replicated_spec(w1sc.shape),
            _replicated_spec(b1sc.shape),
            _replicated_spec(w2s.shape),
            _replicated_spec(b2f.shape),
            _replicated_spec(w3s.shape),
            _replicated_spec(b3f.shape),
        ],
        out_specs=pl.BlockSpec((NB * H * W, Cout), lambda n: (n, 0)),
        scratch_shapes=[
            pltpu.VMEM((NB, H + 2, W + 2, P), compute_dtype),
            pltpu.VMEM((NB * H * W, 9 * P), compute_dtype),
        ],
        compiler_params=pltpu.CompilerParams(
            # Images are independent -> parallel batch axis (v7x megacore).
            dimension_semantics=("parallel",)),
    )(xf, w1sc, b1sc, w2s, b2f, w3s, b3f)

    return out.reshape(N, H, W, Cout)


# ---------------------------- pure-JAX reference ---------------------------

def bottleneck_ref(x, params):
    w1, s1, b1, w2, s2, b2, w3, s3, b3, ws, ss, bs = params

    def conv1x1(v, w):
        return jnp.einsum('nhwc,co->nhwo', v, w)

    h1 = jax.nn.relu(conv1x1(x, w1) * s1 + b1)
    h2 = jax.lax.conv_general_dilated(
        h1, w2, window_strides=(1, 1), padding=((1, 1), (1, 1)),
        dimension_numbers=('NHWC', 'HWIO', 'NHWC'))
    h2 = jax.nn.relu(h2 * s2 + b2)
    h3 = conv1x1(h2, w3) * s3 + b3
    sc = conv1x1(x, ws) * ss + bs
    return jax.nn.relu(h3 + sc)


# ------------------------------ parameter init ------------------------------

def make_params(key, in_planes, planes):
    expansion = 4
    cout = expansion * planes
    ks = jax.random.split(key, 20)

    def bn_fold(k, c):
        kg, kb, km, kv = jax.random.split(k, 4)
        gamma = 1.0 + 0.1 * jax.random.normal(kg, (c,), jnp.float32)
        beta = 0.1 * jax.random.normal(kb, (c,), jnp.float32)
        mean = 0.1 * jax.random.normal(km, (c,), jnp.float32)
        var = jnp.abs(jax.random.normal(kv, (c,), jnp.float32)) + 0.5
        scale = gamma / jnp.sqrt(var + 1e-5)
        bias = beta - mean * scale
        return scale.reshape(1, c), bias.reshape(1, c)

    # PyTorch conv weights are (Cout, Cin, KH, KW); we store transposed forms.
    w1 = 0.2 * jax.random.normal(ks[0], (in_planes, planes), jnp.float32)     # 1x1
    w2 = 0.2 * jax.random.normal(ks[1], (3, 3, planes, planes), jnp.float32)  # 3x3, HWIO
    w3 = 0.2 * jax.random.normal(ks[2], (planes, cout), jnp.float32)          # 1x1
    ws = 0.2 * jax.random.normal(ks[3], (in_planes, cout), jnp.float32)       # shortcut 1x1

    s1, b1 = bn_fold(ks[4], planes)
    s2, b2 = bn_fold(ks[5], planes)
    s3, b3 = bn_fold(ks[6], cout)
    ss, bs = bn_fold(ks[7], cout)

    return (w1, s1, b1, w2, s2, b2, w3, s3, b3, ws, ss, bs)


if __name__ == "__main__":
    key = jax.random.PRNGKey(0)
    k_x, k_p = jax.random.split(key)

    N, H, W = 2, 16, 16
    in_planes, planes = 4, 4          # stride = 1; shortcut has conv+bn

    x = jax.random.normal(k_x, (N, H, W, in_planes), jnp.float32)
    params = make_params(k_p, in_planes, planes)

    ref = bottleneck_ref(x, params)

    # f32, one image per grid step (batch axis parallel across cores).
    out = jax.block_until_ready(bottleneck_pallas(x, params))
    assert out.shape == (N, H, W, 4 * planes)
    assert jnp.allclose(out, ref, atol=1e-4, rtol=1e-4), "f32 mismatch vs ref"

    # bf16 matmul inputs (f32 accumulation/epilogue): loose tolerance.
    out_bf16 = jax.block_until_ready(
        bottleneck_pallas(x, params, compute_dtype=jnp.bfloat16))
    assert out_bf16.shape == (N, H, W, 4 * planes)
    assert jnp.allclose(out_bf16, ref, atol=2e-1, rtol=2e-1), "bf16 mismatch"

    # Multiple images per grid step (amortizes per-step pipeline overhead).
    out_nb2 = jax.block_until_ready(
        bottleneck_pallas(x, params, images_per_block=2))
    assert jnp.allclose(out_nb2, ref, atol=1e-4, rtol=1e-4), "NB=2 mismatch"

    print("KERNEL_OK")
</pallas_src>

<mosaic_0001>
module attributes {stable_mosaic.version = 11 : i64} {
  func.func @bottleneck_kernel(%arg0: i32, %arg1: memref<256x4xf32, #tpu.memory_space<vmem>>, %arg2: memref<4x20xf32, #tpu.memory_space<vmem>>, %arg3: memref<1x20xf32, #tpu.memory_space<vmem>>, %arg4: memref<36x4xf32, #tpu.memory_space<vmem>>, %arg5: memref<1x4xf32, #tpu.memory_space<vmem>>, %arg6: memref<4x16xf32, #tpu.memory_space<vmem>>, %arg7: memref<1x16xf32, #tpu.memory_space<vmem>>, %arg8: memref<256x16xf32, #tpu.memory_space<vmem>>, %arg9: memref<1x18x18x4xf32, #tpu.memory_space<vmem>>, %arg10: memref<256x36xf32, #tpu.memory_space<vmem>>) attributes {dimension_semantics = [#tpu.dimension_semantics<parallel>], iteration_bounds = array<i64: 2>, scalar_prefetch = 0 : i64, scratch_operands = 2 : i64, tpu.core_type = #tpu.core_type<tc>, window_params = [{transform_indices = @transform_0, window_bounds = array<i64: 256, 4>}, {pipeline_mode = #tpu.pipeline_mode<synchronous>, transform_indices = @transform_1, window_bounds = array<i64: 4, 20>}, {pipeline_mode = #tpu.pipeline_mode<synchronous>, transform_indices = @transform_2, window_bounds = array<i64: 1, 20>}, {pipeline_mode = #tpu.pipeline_mode<synchronous>, transform_indices = @transform_3, window_bounds = array<i64: 36, 4>}, {pipeline_mode = #tpu.pipeline_mode<synchronous>, transform_indices = @transform_4, window_bounds = array<i64: 1, 4>}, {pipeline_mode = #tpu.pipeline_mode<synchronous>, transform_indices = @transform_5, window_bounds = array<i64: 4, 16>}, {pipeline_mode = #tpu.pipeline_mode<synchronous>, transform_indices = @transform_6, window_bounds = array<i64: 1, 16>}, {transform_indices = @transform_7, window_bounds = array<i64: 256, 16>}]} {
    %c0 = arith.constant 0 : index
    %c0_0 = arith.constant 0 : index
    %0 = vector.load %arg1[%c0, %c0_0] : memref<256x4xf32, #tpu.memory_space<vmem>>, vector<256x4xf32>
    %c0_1 = arith.constant 0 : index
    %c0_2 = arith.constant 0 : index
    %1 = vector.load %arg2[%c0_1, %c0_2] : memref<4x20xf32, #tpu.memory_space<vmem>>, vector<4x20xf32>
    %cst = arith.constant dense<0.000000e+00> : vector<256x20xf32>
    %2 = tpu.matmul %0, %1, %cst {dimension_numbers = #tpu.dot_dimension_numbers<[1], [0], [0], [1], [0, 0, 1, 1], [], []>} : vector<256x4xf32>, vector<4x20xf32>, vector<256x20xf32> -> vector<256x20xf32>
    %c0_3 = arith.constant 0 : index
    %c0_4 = arith.constant 0 : index
    %3 = vector.load %arg3[%c0_3, %c0_4] : memref<1x20xf32, #tpu.memory_space<vmem>>, vector<1x20xf32>
    %4 = vector.broadcast %3 : vector<1x20xf32> to vector<256x20xf32>
    %5 = arith.addf %2, %4 : vector<256x20xf32>
    %6 = vector.extract_strided_slice %5 {offsets = [0, 0], sizes = [256, 4], strides = [1, 1]} : vector<256x20xf32> to vector<256x4xf32>
    %cst_5 = arith.constant 0.000000e+00 : f32
    %7 = vector.broadcast %cst_5 : f32 to vector<256x4xf32>
    %8 = arith.maximumf %6, %7 : vector<256x4xf32>
    %9 = vector.extract_strided_slice %5 {offsets = [0, 4], sizes = [256, 16], strides = [1, 1]} : vector<256x20xf32> to vector<256x16xf32>
    %cst_6 = arith.constant 0.000000e+00 : f32
    %10 = vector.broadcast %cst_6 : f32 to vector<1x1x18x4xf32>
    %cst_7 = arith.constant 0.000000e+00 : f32
    %11 = vector.broadcast %cst_7 : f32 to vector<1x18x1x4xf32>
    %c0_8 = arith.constant 0 : index
    %c0_9 = arith.constant 0 : index
    %c0_10 = arith.constant 0 : index
    %c0_11 = arith.constant 0 : index
    %12 = vector.load %arg9[%c0_8, %c0_9, %c0_10, %c0_11] : memref<1x18x18x4xf32, #tpu.memory_space<vmem>>, vector<1x1x18x4xf32>
    tpu.vector_store %arg9[%c0_8, %c0_9, %c0_10, %c0_11], %10 {strides = array<i32>} : memref<1x18x18x4xf32, #tpu.memory_space<vmem>>, vector<1x1x18x4xf32>,
    %c0_12 = arith.constant 0 : index
    %c17 = arith.constant 17 : index
    %c0_13 = arith.constant 0 : index
    %c0_14 = arith.constant 0 : index
    %13 = vector.load %arg9[%c0_12, %c17, %c0_13, %c0_14] : memref<1x18x18x4xf32, #tpu.memory_space<vmem>>, vector<1x1x18x4xf32>
    tpu.vector_store %arg9[%c0_12, %c17, %c0_13, %c0_14], %10 {strides = array<i32>} : memref<1x18x18x4xf32, #tpu.memory_space<vmem>>, vector<1x1x18x4xf32>,
    %c0_15 = arith.constant 0 : index
    %c0_16 = arith.constant 0 : index
    %c0_17 = arith.constant 0 : index
    %c0_18 = arith.constant 0 : index
    %14 = vector.load %arg9[%c0_15, %c0_16, %c0_17, %c0_18] : memref<1x18x18x4xf32, #tpu.memory_space<vmem>>, vector<1x18x1x4xf32>
    tpu.vector_store %arg9[%c0_15, %c0_16, %c0_17, %c0_18], %11 {strides = array<i32>} : memref<1x18x18x4xf32, #tpu.memory_space<vmem>>, vector<1x18x1x4xf32>,
    %c0_19 = arith.constant 0 : index
    %c0_20 = arith.constant 0 : index
    %c17_21 = arith.constant 17 : index
    %c0_22 = arith.constant 0 : index
    %15 = vector.load %arg9[%c0_19, %c0_20, %c17_21, %c0_22] : memref<1x18x18x4xf32, #tpu.memory_space<vmem>>, vector<1x18x1x4xf32>
    tpu.vector_store %arg9[%c0_19, %c0_20, %c17_21, %c0_22], %11 {strides = array<i32>} : memref<1x18x18x4xf32, #tpu.memory_space<vmem>>, vector<1x18x1x4xf32>,
    %16 = vector.shape_cast %8 : vector<256x4xf32> to vector<1x16x16x4xf32>
    %c0_23 = arith.constant 0 : index
    %c1 = arith.constant 1 : index
    %c1_24 = arith.constant 1 : index
    %c0_25 = arith.constant 0 : index
    %17 = vector.load %arg9[%c0_23, %c1, %c1_24, %c0_25] : memref<1x18x18x4xf32, #tpu.memory_space<vmem>>, vector<1x16x16x4xf32>
    tpu.vector_store %arg9[%c0_23, %c1, %c1_24, %c0_25], %16 {strides = array<i32>} : memref<1x18x18x4xf32, #tpu.memory_space<vmem>>, vector<1x16x16x4xf32>,
    %c0_26 = arith.constant 0 : index
    %c0_27 = arith.constant 0 : index
    %c0_28 = arith.constant 0 : index
    %c0_29 = arith.constant 0 : index
    %18 = vector.load %arg9[%c0_26, %c0_27, %c0_28, %c0_29] : memref<1x18x18x4xf32, #tpu.memory_space<vmem>>, vector<1x16x16x4xf32>
    %19 = vector.shape_cast %18 : vector<1x16x16x4xf32> to vector<256x4xf32>
    %c0_30 = arith.constant 0 : index
    %c0_31 = arith.constant 0 : index
    %20 = vector.load %arg10[%c0_30, %c0_31] : memref<256x36xf32, #tpu.memory_space<vmem>>, vector<256x4xf32>
    tpu.vector_store %arg10[%c0_30, %c0_31], %19 {strides = array<i32>} : memref<256x36xf32, #tpu.memory_space<vmem>>, vector<256x4xf32>,
    %c0_32 = arith.constant 0 : index
    %c0_33 = arith.constant 0 : index
    %c1_34 = arith.constant 1 : index
    %c0_35 = arith.constant 0 : index
    %21 = vector.load %arg9[%c0_32, %c0_33, %c1_34, %c0_35] : memref<1x18x18x4xf32, #tpu.memory_space<vmem>>, vector<1x16x16x4xf32>
    %22 = vector.shape_cast %21 : vector<1x16x16x4xf32> to vector<256x4xf32>
    %c0_36 = arith.constant 0 : index
    %c4 = arith.constant 4 : index
    %23 = vector.load %arg10[%c0_36, %c4] : memref<256x36xf32, #tpu.memory_space<vmem>>, vector<256x4xf32>
    tpu.vector_store %arg10[%c0_36, %c4], %22 {strides = array<i32>} : memref<256x36xf32, #tpu.memory_space<vmem>>, vector<256x4xf32>,
    %c0_37 = arith.constant 0 : index
    %c0_38 = arith.constant 0 : index
    %c2 = arith.constant 2 : index
    %c0_39 = arith.constant 0 : index
    %24 = vector.load %arg9[%c0_37, %c0_38, %c2, %c0_39] : memref<1x18x18x4xf32, #tpu.memory_space<vmem>>, vector<1x16x16x4xf32>
    %25 = vector.shape_cast %24 : vector<1x16x16x4xf32> to vector<256x4xf32>
    %c0_40 = arith.constant 0 : index
    %c8 = arith.constant 8 : index
    %26 = vector.load %arg10[%c0_40, %c8] : memref<256x36xf32, #tpu.memory_space<vmem>>, vector<256x4xf32>
    tpu.vector_store %arg10[%c0_40, %c8], %25 {strides = array<i32>} : memref<256x36xf32, #tpu.memory_space<vmem>>, vector<256x4xf32>,
    %c0_41 = arith.constant 0 : index
    %c1_42 = arith.constant 1 : index
    %c0_43 = arith.constant 0 : index
    %c0_44 = arith.constant 0 : index
    %27 = vector.load %arg9[%c0_41, %c1_42, %c0_43, %c0_44] : memref<1x18x18x4xf32, #tpu.memory_space<vmem>>, vector<1x16x16x4xf32>
    %28 = vector.shape_cast %27 : vector<1x16x16x4xf32> to vector<256x4xf32>
    %c0_45 = arith.constant 0 : index
    %c12 = arith.constant 12 : index
    %29 = vector.load %arg10[%c0_45, %c12] : memref<256x36xf32, #tpu.memory_space<vmem>>, vector<256x4xf32>
    tpu.vector_store %arg10[%c0_45, %c12], %28 {strides = array<i32>} : memref<256x36xf32, #tpu.memory_space<vmem>>, vector<256x4xf32>,
    %c0_46 = arith.constant 0 : index
    %c1_47 = arith.constant 1 : index
    %c1_48 = arith.constant 1 : index
    %c0_49 = arith.constant 0 : index
    %30 = vector.load %arg9[%c0_46, %c1_47, %c1_48, %c0_49] : memref<1x18x18x4xf32, #tpu.memory_space<vmem>>, vector<1x16x16x4xf32>
    %31 = vector.shape_cast %30 : vector<1x16x16x4xf32> to vector<256x4xf32>
    %c0_50 = arith.constant 0 : index
    %c16 = arith.constant 16 : index
    %32 = vector.load %arg10[%c0_50, %c16] : memref<256x36xf32, #tpu.memory_space<vmem>>, vector<256x4xf32>
    tpu.vector_store %arg10[%c0_50, %c16], %31 {strides = array<i32>} : memref<256x36xf32, #tpu.memory_space<vmem>>, vector<256x4xf32>,
    %c0_51 = arith.constant 0 : index
    %c1_52 = arith.constant 1 : index
    %c2_53 = arith.constant 2 : index
    %c0_54 = arith.constant 0 : index
    %33 = vector.load %arg9[%c0_51, %c1_52, %c2_53, %c0_54] : memref<1x18x18x4xf32, #tpu.memory_space<vmem>>, vector<1x16x16x4xf32>
    %34 = vector.shape_cast %33 : vector<1x16x16x4xf32> to vector<256x4xf32>
    %c0_55 = arith.constant 0 : index
    %c20 = arith.constant 20 : index
    %35 = vector.load %arg10[%c0_55, %c20] : memref<256x36xf32, #tpu.memory_space<vmem>>, vector<256x4xf32>
    tpu.vector_store %arg10[%c0_55, %c20], %34 {strides = array<i32>} : memref<256x36xf32, #tpu.memory_space<vmem>>, vector<256x4xf32>,
    %c0_56 = arith.constant 0 : index
    %c2_57 = arith.constant 2 : index
    %c0_58 = arith.constant 0 : index
    %c0_59 = arith.constant 0 : index
    %36 = vector.load %arg9[%c0_56, %c2_57, %c0_58, %c0_59] : memref<1x18x18x4xf32, #tpu.memory_space<vmem>>, vector<1x16x16x4xf32>
    %37 = vector.shape_cast %36 : vector<1x16x16x4xf32> to vector<256x4xf32>
    %c0_60 = arith.constant 0 : index
    %c24 = arith.constant 24 : index
    %38 = vector.load %arg10[%c0_60, %c24] : memref<256x36xf32, #tpu.memory_space<vmem>>, vector<256x4xf32>
    tpu.vector_store %arg10[%c0_60, %c24], %37 {strides = array<i32>} : memref<256x36xf32, #tpu.memory_space<vmem>>, vector<256x4xf32>,
    %c0_61 = arith.constant 0 : index
    %c2_62 = arith.constant 2 : index
    %c1_63 = arith.constant 1 : index
    %c0_64 = arith.constant 0 : index
    %39 = vector.load %arg9[%c0_61, %c2_62, %c1_63, %c0_64] : memref<1x18x18x4xf32, #tpu.memory_space<vmem>>, vector<1x16x16x4xf32>
    %40 = vector.shape_cast %39 : vector<1x16x16x4xf32> to vector<256x4xf32>
    %c0_65 = arith.constant 0 : index
    %c28 = arith.constant 28 : index
    %41 = vector.load %arg10[%c0_65, %c28] : memref<256x36xf32, #tpu.memory_space<vmem>>, vector<256x4xf32>
    tpu.vector_store %arg10[%c0_65, %c28], %40 {strides = array<i32>} : memref<256x36xf32, #tpu.memory_space<vmem>>, vector<256x4xf32>,
    %c0_66 = arith.constant 0 : index
    %c2_67 = arith.constant 2 : index
    %c2_68 = arith.constant 2 : index
    %c0_69 = arith.constant 0 : index
    %42 = vector.load %arg9[%c0_66, %c2_67, %c2_68, %c0_69] : memref<1x18x18x4xf32, #tpu.memory_space<vmem>>, vector<1x16x16x4xf32>
    %43 = vector.shape_cast %42 : vector<1x16x16x4xf32> to vector<256x4xf32>
    %c0_70 = arith.constant 0 : index
    %c32 = arith.constant 32 : index
    %44 = vector.load %arg10[%c0_70, %c32] : memref<256x36xf32, #tpu.memory_space<vmem>>, vector<256x4xf32>
    tpu.vector_store %arg10[%c0_70, %c32], %43 {strides = array<i32>} : memref<256x36xf32, #tpu.memory_space<vmem>>, vector<256x4xf32>,
    %c0_71 = arith.constant 0 : index
    %c0_72 = arith.constant 0 : index
    %45 = vector.load %arg10[%c0_71, %c0_72] : memref<256x36xf32, #tpu.memory_space<vmem>>, vector<256x36xf32>
    %c0_73 = arith.constant 0 : index
    %c0_74 = arith.constant 0 : index
    %46 = vector.load %arg4[%c0_73, %c0_74] : memref<36x4xf32, #tpu.memory_space<vmem>>, vector<36x4xf32>
    %cst_75 = arith.constant dense<0.000000e+00> : vector<256x4xf32>
    %47 = tpu.matmul %45, %46, %cst_75 {dimension_numbers = #tpu.dot_dimension_numbers<[1], [0], [0], [1], [0, 0, 1, 1], [], []>} : vector<256x36xf32>, vector<36x4xf32>, vector<256x4xf32> -> vector<256x4xf32>
    %c0_76 = arith.constant 0 : index
    %c0_77 = arith.constant 0 : index
    %48 = vector.load %arg5[%c0_76, %c0_77] : memref<1x4xf32, #tpu.memory_space<vmem>>, vector<1x4xf32>
    %49 = vector.broadcast %48 : vector<1x4xf32> to vector<256x4xf32>
    %50 = arith.addf %47, %49 : vector<256x4xf32>
    %cst_78 = arith.constant 0.000000e+00 : f32
    %51 = vector.broadcast %cst_78 : f32 to vector<256x4xf32>
    %52 = arith.maximumf %50, %51 : vector<256x4xf32>
    %c0_79 = arith.constant 0 : index
    %c0_80 = arith.constant 0 : index
    %53 = vector.load %arg6[%c0_79, %c0_80] : memref<4x16xf32, #tpu.memory_space<vmem>>, vector<4x16xf32>
    %cst_81 = arith.constant dense<0.000000e+00> : vector<256x16xf32>
    %54 = tpu.matmul %52, %53, %cst_81 {dimension_numbers = #tpu.dot_dimension_numbers<[1], [0], [0], [1], [0, 0, 1, 1], [], []>} : vector<256x4xf32>, vector<4x16xf32>, vector<256x16xf32> -> vector<256x16xf32>
    %c0_82 = arith.constant 0 : index
    %c0_83 = arith.constant 0 : index
    %55 = vector.load %arg7[%c0_82, %c0_83] : memref<1x16xf32, #tpu.memory_space<vmem>>, vector<1x16xf32>
    %56 = vector.broadcast %55 : vector<1x16xf32> to vector<256x16xf32>
    %57 = arith.addf %54, %56 : vector<256x16xf32>
    %58 = arith.addf %57, %9 : vector<256x16xf32>
    %cst_84 = arith.constant 0.000000e+00 : f32
    %59 = vector.broadcast %cst_84 : f32 to vector<256x16xf32>
    %60 = arith.maximumf %58, %59 : vector<256x16xf32>
    %c0_85 = arith.constant 0 : index
    %c0_86 = arith.constant 0 : index
    %61 = vector.load %arg8[%c0_85, %c0_86] : memref<256x16xf32, #tpu.memory_space<vmem>>, vector<256x16xf32>
    tpu.vector_store %arg8[%c0_85, %c0_86], %60 {strides = array<i32>} : memref<256x16xf32, #tpu.memory_space<vmem>>, vector<256x16xf32>,
    return
  }
  func.func @transform_0(%arg0: i32) -> (i32, i32) {
    %c0_i32 = arith.constant 0 : i32
    %c0_i32_0 = arith.constant 0 : i32
    return %arg0, %c0_i32 : i32, i32
  }
  func.func @transform_1(%arg0: i32) -> (i32, i32) {
    %c0_i32 = arith.constant 0 : i32
    %c0_i32_0 = arith.constant 0 : i32
    %c0_i32_1 = arith.constant 0 : i32
    return %c0_i32, %c0_i32_0 : i32, i32
  }
  func.func @transform_2(%arg0: i32) -> (i32, i32) {
    %c0_i32 = arith.constant 0 : i32
    %c0_i32_0 = arith.constant 0 : i32
    %c0_i32_1 = arith.constant 0 : i32
    return %c0_i32, %c0_i32_0 : i32, i32
  }
  func.func @transform_3(%arg0: i32) -> (i32, i32) {
    %c0_i32 = arith.constant 0 : i32
    %c0_i32_0 = arith.constant 0 : i32
    %c0_i32_1 = arith.constant 0 : i32
    return %c0_i32, %c0_i32_0 : i32, i32
  }
  func.func @transform_4(%arg0: i32) -> (i32, i32) {
    %c0_i32 = arith.constant 0 : i32
    %c0_i32_0 = arith.constant 0 : i32
    %c0_i32_1 = arith.constant 0 : i32
    return %c0_i32, %c0_i32_0 : i32, i32
  }
  func.func @transform_5(%arg0: i32) -> (i32, i32) {
    %c0_i32 = arith.constant 0 : i32
    %c0_i32_0 = arith.constant 0 : i32
    %c0_i32_1 = arith.constant 0 : i32
    return %c0_i32, %c0_i32_0 : i32, i32
  }
  func.func @transform_6(%arg0: i32) -> (i32, i32) {
    %c0_i32 = arith.constant 0 : i32
    %c0_i32_0 = arith.constant 0 : i32
    %c0_i32_1 = arith.constant 0 : i32
    return %c0_i32, %c0_i32_0 : i32, i32
  }
  func.func @transform_7(%arg0: i32) -> (i32, i32) {
    %c0_i32 = arith.constant 0 : i32
    %c0_i32_0 = arith.constant 0 : i32
    return %arg0, %c0_i32 : i32, i32
  }
}

</mosaic_0001>

<bundles_post_ra>
// kernel: tpu_custom_call.1
= control target key start
LH: loop header
LB: loop body
LE: loop exit
PB: predicated region body
PF: predicated region fallthrough
CT: control target
= control target key end

     0   :  { %s3233_s24 = smov 0   ;;  %s4792_s0 = inlined_call_operand.vmem [shape: f32[512,4], index: 0, kind: input, shape index: {}]   ;;  %s4793_s1 = inlined_call_operand.vmem [shape: f32[4,20], index: 1, kind: input, shape index: {}]   ;;  %s4794_s2 = inlined_call_operand.vmem [shape: f32[1,20], index: 2, kind: input, shape index: {}]   ;;  %s4795_s3 = inlined_call_operand.vmem [shape: f32[36,4], index: 3, kind: input, shape index: {}]   ;;  %s4796_s4 = inlined_call_operand.vmem [shape: f32[1,4], index: 4, kind: input, shape index: {}]   ;;  %s4797_s5 = inlined_call_operand.vmem [shape: f32[4,16], index: 5, kind: input, shape index: {}]   ;;  %s4798_s6 = inlined_call_operand.vmem [shape: f32[1,16], index: 6, kind: input, shape index: {}]   ;;  %s4799_s7 = inlined_call_operand.vmem [shape: f32[512,16], index: 7, kind: output, shape index: {}]  }
   0x1 LB: > { %s3036_s25 = sadd.s32 4294967295, %s3181_s24   ;;  %p3040_p0 = scmp.ge.s32.totalorder %s3181_s24, 1  ;;  %s3181_s24 = sphi %s3233_s24, %s17_s24  }
   0x2   : > { %p238_p1 = scmp.lt.s32.totalorder %s3181_s24, 3 }
   0x4   : > { %p239_p2 = pnand %p3040_p0, %p238_p1 }
   0x6   : > { %242 = sbr.rel (%p239_p2) target bundleno = 1228 (0x4cc), region = 48 }
   0xb   : > { %v314_v0 = vld [vmem:[%s4793_s1] sm:$0xf]  ;;  %vm416_vm0 = vcmask 1043456   ;;  %s3041_s28 = sshll.u32 %s3036_s25, 5  ;;  %vm319_vm1 = vcmask 31744   ;;  %v3183_v16 = vmov 0.0  }
   0xc   : > { %3045 = vmatpush.msk.msra.mxu0 %vm416_vm0, %v314_v0  ;;  %3146 = vmatpush.msk.msra.mxu3 %vm416_vm0, %v314_v0  ;;  %p271_p3 = scmp.lt.s32.totalorder %s3041_s28, 63  ;;  %565 = vst.msk [vmem:[#allocation2] sm:$0xff] %vm319_vm1, %v3183_v16  ;;  %vm573_vm2 = vcmask 24576   ;;  %s3184_s10 = smov 4   ;;  %vm567_vm3 = vcmask 25600   ;;  %vm867_vm4 = vcmask 64544  }
   0xd   : > { %566 = vst.msk [vmem:[#allocation2 + $0x8] sm:$0xff] %vm319_vm1, %v3183_v16  ;;  %s3185_s11 = smov 8   ;;  %v3389_v28 = vld [vmem:[%s4794_s2] ss:$0 sm:$0xff]  ;;  %s3186_s14 = smov 16   ;;  %vm1060_vm5 = vcmask 97344  }
   0xe   : > { %s4918_s28 = smov (!%p271_p3, %s3041_s28), 63  ;;  %570 = vst.msk [vmem:[#allocation2 + $0x198] sm:$0xff] %vm319_vm1, %v3183_v16  ;;  %s3187_s15 = smov 12   ;;  %vm1253_vm6 = vcmask 130144   ;;  %vm1446_vm7 = vcmask 162944   ;;  %vm1639_vm8 = vcmask 195744  }
   0xf   : > { %s3042_s29 = sshll.u32 %s4918_s28, 3  ;;  %571 = vst.msk [vmem:[#allocation2 + $0x1a0] sm:$0xff] %vm319_vm1, %v3183_v16  ;;  %s3188_s16 = smov 20   ;;  %vm1833_vm9 = vcmask 228544   ;;  %vm2026_vm10 = vcmask 261344   ;;  %vm2219_vm11 = vcmask 294144  }
  0x10   : > { %s3254_s9 = scalar_lea.vmem %s4792_s0, %s3042_s29  ;;  %574 = vst.msk [vmem:[#allocation2] sm:$0x1] %vm573_vm2, %v3183_v16  ;;  %s3189_s17 = smov 28   ;;  %vm2293_vm12 = vcmask 293888   ;;  %vm2947_vm13 = vcmask 130048  }
  0x11   : > { %v282_v1 = vld [vmem:[%s3254_s9] sm:$0xff]  ;;  %v307_v2 = vld [vmem:[%s3254_s9 + $0xc8] sm:$0xff]  ;;  %v308_v4 = vld [vmem:[%s3254_s9 + $0xd0] sm:$0xff]  ;;  %575 = vst.msk [vmem:[#allocation2 + $0x18] sm:$0x1] %vm573_vm2, %v3183_v16  ;;  %s3190_s18 = smov 24  }
  0x12   : > { %3046 = vmatmul.msk.f32.vlgmr.msra.gmra.mxu0 %vm319_vm1, %v282_v1  ;;  %3071 = vmatmul.msk.f32.vlgmr.msra.gmra.mxu3 %vm319_vm1, %v307_v2  ;;  %v283_v3 = vld [vmem:[%s3254_s9 + $0x8] sm:$0xff]  ;;  %v284_v5 = vld [vmem:[%s3254_s9 + $0x10] sm:$0xff]  ;;  %v309_v6 = vld [vmem:[%s3254_s9 + $0xd8] sm:$0xff]  ;;  %576 = vst.msk [vmem:[#allocation2 + $0x30] sm:$0x1] %vm573_vm2, %v3183_v16  ;;  %s3191_s19 = smov 32  }
  0x13   : > { %v285_v7 = vld [vmem:[%s3254_s9 + $0x18] sm:$0xff]  ;;  %v286_v8 = vld [vmem:[%s3254_s9 + $0x20] sm:$0xff]  ;;  %v287_v10 = vld [vmem:[%s3254_s9 + $0x28] sm:$0xff]  ;;  %577 = vst.msk [vmem:[#allocation2 + $0x48] sm:$0x1] %vm573_vm2, %v3183_v16 }
  0x14   : > { %v310_v9 = vld [vmem:[%s3254_s9 + $0xe0] sm:$0xff]  ;;  %v288_v11 = vld [vmem:[%s3254_s9 + $0x30] sm:$0xff]  ;;  %v311_v12 = vld [vmem:[%s3254_s9 + $0xe8] sm:$0xff]  ;;  %578 = vst.msk [vmem:[#allocation2 + $0x60] sm:$0x1] %vm573_vm2, %v3183_v16 }
  0x15   : > { %v289_v13 = vld [vmem:[%s3254_s9 + $0x38] sm:$0xff]  ;;  %v290_v14 = vld [vmem:[%s3254_s9 + $0x40] sm:$0xff]  ;;  %v291_v15 = vld [vmem:[%s3254_s9 + $0x48] sm:$0xff]  ;;  %579 = vst.msk [vmem:[#allocation2 + $0x78] sm:$0x1] %vm573_vm2, %v3183_v16 }
  0x16   : > { %v292_v17 = vld [vmem:[%s3254_s9 + $0x50] sm:$0xff]  ;;  %v707_v19 = vld [vmem:[#allocation2 + $0x1] sm:$0xff]  ;;  %v293_v20 = vld [vmem:[%s3254_s9 + $0x58] sm:$0xff]  ;;  %580 = vst.msk [vmem:[#allocation2 + $0x90] sm:$0x1] %vm573_vm2, %v3183_v16 }
  0x17   : > { %v312_v18 = vld [vmem:[%s3254_s9 + $0xf0] sm:$0xff]  ;;  %771 = vrot.lane.b32.xlu0 %v707_v19, %s3184_s10  ;;  %581 = vst.msk [vmem:[#allocation2 + $0xa8] sm:$0x1] %vm573_vm2, %v3183_v16  ;;  %v313_v21 = vld [vmem:[%s3254_s9 + $0xf8] sm:$0xff]  ;;  %v294_v22 = vld [vmem:[%s3254_s9 + $0x60] sm:$0xff] }
  0x18   : > { %582 = vst.msk [vmem:[#allocation2 + $0xc0] sm:$0x1] %vm573_vm2, %v3183_v16  ;;  %v295_v23 = vld [vmem:[%s3254_s9 + $0x68] sm:$0xff]  ;;  %v296_v25 = vld [vmem:[%s3254_s9 + $0x70] sm:$0xff]  ;;  %v297_v26 = vld [vmem:[%s3254_s9 + $0x78] sm:$0xff] }
  0x19   : > { %583 = vst.msk [vmem:[#allocation2 + $0xd8] sm:$0x1] %vm573_vm2, %v3183_v16  ;;  %v900_v24 = vld [vmem:[#allocation2 + $0x2] sm:$0xff]  ;;  %v300_v46 = vld [vmem:[%s3254_s9 + $0x90] sm:$0xff]  ;;  %v301_v56 = vld [vmem:[%s3254_s9 + $0x98] sm:$0xff] }
  0x1a   : > { %3047 = vmatmul.msk.f32.gmra.mxu0 %vm319_vm1, %v283_v3  ;;  %3072 = vmatmul.msk.f32.gmra.mxu3 %vm319_vm1, %v308_v4  ;;  %584 = vst.msk [vmem:[#allocation2 + $0xf0] sm:$0x1] %vm573_vm2, %v3183_v16  ;;  %v298_v30 = vld [vmem:[%s3254_s9 + $0x80] sm:$0xff]  ;;  %v299_v37 = vld [vmem:[%s3254_s9 + $0x88] sm:$0xff] }
  0x1b   : > { %585 = vst.msk [vmem:[#allocation2 + $0x108] sm:$0x1] %vm573_vm2, %v3183_v16  ;;  %964 = vrot.lane.b32.xlu2 %v900_v24, %s3185_s11  ;;  %v302_v1 = vld [vmem:[%s3254_s9 + $0xa0] sm:$0xff] }
  0x1c   : > { %586 = vst.msk [vmem:[#allocation2 + $0x120] sm:$0x1] %vm573_vm2, %v3183_v16 }
  0x1d   : > { %587 = vst.msk [vmem:[#allocation2 + $0x138] sm:$0x1] %vm573_vm2, %v3183_v16 }
  0x1e   : > { %588 = vst.msk [vmem:[#allocation2 + $0x150] sm:$0x1] %vm573_vm2, %v3183_v16 }
  0x1f   : > { %589 = vst.msk [vmem:[#allocation2 + $0x168] sm:$0x1] %vm573_vm2, %v3183_v16 }
  0x20   : > { %590 = vst.msk [vmem:[#allocation2 + $0x180] sm:$0x1] %vm573_vm2, %v3183_v16 }
  0x21   : > { %593 = vst.msk [vmem:[#allocation2 + $0x29] sm:$0x1] %vm573_vm2, %v3183_v16 }
  0x22   : > { %3048 = vmatmul.msk.f32.gmra.mxu0 %vm319_vm1, %v284_v5  ;;  %3073 = vmatmul.msk.f32.gmra.mxu3 %vm319_vm1, %v309_v6  ;;  %594 = vst.msk [vmem:[#allocation2 + $0x41] sm:$0x1] %vm573_vm2, %v3183_v16 }
  0x23   : > { %595 = vst.msk [vmem:[#allocation2 + $0x59] sm:$0x1] %vm573_vm2, %v3183_v16 }
  0x24   : > { %596 = vst.msk [vmem:[#allocation2 + $0x71] sm:$0x1] %vm573_vm2, %v3183_v16 }
  0x25   : > { %597 = vst.msk [vmem:[#allocation2 + $0x89] sm:$0x1] %vm573_vm2, %v3183_v16 }
  0x26   : > { %598 = vst.msk [vmem:[#allocation2 + $0xa1] sm:$0x1] %vm573_vm2, %v3183_v16 }
  0x27   : > { %599 = vst.msk [vmem:[#allocation2 + $0xb9] sm:$0x1] %vm573_vm2, %v3183_v16 }
  0x28   : > { %600 = vst.msk [vmem:[#allocation2 + $0xd1] sm:$0x1] %vm573_vm2, %v3183_v16 }
  0x29   : > { %601 = vst.msk [vmem:[#allocation2 + $0xe9] sm:$0x1] %vm573_vm2, %v3183_v16 }
  0x2a   : > { %3049 = vmatmul.msk.f32.gmra.mxu0 %vm319_vm1, %v285_v7  ;;  %3074 = vmatmul.msk.f32.gmra.mxu3 %vm319_vm1, %v310_v9  ;;  %602 = vst.msk [vmem:[#allocation2 + $0x101] sm:$0x1] %vm573_vm2, %v3183_v16 }
  0x2b   : > { %603 = vst.msk [vmem:[#allocation2 + $0x119] sm:$0x1] %vm573_vm2, %v3183_v16 }
  0x2c   : > { %604 = vst.msk [vmem:[#allocation2 + $0x131] sm:$0x1] %vm573_vm2, %v3183_v16 }
  0x2d   : > { %605 = vst.msk [vmem:[#allocation2 + $0x149] sm:$0x1] %vm573_vm2, %v3183_v16 }
  0x2e   : > { %606 = vst.msk [vmem:[#allocation2 + $0x161] sm:$0x1] %vm573_vm2, %v3183_v16 }
  0x2f   : > { %607 = vst.msk [vmem:[#allocation2 + $0x179] sm:$0x1] %vm573_vm2, %v3183_v16 }
  0x30   : > { %608 = vst.msk [vmem:[#allocation2 + $0x191] sm:$0x1] %vm573_vm2, %v3183_v16 }
  0x31   : > { %591 = vst.msk [vmem:[#allocation2 + $0x198] sm:$0x1] %vm573_vm2, %v3183_v16 }
  0x32   : > { %3050 = vmatmul.msk.f32.gmra.mxu0 %vm319_vm1, %v286_v8  ;;  %3075 = vmatmul.msk.f32.gmra.mxu3 %vm319_vm1, %v311_v12  ;;  %568 = vst.msk [vmem:[#allocation2 + $0x10] sm:$0x3] %vm567_vm3, %v3183_v16  ;;  %v303_v8 = vld [vmem:[%s3254_s9 + $0xa8] sm:$0xff] }
  0x33   : > { %572 = vst.msk [vmem:[#allocation2 + $0x1a8] sm:$0x3] %vm567_vm3, %v3183_v16 }
  0x34   : > { %592 = vst.msk [vmem:[#allocation2 + $0x11] sm:$0x1] %vm573_vm2, %v3183_v16 }
  0x35   : > { %609 = vst.msk [vmem:[#allocation2 + $0x1a9] sm:$0x1] %vm573_vm2, %v3183_v16  ;;  %v304_v16 = vld [vmem:[%s3254_s9 + $0xb0] sm:$0xff] }
  0x39   : > { %v708_v27 = vld [vmem:[#allocation2 + $0x9] sm:$0xff] }
  0x3a   : > { %3051 = vmatmul.msk.f32.gmra.mxu0 %vm319_vm1, %v287_v10  ;;  %3076 = vmatmul.msk.f32.gmra.mxu3 %vm319_vm1, %v312_v18 }
  0x3b   : > { %773 = vrot.lane.b32.xlu0 %v708_v27, %s3184_s10  ;;  %v901_v33 = vld [vmem:[#allocation2 + $0xa] sm:$0xff] }
  0x42   : > { %3052 = vmatmul.msk.f32.gmra.mxu0 %vm319_vm1, %v288_v11  ;;  %3077 = vmatmul.msk.f32.gmra.mxu3 %vm319_vm1, %v313_v21  ;;  %v305_v21 = vld [vmem:[%s3254_s9 + $0xb8] sm:$0xff] }
  0x43   : > { %966 = vrot.lane.b32.xlu0 %v901_v33, %s3185_s11 }
  0x4a   : > { %3053 = vmatmul.msk.f32.gmra.mxu0 %vm319_vm1, %v289_v13 }
  0x52   : > { %3054 = vmatmul.msk.f32.gmra.mxu0 %vm319_vm1, %v290_v14 }
  0x5a   : > { %3055 = vmatmul.msk.f32.gmra.mxu0 %vm319_vm1, %v291_v15 }
  0x62   : > { %3056 = vmatmul.msk.f32.gmra.mxu0 %vm319_vm1, %v292_v17 }
  0x6a   : > { %3057 = vmatmul.msk.f32.gmra.mxu0 %vm319_vm1, %v293_v20 }
  0x72   : > { %3058 = vmatmul.msk.f32.gmra.mxu0 %vm319_vm1, %v294_v22 }
  0x7a   : > { %3059 = vmatmul.msk.f32.gmra.mxu0 %vm319_vm1, %v295_v23 }
  0x82   : > { %3060 = vmatmul.msk.f32.gmra.mxu0 %vm319_vm1, %v296_v25 }
  0x8a   : > { %3061 = vmatmul.msk.f32.gmra.mxu0 %vm319_vm1, %v297_v26 }
  0x8f   : > { %v437_v29 = vpop.f32.mrf.mxu0 }
  0x90   : > { %v3394_v31 = vadd.f32 %v3389_v28, %v437_v29 }
  0x92   : > { %4839 = vst [vmem:[#allocation4_spill] sm:$0xff] %v3394_v31  ;;  %v533_v32 = vmax.f32 %v3394_v31, 0.0  ;;  %3062 = vmatmul.msk.f32.gmra.mxu0 %vm319_vm1, %v298_v30 }
  0x94   : > { %611 = vst.msk [vmem:[#allocation2 + $0x19] sm:$0xff] %vm319_vm1, %v533_v32  ;;  %v306_v32 = vld [vmem:[%s3254_s9 + $0xc0] sm:$0xff] }
  0x95   : > { %v512_v34 = vpop.f32.mrf.mxu3 }
  0x96   : > { %v3401_v35 = vadd.f32 %v3389_v28, %v512_v34 }
  0x97   : > { %v440_v36 = vpop.f32.mrf.mxu0 }
  0x98   : > { %4840 = vst [vmem:[#allocation5_spill] sm:$0xff] %v3401_v35  ;;  %v558_v38 = vmax.f32 %v3401_v35, 0.0  ;;  %v3406_v39 = vadd.f32 %v3389_v28, %v440_v36 }
  0x9a   : > { %4841 = vst [vmem:[#allocation6_spill] sm:$0xff] %v3406_v39  ;;  %v534_v40 = vmax.f32 %v3406_v39, 0.0  ;;  %3063 = vmatmul.msk.f32.gmra.mxu0 %vm319_vm1, %v299_v37 }
  0x9b   : > { %636 = vst.msk [vmem:[#allocation2 + $0x141] sm:$0xff] %vm319_vm1, %v558_v38  ;;  %v1286_v41 = vld [vmem:[#allocation2 + $0x19] sm:$0xff] }
  0x9c   : > { %v1093_v42 = vld [vmem:[#allocation2 + $0x18] sm:$0xff]  ;;  %612 = vst.msk [vmem:[#allocation2 + $0x21] sm:$0xff] %vm319_vm1, %v534_v40  ;;  %775 = vrot.lane.b32.xlu1 %v1286_v41, %s3184_s10  ;;  %1350 = vrot.lane.b32.xlu0 %v1286_v41, %s3186_s14  ;;  %v643_v40 = vld [vmem:[#allocation2] sm:$0xff] }
  0x9d   : > { %v515_v43 = vpop.f32.mrf.mxu3  ;;  %677 = vst.msk [vmem:[#allocation3 + $0x10] sm:$0xff] %vm319_vm1, %v1093_v42 }
  0x9e   : > { %v3416_v44 = vadd.f32 %v3389_v28, %v515_v43  ;;  %675 = vst.msk [vmem:[#allocation3] sm:$0xff] %vm319_vm1, %v643_v40  ;;  %v772_v43 = vpop.permute.xlu0 %771 }
  0x9f   : > { %v443_v45 = vpop.f32.mrf.mxu0  ;;  %868 = vst.msk [vmem:[#allocation3] sm:$0xff] %vm867_vm4, %v772_v43 }
  0xa0   : > { %4842 = vst [vmem:[#allocation7_spill] sm:$0xff] %v3416_v44  ;;  %v3420_v47 = vadd.f32 %v3389_v28, %v443_v45  ;;  %v559_v48 = vmax.f32 %v3416_v44, 0.0 }
  0xa2   : > { %4843 = vst [vmem:[#allocation8_spill] sm:$0xff] %v3420_v47  ;;  %v927_v49 = vld [vmem:[#allocation2 + $0x142] sm:$0xff]  ;;  %v535_v50 = vmax.f32 %v3420_v47, 0.0  ;;  %3064 = vmatmul.msk.f32.gmra.mxu0 %vm319_vm1, %v300_v46 }
  0xa3   : > { %637 = vst.msk [vmem:[#allocation2 + $0x151] sm:$0xff] %vm319_vm1, %v559_v48  ;;  %1018 = vrot.lane.b32.xlu2 %v927_v49, %s3185_s11  ;;  %v734_v51 = vld [vmem:[#allocation2 + $0x141] sm:$0xff] }
  0xa4   : > { %v1094_v52 = vld [vmem:[#allocation2 + $0x20] sm:$0xff]  ;;  %613 = vst.msk [vmem:[#allocation2 + $0x31] sm:$0xff] %vm319_vm1, %v535_v50  ;;  %1157 = vrot.lane.b32.xlu1 %v1093_v42, %s3187_s15  ;;  %825 = vrot.lane.b32.xlu0 %v734_v51, %s3184_s10  ;;  %v644_v50 = vld [vmem:[#allocation2 + $0x8] sm:$0xff] }
  0xa5   : > { %v518_v53 = vpop.f32.mrf.mxu3  ;;  %678 = vst.msk [vmem:[#allocation3 + $0x18] sm:$0xff] %vm319_vm1, %v1094_v52  ;;  %v903_v57 = vld [vmem:[#allocation2 + $0x22] sm:$0xff]  ;;  %v902_v5 = vld [vmem:[#allocation2 + $0x1a] sm:$0xff] }
  0xa6   : > { %v3432_v54 = vadd.f32 %v3389_v28, %v518_v53  ;;  %v710_v60 = vld [vmem:[#allocation2 + $0x21] sm:$0xff]  ;;  %676 = vst.msk [vmem:[#allocation3 + $0x8] sm:$0xff] %vm319_vm1, %v644_v50 }
  0xa7   : > { %v446_v55 = vpop.f32.mrf.mxu0 }
  0xa8   : > { %4844 = vst [vmem:[#allocation9_spill] sm:$0xff] %v3432_v54  ;;  %v3436_v58 = vadd.f32 %v3389_v28, %v446_v55  ;;  %v560_v59 = vmax.f32 %v3432_v54, 0.0  ;;  %v2286_v54 = vld [vmem:[%s4795_s3 + $0x10] sm:$0xff] }
  0xaa   : > { %4845 = vst [vmem:[#allocation10_spill] sm:$0xff] %v3436_v58  ;;  %v536_v61 = vmax.f32 %v3436_v58, 0.0  ;;  %3065 = vmatmul.msk.f32.gmra.mxu0 %vm319_vm1, %v301_v56  ;;  %v1119_v62 = vld [vmem:[#allocation2 + $0x150] sm:$0xff] }
  0xab   : > { %970 = vrot.lane.b32.xlu2 %v903_v57, %s3185_s11  ;;  %638 = vst.msk [vmem:[#allocation2 + $0x159] sm:$0xff] %vm319_vm1, %v560_v59  ;;  %v3446_v63 = vld [vmem:[#allocation2 + $0x30] sm:$0xff]  ;;  %v965_v59 = vpop.permute.xlu2 %964 }
  0xac   : > { %703 = vst.msk [vmem:[#allocation3 + $0xe0] sm:$0xff] %vm319_vm1, %v1119_v62  ;;  %777 = vrot.lane.b32.xlu1 %v710_v60, %s3184_s10  ;;  %1209 = vrot.lane.b32.xlu0 %v1119_v62, %s3187_s15  ;;  %v1866_v13 = vld [vmem:[#allocation2 + $0x31] sm:$0xff] }
  0xad   : > { %614 = vst.msk [vmem:[#allocation2 + $0x39] sm:$0xff] %vm319_vm1, %v536_v61  ;;  %v521_v10 = vpop.f32.mrf.mxu3  ;;  %v735_v26 = vld [vmem:[#allocation2 + $0x151] sm:$0xff] }
  0xae   : > { %679 = vst.msk [vmem:[#allocation3 + $0x20] sm:$0xff] %vm319_vm1, %v3446_v63  ;;  %v3475_v11 = vadd.f32 %v3389_v28, %v521_v10 }
  0xaf   : > { %v449_v0 = vpop.f32.mrf.mxu0  ;;  %1061 = vst.msk [vmem:[#allocation3] sm:$0xff] %vm1060_vm5, %v965_v59 }
  0xb0   : > { %v3453_v2 = vadd.f32 %v3389_v28, %v449_v0  ;;  %4848 = vst [vmem:[#allocation13_spill] sm:$0xff] %v3475_v11  ;;  %v561_v14 = vmax.f32 %v3475_v11, 0.0 }
  0xb2   : > { %4846 = vst [vmem:[#allocation11_spill] sm:$0xff] %v3453_v2  ;;  %v3455_v3 = vld [vmem:[#allocation2 + $0x158] sm:$0xff]  ;;  %v537_v4 = vmax.f32 %v3453_v2, 0.0  ;;  %3066 = vmatmul.msk.f32.gmra.mxu0 %vm319_vm1, %v302_v1 }
  0xb3   : > { %1159 = vrot.lane.b32.xlu2 %v1094_v52, %s3187_s15  ;;  %704 = vst.msk [vmem:[#allocation3 + $0xe8] sm:$0xff] %vm319_vm1, %v3455_v3  ;;  %v928_v19 = vld [vmem:[#allocation2 + $0x152] sm:$0xff]  ;;  %v929_v34 = vld [vmem:[#allocation2 + $0x15a] sm:$0xff] }
  0xb4   : > { %v3462_v6 = vld [vmem:[#allocation2 + $0x38] sm:$0xff]  ;;  %615 = vst.msk [vmem:[#allocation2 + $0x49] sm:$0xff] %vm319_vm1, %v537_v4  ;;  %968 = vrot.lane.b32.xlu1 %v902_v5, %s3185_s11  ;;  %1161 = vrot.lane.b32.xlu0 %v3446_v63, %s3187_s15 }
  0xb5   : > { %680 = vst.msk [vmem:[#allocation3 + $0x28] sm:$0xff] %vm319_vm1, %v3462_v6  ;;  %v524_v23 = vpop.f32.mrf.mxu3  ;;  %v3507_v29 = vld [vmem:[#allocation2 + $0x32] sm:$0xff] }
  0xb6   : > { %639 = vst.msk [vmem:[#allocation2 + $0x169] sm:$0xff] %vm319_vm1, %v561_v14  ;;  %v3500_v24 = vadd.f32 %v3389_v28, %v524_v23  ;;  %v3521_v37 = vld [vmem:[#allocation2 + $0x39] sm:$0xff] }
  0xb7   : > { %v452_v7 = vpop.f32.mrf.mxu0  ;;  %v736_v46 = vld [vmem:[#allocation2 + $0x159] sm:$0xff] }
  0xb8   : > { %v3472_v9 = vadd.f32 %v3389_v28, %v452_v7  ;;  %4851 = vst [vmem:[#allocation16_spill] sm:$0xff] %v3500_v24  ;;  %v562_v27 = vmax.f32 %v3500_v24, 0.0 }
  0xba   : > { %4847 = vst [vmem:[#allocation12_spill] sm:$0xff] %v3472_v9  ;;  %v538_v12 = vmax.f32 %v3472_v9, 0.0  ;;  %3067 = vmatmul.msk.f32.gmra.mxu0 %vm319_vm1, %v303_v8 }
  0xbb   : > { %1545 = vrot.lane.b32.xlu2 %v903_v57, %s3188_s16  ;;  %640 = vst.msk [vmem:[#allocation2 + $0x171] sm:$0xff] %vm319_vm1, %v562_v27  ;;  %v3536_v49 = vld [vmem:[#allocation2 + $0x48] sm:$0xff]  ;;  %v905_v57 = vld [vmem:[#allocation2 + $0x3a] sm:$0xff] }
  0xbc   : > { %616 = vst.msk [vmem:[#allocation2 + $0x51] sm:$0xff] %vm319_vm1, %v538_v12  ;;  %1352 = vrot.lane.b32.xlu1 %v710_v60, %s3186_s14  ;;  %1930 = vrot.lane.b32.xlu0 %v1866_v13, %s3189_s17  ;;  %v3565_v0 = vld [vmem:[#allocation2 + $0x49] sm:$0xff] }
  0xbd   : > { %v1121_v38 = vld [vmem:[#allocation2 + $0x168] sm:$0xff]  ;;  %681 = vst.msk [vmem:[#allocation3 + $0x30] sm:$0xff] %vm319_vm1, %v3536_v49  ;;  %v527_v62 = vpop.f32.mrf.mxu3 }
  0xbe   : > { %705 = vst.msk [vmem:[#allocation3 + $0xf0] sm:$0xff] %vm319_vm1, %v1121_v38  ;;  %v737_v56 = vld [vmem:[#allocation2 + $0x169] sm:$0xff]  ;;  %v3571_v1 = vadd.f32 %v3389_v28, %v527_v62 }
  0xbf   : > { %v455_v15 = vpop.f32.mrf.mxu0 }
  0xc0   : > { %v3487_v17 = vadd.f32 %v3389_v28, %v455_v15  ;;  %4856 = vst [vmem:[#allocation21_spill] sm:$0xff] %v3571_v1 }
  0xc2   : > { %4849 = vst [vmem:[#allocation14_spill] sm:$0xff] %v3487_v17  ;;  %v539_v18 = vmax.f32 %v3487_v17, 0.0  ;;  %3068 = vmatmul.msk.f32.gmra.mxu0 %vm319_vm1, %v304_v16  ;;  %v1122_v41 = vld [vmem:[#allocation2 + $0x170] sm:$0xff] }
  0xc3   : > { %779 = vrot.lane.b32.xlu2 %v1866_v13, %s3184_s10  ;;  %706 = vst.msk [vmem:[#allocation3 + $0xf8] sm:$0xff] %vm319_vm1, %v1122_v41  ;;  %v3546_v51 = vld [vmem:[#allocation2 + $0x50] sm:$0xff] }
  0xc4   : > { %617 = vst.msk [vmem:[#allocation2 + $0x61] sm:$0xff] %vm319_vm1, %v539_v18  ;;  %1543 = vrot.lane.b32.xlu1 %v902_v5, %s3188_s16  ;;  %1020 = vrot.lane.b32.xlu0 %v928_v19, %s3185_s11  ;;  %v931_v10 = vld [vmem:[#allocation2 + $0x172] sm:$0xff]  ;;  %v774_v18 = vpop.permute.xlu0 %773 }
  0xc5   : > { %682 = vst.msk [vmem:[#allocation3 + $0x38] sm:$0xff] %vm319_vm1, %v3546_v51  ;;  %v530_v7 = vpop.f32.mrf.mxu3  ;;  %v3643_v50 = vld [vmem:[#allocation2 + $0x51] sm:$0xff] }
  0xc6   : > { %v3581_v8 = vadd.f32 %v3389_v28, %v530_v7  ;;  %869 = vst.msk [vmem:[#allocation3 + $0x8] sm:$0xff] %vm867_vm4, %v774_v18 }
  0xc7   : > { %v458_v20 = vpop.f32.mrf.mxu0 }
  0xc8   : > { %v3497_v22 = vadd.f32 %v3389_v28, %v458_v20  ;;  %4858 = vst [vmem:[#allocation23_spill] sm:$0xff] %v3581_v8  ;;  %v564_v12 = vmax.f32 %v3581_v8, 0.0  ;;  %v2287_v8 = vld [vmem:[%s4795_s3 + $0x18] sm:$0xff] }
  0xca   : > { %4850 = vst [vmem:[#allocation15_spill] sm:$0xff] %v3497_v22  ;;  %v540_v25 = vmax.f32 %v3497_v22, 0.0  ;;  %3069 = vmatmul.msk.f32.gmra.mxu0 %vm319_vm1, %v305_v21  ;;  %v930_v21 = vld [vmem:[#allocation2 + $0x16a] sm:$0xff] }
  0xcb   : > { %1354 = vrot.lane.b32.xlu2 %v1866_v13, %s3186_s14  ;;  %642 = vst.msk [vmem:[#allocation2 + $0x189] sm:$0xff] %vm319_vm1, %v564_v12  ;;  %v3614_v27 = vld [vmem:[#allocation2 + $0x60] sm:$0xff] }
  0xcc   : > { %618 = vst.msk [vmem:[#allocation2 + $0x69] sm:$0xff] %vm319_vm1, %v540_v25  ;;  %827 = vrot.lane.b32.xlu1 %v735_v26, %s3184_s10  ;;  %972 = vrot.lane.b32.xlu0 %v3507_v29, %s3185_s11  ;;  %v3609_v25 = vld [vmem:[#allocation2 + $0x52] sm:$0xff] }
  0xcd   : > { %683 = vst.msk [vmem:[#allocation3 + $0x40] sm:$0xff] %vm319_vm1, %v3614_v27 }
  0xcf   : > { %v461_v30 = vpop.f32.mrf.mxu0 }
  0xd0   : > { %v3515_v33 = vadd.f32 %v3389_v28, %v461_v30 }
  0xd2   : > { %4852 = vst [vmem:[#allocation17_spill] sm:$0xff] %v3515_v33  ;;  %v541_v36 = vmax.f32 %v3515_v33, 0.0  ;;  %3070 = vmatmul.msk.f32.gmra.mxu0 %vm319_vm1, %v306_v32 }
  0xd3   : > { %1737 = vrot.lane.b32.xlu2 %v3446_v63, %s3190_s18  ;;  %v3618_v30 = vld [vmem:[#allocation2 + $0x68] sm:$0xff] }
  0xd4   : > { %619 = vst.msk [vmem:[#allocation2 + $0x79] sm:$0xff] %vm319_vm1, %v541_v36  ;;  %1022 = vrot.lane.b32.xlu1 %v929_v34, %s3185_s11  ;;  %1356 = vrot.lane.b32.xlu0 %v3521_v37, %s3186_s14  ;;  %v967_v34 = vpop.permute.xlu0 %966 }
  0xd5   : > { %684 = vst.msk [vmem:[#allocation3 + $0x48] sm:$0xff] %vm319_vm1, %v3618_v30 }
  0xd6   : > { %1062 = vst.msk [vmem:[#allocation3 + $0x8] sm:$0xff] %vm1060_vm5, %v967_v34 }
  0xd7   : > { %v464_v42 = vpop.f32.mrf.mxu0 }
  0xd8   : > { %v3531_v45 = vadd.f32 %v3389_v28, %v464_v42 }
  0xda   : > { %4853 = vst [vmem:[#allocation18_spill] sm:$0xff] %v3531_v45  ;;  %v542_v48 = vmax.f32 %v3531_v45, 0.0 }
  0xdb   : > { %829 = vrot.lane.b32.xlu2 %v736_v46, %s3184_s10  ;;  %v3622_v32 = vld [vmem:[#allocation2 + $0x78] sm:$0xff] }
  0xdc   : > { %620 = vst.msk [vmem:[#allocation2 + $0x81] sm:$0xff] %vm319_vm1, %v542_v48  ;;  %1211 = vrot.lane.b32.xlu1 %v3455_v3, %s3187_s15  ;;  %1739 = vrot.lane.b32.xlu0 %v3462_v6, %s3190_s18  ;;  %v563_v3 = vmax.f32 %v3571_v1, 0.0 }
  0xdd   : > { %685 = vst.msk [vmem:[#allocation3 + $0x50] sm:$0xff] %vm319_vm1, %v3622_v32 }
  0xde   : > { %641 = vst.msk [vmem:[#allocation2 + $0x181] sm:$0xff] %vm319_vm1, %v563_v3 }
  0xdf   : > { %v467_v52 = vpop.f32.mrf.mxu0 }
  0xe0   : > { %v3551_v53 = vadd.f32 %v3389_v28, %v467_v52 }
  0xe2   : > { %4854 = vst [vmem:[#allocation19_spill] sm:$0xff] %v3551_v53  ;;  %v543_v55 = vmax.f32 %v3551_v53, 0.0 }
  0xe3   : > { %781 = vrot.lane.b32.xlu2 %v3521_v37, %s3184_s10 }
  0xe4   : > { %621 = vst.msk [vmem:[#allocation2 + $0x91] sm:$0xff] %vm319_vm1, %v543_v55  ;;  %974 = vrot.lane.b32.xlu1 %v905_v57, %s3185_s11  ;;  %831 = vrot.lane.b32.xlu0 %v737_v56, %s3184_s10  ;;  %v3651_v56 = vld [vmem:[#allocation2 + $0x61] sm:$0xff] }
  0xe7   : > { %v470_v60 = vpop.f32.mrf.mxu0 }
  0xe8   : > { %v3561_v61 = vadd.f32 %v3389_v28, %v470_v60  ;;  %v3658_v60 = vld [vmem:[#allocation2 + $0x80] sm:$0xff] }
  0xe9   : > { %686 = vst.msk [vmem:[#allocation3 + $0x58] sm:$0xff] %vm319_vm1, %v3658_v60 }
  0xea   : > { %4855 = vst [vmem:[#allocation20_spill] sm:$0xff] %v3561_v61  ;;  %v544_v63 = vmax.f32 %v3561_v61, 0.0 }
  0xeb   : > { %2125 = vrot.lane.b32.xlu2 %v905_v57, %s3191_s19 }
  0xec   : > { %622 = vst.msk [vmem:[#allocation2 + $0x99] sm:$0xff] %vm319_vm1, %v544_v63  ;;  %1163 = vrot.lane.b32.xlu1 %v3462_v6, %s3187_s15  ;;  %783 = vrot.lane.b32.xlu0 %v3565_v0, %s3184_s10 }
  0xef   : > { %v473_v4 = vpop.f32.mrf.mxu0 }
  0xf0   : > { %v3577_v5 = vadd.f32 %v3389_v28, %v473_v4  ;;  %v1123_v4 = vld [vmem:[#allocation2 + $0x180] sm:$0xff] }
  0xf2   : > { %4857 = vst [vmem:[#allocation22_spill] sm:$0xff] %v3577_v5  ;;  %v545_v6 = vmax.f32 %v3577_v5, 0.0 }
  0xf3   : > { %1213 = vrot.lane.b32.xlu2 %v1121_v38, %s3187_s15  ;;  %v3632_v38 = vld [vmem:[#allocation2 + $0x4a] sm:$0xff] }
  0xf4   : > { %623 = vst.msk [vmem:[#allocation2 + $0xa9] sm:$0xff] %vm319_vm1, %v545_v6  ;;  %2123 = vrot.lane.b32.xlu1 %v3507_v29, %s3191_s19  ;;  %1026 = vrot.lane.b32.xlu0 %v931_v10, %s3185_s11  ;;  %v3672_v6 = vld [vmem:[#allocation2 + $0x69] sm:$0xff] }
  0xf7   : > { %v476_v13 = vpop.f32.mrf.mxu0 }
  0xf8   : > { %v3592_v14 = vadd.f32 %v3389_v28, %v476_v13 }
  0xfa   : > { %4859 = vst [vmem:[#allocation24_spill] sm:$0xff] %v3592_v14  ;;  %v546_v15 = vmax.f32 %v3592_v14, 0.0 }
  0xfb   : > { %1165 = vrot.lane.b32.xlu2 %v3536_v49, %s3187_s15 }
  0xfc   : > { %624 = vst.msk [vmem:[#allocation2 + $0xb1] sm:$0xff] %vm319_vm1, %v546_v15  ;;  %1932 = vrot.lane.b32.xlu1 %v3521_v37, %s3189_s17  ;;  %1215 = vrot.lane.b32.xlu0 %v1122_v41, %s3187_s15  ;;  %v738_v41 = vld [vmem:[#allocation2 + $0x171] sm:$0xff] }
  0xfd   : > { %v3598_v16 = vpop.permute.xlu2 %1018 }
  0xff   : > { %v479_v19 = vpop.f32.mrf.mxu0 }
 0x100   : > { %v3605_v20 = vadd.f32 %v3389_v28, %v479_v19  ;;  %v1124_v19 = vld [vmem:[#allocation2 + $0x188] sm:$0xff] }
 0x102   : > { %4860 = vst [vmem:[#allocation25_spill] sm:$0xff] %v3605_v20  ;;  %v547_v23 = vmax.f32 %v3605_v20, 0.0 }
 0x103   : > { %1024 = vrot.lane.b32.xlu2 %v930_v21, %s3185_s11  ;;  %v3884_v44 = vld [vmem:[#allocation2 + $0xaa] sm:$0xff] }
 0x104   : > { %625 = vst.msk [vmem:[#allocation2 + $0xc1] sm:$0xff] %vm319_vm1, %v547_v23  ;;  %1358 = vrot.lane.b32.xlu1 %v3565_v0, %s3186_s14  ;;  %978 = vrot.lane.b32.xlu0 %v3609_v25, %s3185_s11 }
 0x105   : > { %v971_v26 = vpop.permute.xlu2 %970 }
 0x107   : > { %v482_v36 = vpop.f32.mrf.mxu0 }
 0x108   : > { %v3630_v37 = vadd.f32 %v3389_v28, %v482_v36 }
 0x10a   : > { %4861 = vst [vmem:[#allocation26_spill] sm:$0xff] %v3630_v37  ;;  %v548_v40 = vmax.f32 %v3630_v37, 0.0 }
 0x10b   : > { %976 = vrot.lane.b32.xlu2 %v3632_v38, %s3185_s11 }
 0x10c   : > { %626 = vst.msk [vmem:[#allocation2 + $0xc9] sm:$0xff] %vm319_vm1, %v548_v40  ;;  %833 = vrot.lane.b32.xlu1 %v738_v41, %s3184_s10  ;;  %1167 = vrot.lane.b32.xlu0 %v3546_v51, %s3187_s15  ;;  %v3694_v40 = vld [vmem:[#allocation2 + $0x6a] sm:$0xff] }
 0x10d   : > { %v1160_v42 = vpop.permute.xlu2 %1159 }
 0x10e   : > { %1255 = vst.msk [vmem:[#allocation3 + $0x8] sm:$0xff] %vm1253_vm6, %v1160_v42  ;;  %v776_v43 = vpop.permute.xlu1 %775  ;;  %v1351_v46 = vpop.permute.xlu0 %1350 }
 0x10f   : > { %870 = vst.msk [vmem:[#allocation3 + $0x10] sm:$0xff] %vm867_vm4, %v776_v43  ;;  %v485_v48 = vpop.f32.mrf.mxu0  ;;  %v3704_v43 = vld [vmem:[#allocation2 + $0x7a] sm:$0xff] }
 0x110   : > { %v3646_v52 = vadd.f32 %v3389_v28, %v485_v48  ;;  %v3708_v48 = vld [vmem:[#allocation2 + $0x62] sm:$0xff] }
 0x112   : > { %4862 = vst [vmem:[#allocation27_spill] sm:$0xff] %v3646_v52  ;;  %v549_v55 = vmax.f32 %v3646_v52, 0.0 }
 0x113   : > { %1360 = vrot.lane.b32.xlu2 %v3643_v50, %s3186_s14 }
 0x114   : > { %627 = vst.msk [vmem:[#allocation2 + $0xd9] sm:$0xff] %vm319_vm1, %v549_v55  ;;  %785 = vrot.lane.b32.xlu1 %v3643_v50, %s3184_s10  ;;  %1362 = vrot.lane.b32.xlu0 %v3651_v56, %s3186_s14 }
 0x115   : > { %v1546_v57 = vpop.permute.xlu2 %1545 }
 0x116   : > { %v1158_v59 = vpop.permute.xlu1 %1157  ;;  %v3660_v62 = vpop.permute.xlu0 %825 }
 0x117   : > { %1254 = vst.msk [vmem:[#allocation3] sm:$0xff] %vm1253_vm6, %v1158_v59  ;;  %v488_v63 = vpop.f32.mrf.mxu0  ;;  %v3715_v59 = vld [vmem:[#allocation2 + $0x98] sm:$0xff] }
 0x118   : > { %v3664_v3 = vadd.f32 %v3389_v28, %v488_v63  ;;  %1447 = vst.msk [vmem:[#allocation3] sm:$0xff] %vm1446_vm7, %v1351_v46  ;;  %v3706_v46 = vld [vmem:[#allocation2 + $0x90] sm:$0xff] }
 0x119   : > { %687 = vst.msk [vmem:[#allocation3 + $0x60] sm:$0xff] %vm319_vm1, %v3706_v46 }
 0x11a   : > { %4863 = vst [vmem:[#allocation28_spill] sm:$0xff] %v3664_v3  ;;  %v550_v7 = vmax.f32 %v3664_v3, 0.0 }
 0x11b   : > { %787 = vrot.lane.b32.xlu2 %v3651_v56, %s3184_s10  ;;  %688 = vst.msk [vmem:[#allocation3 + $0x68] sm:$0xff] %vm319_vm1, %v3715_v59  ;;  %v3912_v52 = vld [vmem:[#allocation2 + $0xd9] sm:$0xff] }
 0x11c   : > { %628 = vst.msk [vmem:[#allocation2 + $0xe1] sm:$0xff] %vm319_vm1, %v550_v7  ;;  %1217 = vrot.lane.b32.xlu1 %v1123_v4, %s3187_s15  ;;  %789 = vrot.lane.b32.xlu0 %v3672_v6, %s3184_s10 }
 0x11d   : > { %v780_v10 = vpop.permute.xlu2 %779 }
 0x11e   : > { %872 = vst.msk [vmem:[#allocation3 + $0x20] sm:$0xff] %vm867_vm4, %v780_v10  ;;  %v778_v12 = vpop.permute.xlu1 %777  ;;  %v3679_v13 = vpop.permute.xlu0 %1209 }
 0x11f   : > { %871 = vst.msk [vmem:[#allocation3 + $0x18] sm:$0xff] %vm867_vm4, %v778_v12  ;;  %v491_v15 = vpop.f32.mrf.mxu0 }
 0x120   : > { %1064 = vst.msk [vmem:[#allocation3 + $0x18] sm:$0xff] %vm1060_vm5, %v971_v26  ;;  %v3684_v18 = vadd.f32 %v3389_v28, %v491_v15  ;;  %v3729_v15 = vld [vmem:[#allocation2 + $0x81] sm:$0xff] }
 0x122   : > { %4864 = vst [vmem:[#allocation29_spill] sm:$0xff] %v3684_v18  ;;  %v551_v21 = vmax.f32 %v3684_v18, 0.0 }
 0x123   : > { %1219 = vrot.lane.b32.xlu2 %v1124_v19, %s3187_s15 }
 0x124   : > { %629 = vst.msk [vmem:[#allocation2 + $0xf1] sm:$0xff] %vm319_vm1, %v551_v21  ;;  %1169 = vrot.lane.b32.xlu1 %v3614_v27, %s3187_s15  ;;  %1173 = vrot.lane.b32.xlu0 %v3622_v32, %s3187_s15 }
 0x125   : > { %v1355_v23 = vpop.permute.xlu2 %1354 }
 0x126   : > { %v969_v34 = vpop.permute.xlu1 %968  ;;  %v1162_v36 = vpop.permute.xlu0 %1161 }
 0x127   : > { %1063 = vst.msk [vmem:[#allocation3 + $0x10] sm:$0xff] %vm1060_vm5, %v969_v34  ;;  %v494_v26 = vpop.f32.mrf.mxu0 }
 0x128   : > { %1256 = vst.msk [vmem:[#allocation3 + $0x10] sm:$0xff] %vm1253_vm6, %v1162_v36  ;;  %v3698_v41 = vadd.f32 %v3389_v28, %v494_v26  ;;  %v3742_v36 = vld [vmem:[#allocation2 + $0x79] sm:$0xff] }
 0x129   : > { %1449 = vst.msk [vmem:[#allocation3 + $0x10] sm:$0xff] %vm1446_vm7, %v1355_v23 }
 0x12a   : > { %4865 = vst [vmem:[#allocation30_spill] sm:$0xff] %v3698_v41  ;;  %v552_v42 = vmax.f32 %v3698_v41, 0.0 }
 0x12b   : > { %982 = vrot.lane.b32.xlu2 %v3694_v40, %s3185_s11 }
 0x12c   : > { %630 = vst.msk [vmem:[#allocation2 + $0xf9] sm:$0xff] %vm319_vm1, %v552_v42  ;;  %980 = vrot.lane.b32.xlu1 %v3708_v48, %s3185_s11  ;;  %984 = vrot.lane.b32.xlu0 %v3704_v43, %s3185_s11  ;;  %v3748_v42 = vld [vmem:[#allocation2 + $0x91] sm:$0xff] }
 0x12d   : > { %v1738_v55 = vpop.permute.xlu2 %1737 }
 0x12e   : > { %v1353_v63 = vpop.permute.xlu1 %1352  ;;  %v1931_v4 = vpop.permute.xlu0 %1930 }
 0x12f   : > { %1448 = vst.msk [vmem:[#allocation3 + $0x8] sm:$0xff] %vm1446_vm7, %v1353_v63  ;;  %v497_v7 = vpop.f32.mrf.mxu0 }
 0x130   : > { %v3723_v10 = vadd.f32 %v3389_v28, %v497_v7  ;;  %1641 = vst.msk [vmem:[#allocation3 + $0x8] sm:$0xff] %vm1639_vm8, %v1546_v57 }
 0x132   : > { %4866 = vst [vmem:[#allocation31_spill] sm:$0xff] %v3723_v10  ;;  %v553_v12 = vmax.f32 %v3723_v10, 0.0 }
 0x133   : > { %1171 = vrot.lane.b32.xlu2 %v3618_v30, %s3187_s15  ;;  %v3977_v17 = vld [vmem:[#allocation2 + $0xf9] sm:$0xff] }
 0x134   : > { %631 = vst.msk [vmem:[#allocation2 + $0x109] sm:$0xff] %vm319_vm1, %v553_v12  ;;  %1364 = vrot.lane.b32.xlu1 %v3672_v6, %s3186_s14  ;;  %1368 = vrot.lane.b32.xlu0 %v3729_v15, %s3186_s14  ;;  %v3994_v2 = vld [vmem:[#allocation2 + $0xfa] sm:$0xff]  ;;  %v4004_v33 = vld [vmem:[#allocation2 + $0xf2] sm:$0xff] }
 0x135   : > { %v830_v19 = vpop.permute.xlu2 %829 }
 0x136   : > { %897 = vst.msk [vmem:[#allocation3 + $0xe8] sm:$0xff] %vm867_vm4, %v830_v19  ;;  %v1544_v57 = vpop.permute.xlu1 %1543  ;;  %v1021_v21 = vpop.permute.xlu0 %1020 }
 0x137   : > { %1640 = vst.msk [vmem:[#allocation3] sm:$0xff] %vm1639_vm8, %v1544_v57  ;;  %v500_v23 = vpop.f32.mrf.mxu0  ;;  %v3765_v57 = vld [vmem:[#allocation2 + $0x9a] sm:$0xff] }
 0x138   : > { %1834 = vst.msk [vmem:[#allocation3] sm:$0xff] %vm1833_vm9, %v1738_v55  ;;  %v3740_v34 = vadd.f32 %v3389_v28, %v500_v23  ;;  %v3767_v23 = vld [vmem:[#allocation2 + $0xc0] sm:$0xff] }
 0x139   : > { %2027 = vst.msk [vmem:[#allocation3] sm:$0xff] %vm2026_vm10, %v1931_v4 }
 0x13a   : > { %4867 = vst [vmem:[#allocation32_spill] sm:$0xff] %v3740_v34  ;;  %v554_v26 = vmax.f32 %v3740_v34, 0.0  ;;  %v3822_v34 = vld [vmem:[#allocation2 + $0x92] sm:$0xff] }
 0x13b   : > { %1366 = vrot.lane.b32.xlu2 %v3742_v36, %s3186_s14  ;;  %691 = vst.msk [vmem:[#allocation3 + $0x80] sm:$0xff] %vm319_vm1, %v3767_v23  ;;  %v3929_v14 = vld [vmem:[#allocation2 + $0x108] sm:$0xff] }
 0x13c   : > { %632 = vst.msk [vmem:[#allocation2 + $0x111] sm:$0xff] %vm319_vm1, %v554_v26  ;;  %791 = vrot.lane.b32.xlu1 %v3742_v36, %s3184_s10  ;;  %795 = vrot.lane.b32.xlu0 %v3748_v42, %s3184_s10  ;;  %v3769_v26 = vld [vmem:[#allocation2 + $0x82] sm:$0xff] }
 0x13d   : > { %v782_v63 = vpop.permute.xlu2 %781  ;;  %4872 = vst [vmem:[#allocation37_spill] sm:$0xff] %v3929_v14 }
 0x13e   : > { %873 = vst.msk [vmem:[#allocation3 + $0x28] sm:$0xff] %vm867_vm4, %v782_v63  ;;  %v828_v55 = vpop.permute.xlu1 %827  ;;  %v973_v4 = vpop.permute.xlu0 %972 }
 0x13f   : > { %896 = vst.msk [vmem:[#allocation3 + $0xe0] sm:$0xff] %vm867_vm4, %v828_v55  ;;  %v503_v7 = vpop.f32.mrf.mxu0  ;;  %v3780_v55 = vld [vmem:[#allocation2 + $0xb0] sm:$0xff] }
 0x140   : > { %1065 = vst.msk [vmem:[#allocation3 + $0x20] sm:$0xff] %vm1060_vm5, %v973_v4  ;;  %v3759_v12 = vadd.f32 %v3389_v28, %v503_v7  ;;  %v2288_v4 = vld [vmem:[%s4795_s3 + $0x20] sm:$0xf] }
 0x141   : > { %1089 = vst.msk [vmem:[#allocation3 + $0xe0] sm:$0xff] %vm1060_vm5, %v1021_v21  ;;  %v3778_v21 = vld [vmem:[#allocation2 + $0xa8] sm:$0xff]  ;;  %3078 = vmatpush.msk.msra.mxu1 %vm416_vm0, %v2288_v4  ;;  %3147 = vmatpush.msk.msrb.mxu3 %vm416_vm0, %v2288_v4 }
 0x142   : > { %4868 = vst [vmem:[#allocation33_spill] sm:$0xff] %v3759_v12  ;;  %v555_v19 = vmax.f32 %v3759_v12, 0.0  ;;  %v2285_v4 = vld [vmem:[%s4795_s3 + $0x8] sm:$0xff] }
 0x143   : > { %793 = vrot.lane.b32.xlu2 %v3729_v15, %s3184_s10  ;;  %689 = vst.msk [vmem:[#allocation3 + $0x70] sm:$0xff] %vm319_vm1, %v3778_v21  ;;  %2405 = vmatpush.msra.mxu1 %v2287_v8  ;;  %v4017_v9 = vld [vmem:[#allocation2 + $0x111] sm:$0xff] }
 0x144   : > { %633 = vst.msk [vmem:[#allocation2 + $0x121] sm:$0xff] %vm319_vm1, %v555_v19  ;;  %986 = vrot.lane.b32.xlu1 %v3769_v26, %s3185_s11  ;;  %990 = vrot.lane.b32.xlu0 %v3765_v57, %s3185_s11 }
 0x145   : > { %v3774_v63 = vpop.permute.xlu2 %2125  ;;  %690 = vst.msk [vmem:[#allocation3 + $0x78] sm:$0xff] %vm319_vm1, %v3780_v55  ;;  %3148 = vmatpush.msrb.mxu3 %v2287_v8  ;;  %2406 = vmatpush.msra.mxu1 %v2286_v54 }
 0x146   : > { %v1023_v7 = vpop.permute.xlu1 %1022  ;;  %v1357_v19 = vpop.permute.xlu0 %1356  ;;  %697 = vst.msk [vmem:[#allocation3 + $0xb0] sm:$0xff] %vm319_vm1, %v3929_v14 }
 0x147   : > { %1090 = vst.msk [vmem:[#allocation3 + $0xe8] sm:$0xff] %vm1060_vm5, %v1023_v7  ;;  %v506_v1 = vpop.f32.mrf.mxu0  ;;  %3149 = vmatpush.msrb.mxu3 %v2286_v54  ;;  %2407 = vmatpush.msra.mxu1 %v2285_v4 }
 0x148   : > { %v3801_v11 = vadd.f32 %v3389_v28, %v506_v1  ;;  %v2284_v1 = vld [vmem:[%s4795_s3] sm:$0xff] }
 0x149   : > { %3150 = vmatpush.msrb.mxu3 %v2285_v4  ;;  %2408 = vmatpush.msra.mxu1 %v2284_v1 }
 0x14a   : > { %4869 = vst [vmem:[#allocation34_spill] sm:$0xff] %v3801_v11  ;;  %v556_v35 = vmax.f32 %v3801_v11, 0.0  ;;  %v3899_v11 = vld [vmem:[#allocation2 + $0xc9] sm:$0xff] }
 0x14b   : > { %1177 = vrot.lane.b32.xlu2 %v3706_v46, %s3187_s15  ;;  %3151 = vmatpush.msrb.mxu3 %v2284_v1  ;;  %v3836_v1 = vld [vmem:[#allocation2 + $0xc8] sm:$0xff] }
 0x14c   : > { %634 = vst.msk [vmem:[#allocation2 + $0x129] sm:$0xff] %vm319_vm1, %v556_v35  ;;  %1175 = vrot.lane.b32.xlu1 %v3658_v60, %s3187_s15  ;;  %1179 = vrot.lane.b32.xlu0 %v3715_v59, %s3187_s15 }
 0x14d   : > { %v1214_v7 = vpop.permute.xlu2 %1213  ;;  %692 = vst.msk [vmem:[#allocation3 + $0x88] sm:$0xff] %vm319_vm1, %v3836_v1 }
 0x14e   : > { %1282 = vst.msk [vmem:[#allocation3 + $0xe0] sm:$0xff] %vm1253_vm6, %v1214_v7  ;;  %v1212_v8 = vpop.permute.xlu1 %1211  ;;  %v1740_v54 = vpop.permute.xlu0 %1739  ;;  %v3827_v7 = vld [vmem:[#allocation2 + $0xa9] sm:$0xff] }
 0x14f   : > { %v509_v24 = vpop.f32.mrf.mxu0  ;;  %1835 = vst.msk [vmem:[#allocation3 + $0x8] sm:$0xff] %vm1833_vm9, %v1740_v54  ;;  %v3839_v54 = vld [vmem:[#allocation2 + $0x99] sm:$0xff] }
 0x150   : > { %v3820_v35 = vadd.f32 %v3389_v28, %v509_v24 }
 0x152   : > { %4870 = vst [vmem:[#allocation35_spill] sm:$0xff] %v3820_v35  ;;  %v557_v12 = vmax.f32 %v3820_v35, 0.0 }
 0x153   : > { %988 = vrot.lane.b32.xlu2 %v3822_v34, %s3185_s11 }
 0x154   : > { %635 = vst.msk [vmem:[#allocation2 + $0x139] sm:$0xff] %vm319_vm1, %v557_v12  ;;  %1370 = vrot.lane.b32.xlu1 %v3748_v42, %s3186_s14  ;;  %1374 = vrot.lane.b32.xlu0 %v3827_v7, %s3186_s14  ;;  %v3845_v12 = vld [vmem:[#allocation2 + $0xb1] sm:$0xff] }
 0x155   : > { %v1166_v4 = vpop.permute.xlu2 %1165 }
 0x156   : > { %1258 = vst.msk [vmem:[#allocation3 + $0x20] sm:$0xff] %vm1253_vm6, %v1166_v4  ;;  %v975_v28 = vpop.permute.xlu1 %974  ;;  %v832_v24 = vpop.permute.xlu0 %831 }
 0x157   : > { %1066 = vst.msk [vmem:[#allocation3 + $0x28] sm:$0xff] %vm1060_vm5, %v975_v28 }
 0x158   : > { %898 = vst.msk [vmem:[#allocation3 + $0xf0] sm:$0xff] %vm867_vm4, %v832_v24 }
 0x15b   : > { %1372 = vrot.lane.b32.xlu2 %v3839_v54, %s3186_s14  ;;  %v3849_v4 = vld [vmem:[#allocation2 + $0x140] sm:$0xff] }
 0x15c   : > { %797 = vrot.lane.b32.xlu1 %v3839_v54, %s3184_s10  ;;  %4871 = vst [vmem:[#allocation36_spill] sm:$0xff] %v3849_v4  ;;  %801 = vrot.lane.b32.xlu0 %v3845_v12, %s3184_s10 }
 0x15d   : > { %v1025_v35 = vpop.permute.xlu2 %1024  ;;  %702 = vst.msk [vmem:[#allocation3 + $0xd8] sm:$0xff] %vm319_vm1, %v3849_v4 }
 0x15e   : > { %1091 = vst.msk [vmem:[#allocation3 + $0xf0] sm:$0xff] %vm1060_vm5, %v1025_v35  ;;  %v1164_v28 = vpop.permute.xlu1 %1163  ;;  %v784_v24 = vpop.permute.xlu0 %783 }
 0x15f   : > { %1257 = vst.msk [vmem:[#allocation3 + $0x18] sm:$0xff] %vm1253_vm6, %v1164_v28 }
 0x160   : > { %874 = vst.msk [vmem:[#allocation3 + $0x30] sm:$0xff] %vm867_vm4, %v784_v24  ;;  %v3874_v24 = vld [vmem:[#allocation2 + $0xd8] sm:$0xff] }
 0x161   : > { %1450 = vst.msk [vmem:[#allocation3 + $0x18] sm:$0xff] %vm1446_vm7, %v1357_v19 }
 0x162   : > { %895 = vst.msk [vmem:[#allocation3 + $0xd8] sm:$0xff] %vm867_vm4, %v3660_v62  ;;  %v3872_v62 = vld [vmem:[#allocation2 + $0xb2] sm:$0xff] }
 0x163   : > { %799 = vrot.lane.b32.xlu2 %v3827_v7, %s3184_s10  ;;  %1088 = vst.msk [vmem:[#allocation3 + $0xd8] sm:$0xff] %vm1060_vm5, %v3598_v16  ;;  %v3880_v16 = vld [vmem:[#allocation2 + $0xc2] sm:$0xff] }
 0x164   : > { %1181 = vrot.lane.b32.xlu1 %v3778_v21, %s3187_s15  ;;  %1281 = vst.msk [vmem:[#allocation3 + $0xd8] sm:$0xff] %vm1253_vm6, %v1212_v8  ;;  %1185 = vrot.lane.b32.xlu0 %v3767_v23, %s3187_s15  ;;  %v3882_v8 = vld [vmem:[#allocation2 + $0xe0] sm:$0xff] }
 0x165   : > { %v977_v35 = vpop.permute.xlu2 %976  ;;  %693 = vst.msk [vmem:[#allocation3 + $0x90] sm:$0xff] %vm319_vm1, %v3874_v24 }
 0x166   : > { %1067 = vst.msk [vmem:[#allocation3 + $0x30] sm:$0xff] %vm1060_vm5, %v977_v35  ;;  %v2124_v19 = vpop.permute.xlu1 %2123  ;;  %v1027_v28 = vpop.permute.xlu0 %1026 }
 0x167   : > { %2220 = vst.msk [vmem:[#allocation3] sm:$0xff] %vm2219_vm11, %v2124_v19 }
 0x168   : > { %694 = vst.msk [vmem:[#allocation3 + $0x98] sm:$0xff] %vm319_vm1, %v3882_v8 }
 0x16b   : > { %994 = vrot.lane.b32.xlu2 %v3872_v62, %s3185_s11 }
 0x16c   : > { %992 = vrot.lane.b32.xlu1 %v3884_v44, %s3185_s11  ;;  %996 = vrot.lane.b32.xlu0 %v3880_v16, %s3185_s11 }
 0x16d   : > { %v1361_v35 = vpop.permute.xlu2 %1360 }
 0x16e   : > { %v1933_v19 = vpop.permute.xlu1 %1932  ;;  %v2252_v18 = vld [vmem:[#allocation3] sm:$0xff]  ;;  %v1216_v41 = vpop.permute.xlu0 %1215 }
 0x16f   : > { %2028 = vst.msk [vmem:[#allocation3 + $0x8] sm:$0xff] %vm2026_vm10, %v1933_v19  ;;  %3079 = vmatmul.msk.f32.vlgmr.msra.gmra.mxu1 %vm2293_vm12, %v2252_v18 }
 0x170   : > { %1283 = vst.msk [vmem:[#allocation3 + $0xe8] sm:$0xff] %vm1253_vm6, %v1216_v41 }
 0x171   : > { %2221 = vst.msk [vmem:[#allocation3 + $0x8] sm:$0xff] %vm2219_vm11, %v3774_v63  ;;  %v3908_v63 = vld [vmem:[#allocation2 + $0xc1] sm:$0xff] }
 0x173   : > { %1183 = vrot.lane.b32.xlu2 %v3780_v55, %s3187_s15 }
 0x174   : > { %1376 = vrot.lane.b32.xlu1 %v3845_v12, %s3186_s14  ;;  %1380 = vrot.lane.b32.xlu0 %v3899_v11, %s3186_s14 }
 0x175   : > { %v788_v37 = vpop.permute.xlu2 %787 }
 0x176   : > { %876 = vst.msk [vmem:[#allocation3 + $0x40] sm:$0xff] %vm867_vm4, %v788_v37  ;;  %v1359_v18 = vpop.permute.xlu1 %1358  ;;  %v979_v19 = vpop.permute.xlu0 %978 }
 0x177   : > { %1451 = vst.msk [vmem:[#allocation3 + $0x20] sm:$0xff] %vm1446_vm7, %v1359_v18  ;;  %v3924_v18 = vld [vmem:[#allocation2 + $0xe2] sm:$0xff] }
 0x178   : > { %v2253_v41 = vld [vmem:[#allocation3 + $0x8] sm:$0xff] }
 0x179   : > { %3080 = vmatmul.msk.f32.gmra.mxu1 %vm2293_vm12, %v2253_v41  ;;  %v3927_v41 = vld [vmem:[#allocation2 + $0xca] sm:$0xff] }
 0x17b   : > { %1378 = vrot.lane.b32.xlu2 %v3908_v63, %s3186_s14 }
 0x17c   : > { %803 = vrot.lane.b32.xlu1 %v3908_v63, %s3184_s10  ;;  %807 = vrot.lane.b32.xlu0 %v3912_v52, %s3184_s10 }
 0x17d   : > { %v1220_v10 = vpop.permute.xlu2 %1219 }
 0x17e   : > { %v834_v37 = vpop.permute.xlu1 %833  ;;  %v1168_v5 = vpop.permute.xlu0 %1167 }
 0x17f   : > { %899 = vst.msk [vmem:[#allocation3 + $0xf8] sm:$0xff] %vm867_vm4, %v834_v37 }
 0x180   : > { %1259 = vst.msk [vmem:[#allocation3 + $0x28] sm:$0xff] %vm1253_vm6, %v1168_v5  ;;  %v3937_v5 = vld [vmem:[#allocation2 + $0xf0] sm:$0xff] }
 0x181   : > { %1452 = vst.msk [vmem:[#allocation3 + $0x28] sm:$0xff] %vm1446_vm7, %v1361_v35  ;;  %v3939_v35 = vld [vmem:[#allocation2 + $0xf8] sm:$0xff] }
 0x182   : > { %1092 = vst.msk [vmem:[#allocation3 + $0xf8] sm:$0xff] %vm1060_vm5, %v1027_v28 }
 0x183   : > { %805 = vrot.lane.b32.xlu2 %v3899_v11, %s3184_s10  ;;  %1285 = vst.msk [vmem:[#allocation3 + $0xf8] sm:$0xff] %vm1253_vm6, %v1220_v10 }
 0x184   : > { %998 = vrot.lane.b32.xlu1 %v3927_v41, %s3185_s11  ;;  %1002 = vrot.lane.b32.xlu0 %v3924_v18, %s3185_s11  ;;  %695 = vst.msk [vmem:[#allocation3 + $0xa0] sm:$0xff] %vm319_vm1, %v3937_v5 }
 0x185   : > { %v983_v3 = vpop.permute.xlu2 %982  ;;  %696 = vst.msk [vmem:[#allocation3 + $0xa8] sm:$0xff] %vm319_vm1, %v3939_v35 }
 0x186   : > { %v786_v28 = vpop.permute.xlu1 %785  ;;  %v1363_v10 = vpop.permute.xlu0 %1362 }
 0x187   : > { %875 = vst.msk [vmem:[#allocation3 + $0x38] sm:$0xff] %vm867_vm4, %v786_v28  ;;  %v3961_v28 = vld [vmem:[#allocation2 + $0xf1] sm:$0xff] }
 0x188   : > { %1068 = vst.msk [vmem:[#allocation3 + $0x38] sm:$0xff] %vm1060_vm5, %v979_v19  ;;  %v3957_v19 = vld [vmem:[#allocation2 + $0xda] sm:$0xff] }
 0x18b   : > { %1189 = vrot.lane.b32.xlu2 %v3874_v24, %s3187_s15 }
 0x18c   : > { %1187 = vrot.lane.b32.xlu1 %v3836_v1, %s3187_s15  ;;  %1191 = vrot.lane.b32.xlu0 %v3882_v8, %s3187_s15 }
 0x18d   : > { %v1172_v37 = vpop.permute.xlu2 %1171 }
 0x18e   : > { %1261 = vst.msk [vmem:[#allocation3 + $0x38] sm:$0xff] %vm1253_vm6, %v1172_v37  ;;  %v1218_v45 = vpop.permute.xlu1 %1217  ;;  %v790_v53 = vpop.permute.xlu0 %789 }
 0x18f   : > { %1284 = vst.msk [vmem:[#allocation3 + $0xf0] sm:$0xff] %vm1253_vm6, %v1218_v45 }
 0x190   : > { %877 = vst.msk [vmem:[#allocation3 + $0x48] sm:$0xff] %vm867_vm4, %v790_v53  ;;  %v3968_v53 = vld [vmem:[#allocation2 + $0x110] sm:$0xff] }
 0x191   : > { %1070 = vst.msk [vmem:[#allocation3 + $0x48] sm:$0xff] %vm1060_vm5, %v983_v3  ;;  %v3971_v3 = vld [vmem:[#allocation2 + $0xe1] sm:$0xff] }
 0x192   : > { %698 = vst.msk [vmem:[#allocation3 + $0xb8] sm:$0xff] %vm319_vm1, %v3968_v53 }
 0x193   : > { %1000 = vrot.lane.b32.xlu2 %v3957_v19, %s3185_s11 }
 0x194   : > { %1382 = vrot.lane.b32.xlu1 %v3912_v52, %s3186_s14  ;;  %1386 = vrot.lane.b32.xlu0 %v3961_v28, %s3186_s14 }
 0x195   : > { %v1367_v20 = vpop.permute.xlu2 %1366 }
 0x196   : > { %v1170_v37 = vpop.permute.xlu1 %1169  ;;  %v1174_v45 = vpop.permute.xlu0 %1173 }
 0x197   : > { %1260 = vst.msk [vmem:[#allocation3 + $0x30] sm:$0xff] %vm1253_vm6, %v1170_v37 }
 0x198   : > { %1453 = vst.msk [vmem:[#allocation3 + $0x30] sm:$0xff] %vm1446_vm7, %v1363_v10 }
 0x19b   : > { %1384 = vrot.lane.b32.xlu2 %v3971_v3, %s3186_s14 }
 0x19c   : > { %809 = vrot.lane.b32.xlu1 %v3971_v3, %s3184_s10  ;;  %813 = vrot.lane.b32.xlu0 %v3977_v17, %s3184_s10 }
 0x19d   : > { %v794_v22 = vpop.permute.xlu2 %793 }
 0x19e   : > { %879 = vst.msk [vmem:[#allocation3 + $0x58] sm:$0xff] %vm867_vm4, %v794_v22  ;;  %v981_v10 = vpop.permute.xlu1 %980  ;;  %v985_v37 = vpop.permute.xlu0 %984 }
 0x19f   : > { %1069 = vst.msk [vmem:[#allocation3 + $0x40] sm:$0xff] %vm1060_vm5, %v981_v10  ;;  %v3996_v10 = vld [vmem:[#allocation2 + $0x120] sm:$0xff] }
 0x1a0   : > { %1262 = vst.msk [vmem:[#allocation3 + $0x40] sm:$0xff] %vm1253_vm6, %v1174_v45  ;;  %v1116_v45 = vld [vmem:[#allocation2 + $0x128] sm:$0xff] }
 0x1a1   : > { %1455 = vst.msk [vmem:[#allocation3 + $0x40] sm:$0xff] %vm1446_vm7, %v1367_v20  ;;  %v4002_v20 = vld [vmem:[#allocation2 + $0x10a] sm:$0xff] }
 0x1a2   : > { %4873 = vst [vmem:[#allocation38_spill] sm:$0xff] %v3996_v10 }
 0x1a3   : > { %811 = vrot.lane.b32.xlu2 %v3961_v28, %s3184_s10  ;;  %699 = vst.msk [vmem:[#allocation3 + $0xc0] sm:$0xff] %vm319_vm1, %v3996_v10 }
 0x1a4   : > { %1193 = vrot.lane.b32.xlu1 %v3937_v5, %s3187_s15  ;;  %1197 = vrot.lane.b32.xlu0 %v3929_v14, %s3187_s15  ;;  %4874 = vst [vmem:[#allocation39_spill] sm:$0xff] %v4002_v20  ;;  %v4042_v14 = vld [vmem:[#allocation2 + $0x112] sm:$0xff] }
 0x1a5   : > { %v1178_v61 = vpop.permute.xlu2 %1177  ;;  %700 = vst.msk [vmem:[#allocation3 + $0xc8] sm:$0xff] %vm319_vm1, %v1116_v45 }
 0x1a6   : > { %v1365_v58 = vpop.permute.xlu1 %1364  ;;  %v1369_v22 = vpop.permute.xlu0 %1368 }
 0x1a7   : > { %1454 = vst.msk [vmem:[#allocation3 + $0x38] sm:$0xff] %vm1446_vm7, %v1365_v58 }
 0x1ab   : > { %1006 = vrot.lane.b32.xlu2 %v3994_v2, %s3185_s11 }
 0x1ac   : > { %1004 = vrot.lane.b32.xlu1 %v4004_v33, %s3185_s11  ;;  %1008 = vrot.lane.b32.xlu0 %v4002_v20, %s3185_s11 }
 0x1ad   : > { %v989_v31 = vpop.permute.xlu2 %988 }
 0x1ae   : > { %v792_v58 = vpop.permute.xlu1 %791  ;;  %v796_v39 = vpop.permute.xlu0 %795 }
 0x1af   : > { %878 = vst.msk [vmem:[#allocation3 + $0x50] sm:$0xff] %vm867_vm4, %v792_v58 }
 0x1b0   : > { %880 = vst.msk [vmem:[#allocation3 + $0x60] sm:$0xff] %vm867_vm4, %v796_v39 }
 0x1b1   : > { %1073 = vst.msk [vmem:[#allocation3 + $0x60] sm:$0xff] %vm1060_vm5, %v989_v31  ;;  %v4025_v31 = vld [vmem:[#allocation2 + $0x109] sm:$0xff] }
 0x1b2   : > { %1071 = vst.msk [vmem:[#allocation3 + $0x50] sm:$0xff] %vm1060_vm5, %v985_v37  ;;  %v4029_v37 = vld [vmem:[#allocation2 + $0x121] sm:$0xff] }
 0x1b3   : > { %1195 = vrot.lane.b32.xlu2 %v3939_v35, %s3187_s15  ;;  %1264 = vst.msk [vmem:[#allocation3 + $0x50] sm:$0xff] %vm1253_vm6, %v1178_v61 }
 0x1b4   : > { %1388 = vrot.lane.b32.xlu1 %v3977_v17, %s3186_s14  ;;  %1392 = vrot.lane.b32.xlu0 %v4017_v9, %s3186_s14  ;;  %4875 = vst [vmem:[#allocation40_spill] sm:$0xff] %v4025_v31 }
 0x1b5   : > { %v1373_v47 = vpop.permute.xlu2 %1372  ;;  %4876 = vst [vmem:[#allocation41_spill] sm:$0xff] %v4029_v37 }
 0x1b6   : > { %v987_v58 = vpop.permute.xlu1 %986  ;;  %v991_v39 = vpop.permute.xlu0 %990 }
 0x1b7   : > { %1072 = vst.msk [vmem:[#allocation3 + $0x58] sm:$0xff] %vm1060_vm5, %v987_v58  ;;  %v925_v58 = vld [vmem:[#allocation2 + $0x12a] sm:$0xff] }
 0x1bb   : > { %1390 = vrot.lane.b32.xlu2 %v4025_v31, %s3186_s14 }
 0x1bc   : > { %815 = vrot.lane.b32.xlu1 %v4025_v31, %s3184_s10  ;;  %819 = vrot.lane.b32.xlu0 %v4029_v37, %s3184_s10 }
 0x1bd   : > { %v800_v4 = vpop.permute.xlu2 %799 }
 0x1be   : > { %882 = vst.msk [vmem:[#allocation3 + $0x70] sm:$0xff] %vm867_vm4, %v800_v4  ;;  %v1176_v61 = vpop.permute.xlu1 %1175  ;;  %v1180_v20 = vpop.permute.xlu0 %1179  ;;  %v1117_v4 = vld [vmem:[#allocation2 + $0x138] sm:$0xff] }
 0x1bf   : > { %1263 = vst.msk [vmem:[#allocation3 + $0x48] sm:$0xff] %vm1253_vm6, %v1176_v61 }
 0x1c0   : > { %1265 = vst.msk [vmem:[#allocation3 + $0x58] sm:$0xff] %vm1253_vm6, %v1180_v20 }
 0x1c1   : > { %1458 = vst.msk [vmem:[#allocation3 + $0x58] sm:$0xff] %vm1446_vm7, %v1373_v47 }
 0x1c2   : > { %1456 = vst.msk [vmem:[#allocation3 + $0x48] sm:$0xff] %vm1446_vm7, %v1369_v22 }
 0x1c3   : > { %817 = vrot.lane.b32.xlu2 %v4017_v9, %s3184_s10  ;;  %701 = vst.msk [vmem:[#allocation3 + $0xd0] sm:$0xff] %vm319_vm1, %v1117_v4 }
 0x1c4   : > { %1010 = vrot.lane.b32.xlu1 %v4042_v14, %s3185_s11  ;;  %1014 = vrot.lane.b32.xlu0 %v925_v58, %s3185_s11  ;;  %v4057_v58 = vld [vmem:[#allocation2 + $0x122] sm:$0xff] }
 0x1c5   : > { %v995_v31 = vpop.permute.xlu2 %994 }
 0x1c6   : > { %v1371_v61 = vpop.permute.xlu1 %1370  ;;  %v1375_v20 = vpop.permute.xlu0 %1374 }
 0x1c7   : > { %1457 = vst.msk [vmem:[#allocation3 + $0x50] sm:$0xff] %vm1446_vm7, %v1371_v61  ;;  %v4059_v61 = vld [vmem:[#allocation2 + $0x129] sm:$0xff] }
 0x1c8   : > { %4877 = vst [vmem:[#allocation42_spill] sm:$0xff] %v4059_v61 }
 0x1cb   : > { %1201 = vrot.lane.b32.xlu2 %v3996_v10, %s3187_s15  ;;  %v2538_v10 = vld [vmem:[%s4797_s5] sm:$0xf] }
 0x1cc   : > { %1199 = vrot.lane.b32.xlu1 %v3968_v53, %s3187_s15  ;;  %1203 = vrot.lane.b32.xlu0 %v1116_v45, %s3187_s15 }
 0x1cd   : > { %v1184_v47 = vpop.permute.xlu2 %1183  ;;  %3111 = vmatpush.msk.msra.mxu2 %vm416_vm0, %v2538_v10  ;;  %3152 = vmatpush.msk.msra.mxu3 %vm416_vm0, %v2538_v10 }
 0x1ce   : > { %v798_v22 = vpop.permute.xlu1 %797  ;;  %v802_v37 = vpop.permute.xlu0 %801 }
 0x1cf   : > { %881 = vst.msk [vmem:[#allocation3 + $0x68] sm:$0xff] %vm867_vm4, %v798_v22 }
 0x1d0   : > { %883 = vst.msk [vmem:[#allocation3 + $0x78] sm:$0xff] %vm867_vm4, %v802_v37 }
 0x1d1   : > { %1076 = vst.msk [vmem:[#allocation3 + $0x78] sm:$0xff] %vm1060_vm5, %v995_v31 }
 0x1d2   : > { %1074 = vst.msk [vmem:[#allocation3 + $0x68] sm:$0xff] %vm1060_vm5, %v991_v39 }
 0x1d3   : > { %1012 = vrot.lane.b32.xlu2 %v4057_v58, %s3185_s11  ;;  %1267 = vst.msk [vmem:[#allocation3 + $0x68] sm:$0xff] %vm1253_vm6, %v1184_v47  ;;  %v4084_v47 = vld [vmem:[#allocation2 + $0x139] sm:$0xff] }
 0x1d4   : > { %821 = vrot.lane.b32.xlu1 %v4059_v61, %s3184_s10  ;;  %1547 = vrot.lane.b32.xlu0 %v3507_v29, %s3188_s16 }
 0x1d5   : > { %v1379_v45 = vpop.permute.xlu2 %1378 }
 0x1d6   : > { %v1182_v31 = vpop.permute.xlu1 %1181  ;;  %v1186_v37 = vpop.permute.xlu0 %1185 }
 0x1d7   : > { %1266 = vst.msk [vmem:[#allocation3 + $0x60] sm:$0xff] %vm1253_vm6, %v1182_v31  ;;  %v1118_v31 = vld [vmem:[#allocation2 + $0x140] sm:$0xff] }
 0x1d8   : > { %1459 = vst.msk [vmem:[#allocation3 + $0x60] sm:$0xff] %vm1446_vm7, %v1375_v20 }
 0x1db   : > { %1934 = vrot.lane.b32.xlu2 %v3565_v0, %s3189_s17  ;;  %v4090_v0 = vld [vmem:[#allocation2 + $0x13a] sm:$0xff] }
 0x1dc   : > { %1741 = vrot.lane.b32.xlu1 %v3536_v49, %s3190_s18  ;;  %2127 = vrot.lane.b32.xlu0 %v3632_v38, %s3191_s19 }
 0x1dd   : > { %v806_v39 = vpop.permute.xlu2 %805 }
 0x1de   : > { %885 = vst.msk [vmem:[#allocation3 + $0x88] sm:$0xff] %vm867_vm4, %v806_v39  ;;  %v993_v10 = vpop.permute.xlu1 %992  ;;  %v997_v29 = vpop.permute.xlu0 %996 }
 0x1df   : > { %1075 = vst.msk [vmem:[#allocation3 + $0x70] sm:$0xff] %vm1060_vm5, %v993_v10 }
 0x1e0   : > { %1268 = vst.msk [vmem:[#allocation3 + $0x70] sm:$0xff] %vm1253_vm6, %v1186_v37 }
 0x1e1   : > { %1461 = vst.msk [vmem:[#allocation3 + $0x70] sm:$0xff] %vm1446_vm7, %v1379_v45  ;;  %v4100_v45 = vld [vmem:[%s4796_s4] ss:$0 sm:$0xff] }
 0x1e3   : > { %823 = vrot.lane.b32.xlu2 %v4084_v47, %s3184_s10  ;;  %s3192_s10 = smov 124  }
 0x1e4   : > { %1016 = vrot.lane.b32.xlu1 %v4090_v0, %s3185_s11  ;;  %1936 = vrot.lane.b32.xlu0 %v3643_v50, %s3189_s17 }
 0x1e5   : > { %v1190_v49 = vpop.permute.xlu2 %1189 }
 0x1e6   : > { %v1377_v20 = vpop.permute.xlu1 %1376  ;;  %v1381_v22 = vpop.permute.xlu0 %1380 }
 0x1e7   : > { %1460 = vst.msk [vmem:[#allocation3 + $0x68] sm:$0xff] %vm1446_vm7, %v1377_v20 }
 0x1eb   : > { %1207 = vrot.lane.b32.xlu2 %v1118_v31, %s3187_s15 }
 0x1ec   : > { %1205 = vrot.lane.b32.xlu1 %v1117_v4, %s3187_s15  ;;  %v2410_v39 = vpop.f32.mrf.mxu1  ;;  %1745 = vrot.lane.b32.xlu0 %v3614_v27, %s3190_s18  ;;  %v1482_v27 = vld [vmem:[#allocation2 + $0x3a] sm:$0xff] }
 0x1ed   : > { %v1001_v37 = vpop.permute.xlu2 %1000  ;;  %v2411_v50 = vadd.f32 %v4100_v45, %v2410_v39 }
 0x1ee   : > { %v804_v10 = vpop.permute.xlu1 %803  ;;  %v808_v20 = vpop.permute.xlu0 %807 }
 0x1ef   : > { %v2506_v61 = vmax.f32 %v2411_v50, 0.0  ;;  %884 = vst.msk [vmem:[#allocation3 + $0x80] sm:$0xff] %vm867_vm4, %v804_v10 }
 0x1f0   : > { %886 = vst.msk [vmem:[#allocation3 + $0x90] sm:$0xff] %vm867_vm4, %v808_v20 }
 0x1f1   : > { %1079 = vst.msk [vmem:[#allocation3 + $0x90] sm:$0xff] %vm1060_vm5, %v1001_v37  ;;  %3112 = vmatmul.msk.f32.vlgmr.msra.gmra.mxu2 %vm319_vm1, %v2506_v61 }
 0x1f2   : > { %1077 = vst.msk [vmem:[#allocation3 + $0x80] sm:$0xff] %vm1060_vm5, %v997_v29 }
 0x1f3   : > { %1743 = vrot.lane.b32.xlu2 %v3546_v51, %s3190_s18  ;;  %1270 = vst.msk [vmem:[#allocation3 + $0x80] sm:$0xff] %vm1253_vm6, %v1190_v49 }
 0x1f4   : > { %1549 = vrot.lane.b32.xlu1 %v1482_v27, %s3188_s16  ;;  %1553 = vrot.lane.b32.xlu0 %v3609_v25, %s3188_s16 }
 0x1f5   : > { %v1385_v4 = vpop.permute.xlu2 %1384 }
 0x1f6   : > { %v2413_v31 = vpop.f32.mrf.mxu1  ;;  %v999_v39 = vpop.permute.xlu1 %998 }
 0x1f7   : > { %v2414_v37 = vadd.f32 %v4100_v45, %v2413_v31  ;;  %v1003_v50 = vpop.permute.xlu0 %1002  ;;  %1078 = vst.msk [vmem:[#allocation3 + $0x88] sm:$0xff] %vm1060_vm5, %v999_v39 }
 0x1f9   : > { %v2507_v61 = vmax.f32 %v2414_v37, 0.0 }
 0x1fb   : > { %1551 = vrot.lane.b32.xlu2 %v3632_v38, %s3188_s16  ;;  %3113 = vmatmul.msk.f32.gmra.mxu2 %vm319_vm1, %v2507_v61 }
 0x1fc   : > { %2129 = vrot.lane.b32.xlu1 %v3609_v25, %s3191_s19  ;;  %2133 = vrot.lane.b32.xlu0 %v3694_v40, %s3191_s19 }
 0x1fd   : > { %v812_v51 = vpop.permute.xlu2 %811 }
 0x1fe   : > { %888 = vst.msk [vmem:[#allocation3 + $0xa0] sm:$0xff] %vm867_vm4, %v812_v51  ;;  %v1188_v29 = vpop.permute.xlu1 %1187 }
 0x1ff   : > { %v1192_v49 = vpop.permute.xlu0 %1191  ;;  %1269 = vst.msk [vmem:[#allocation3 + $0x78] sm:$0xff] %vm1253_vm6, %v1188_v29 }
 0x200   : > { %1271 = vst.msk [vmem:[#allocation3 + $0x88] sm:$0xff] %vm1253_vm6, %v1192_v49 }
 0x201   : > { %1464 = vst.msk [vmem:[#allocation3 + $0x88] sm:$0xff] %vm1446_vm7, %v1385_v4 }
 0x202   : > { %1462 = vst.msk [vmem:[#allocation3 + $0x78] sm:$0xff] %vm1446_vm7, %v1381_v22 }
 0x203   : > { %2131 = vrot.lane.b32.xlu2 %v3708_v48, %s3191_s19 }
 0x204   : > { %1938 = vrot.lane.b32.xlu1 %v3651_v56, %s3189_s17  ;;  %1942 = vrot.lane.b32.xlu0 %v3742_v36, %s3189_s17 }
 0x205   : > { %v1007_v38 = vpop.permute.xlu2 %1006 }
 0x206   : > { %v1383_v25 = vpop.permute.xlu1 %1382 }
 0x207   : > { %v1387_v10 = vpop.permute.xlu0 %1386  ;;  %1463 = vst.msk [vmem:[#allocation3 + $0x80] sm:$0xff] %vm1446_vm7, %v1383_v25 }
 0x20b   : > { %1940 = vrot.lane.b32.xlu2 %v3672_v6, %s3189_s17 }
 0x20c   : > { %1747 = vrot.lane.b32.xlu1 %v3618_v30, %s3190_s18  ;;  %1751 = vrot.lane.b32.xlu0 %v3658_v60, %s3190_s18 }
 0x20d   : > { %v1196_v20 = vpop.permute.xlu2 %1195 }
 0x20e   : > { %v810_v22 = vpop.permute.xlu1 %809 }
 0x20f   : > { %v814_v27 = vpop.permute.xlu0 %813  ;;  %887 = vst.msk [vmem:[#allocation3 + $0x98] sm:$0xff] %vm867_vm4, %v810_v22 }
 0x210   : > { %889 = vst.msk [vmem:[#allocation3 + $0xa8] sm:$0xff] %vm867_vm4, %v814_v27 }
 0x211   : > { %1082 = vst.msk [vmem:[#allocation3 + $0xa8] sm:$0xff] %vm1060_vm5, %v1007_v38 }
 0x212   : > { %1080 = vst.msk [vmem:[#allocation3 + $0x98] sm:$0xff] %vm1060_vm5, %v1003_v50 }
 0x213   : > { %1749 = vrot.lane.b32.xlu2 %v3622_v32, %s3190_s18  ;;  %1273 = vst.msk [vmem:[#allocation3 + $0x98] sm:$0xff] %vm1253_vm6, %v1196_v20 }
 0x214   : > { %1555 = vrot.lane.b32.xlu1 %v3708_v48, %s3188_s16  ;;  %1559 = vrot.lane.b32.xlu0 %v3704_v43, %s3188_s16 }
 0x215   : > { %v1391_v56 = vpop.permute.xlu2 %1390 }
 0x216   : > { %v1194_v30 = vpop.permute.xlu1 %1193 }
 0x217   : > { %v1198_v60 = vpop.permute.xlu0 %1197  ;;  %1272 = vst.msk [vmem:[#allocation3 + $0x90] sm:$0xff] %vm1253_vm6, %v1194_v30  ;;  %v2083_v30 = vld [vmem:[#allocation2 + $0x152] sm:$0xff] }
 0x218   : > { %1465 = vst.msk [vmem:[#allocation3 + $0x90] sm:$0xff] %vm1446_vm7, %v1387_v10 }
 0x21b   : > { %1557 = vrot.lane.b32.xlu2 %v3694_v40, %s3188_s16 }
 0x21c   : > { %2135 = vrot.lane.b32.xlu1 %v3704_v43, %s3191_s19  ;;  %2139 = vrot.lane.b32.xlu0 %v3822_v34, %s3191_s19 }
 0x21d   : > { %v818_v6 = vpop.permute.xlu2 %817 }
 0x21e   : > { %891 = vst.msk [vmem:[#allocation3 + $0xb8] sm:$0xff] %vm867_vm4, %v818_v6  ;;  %v1005_v32 = vpop.permute.xlu1 %1004 }
 0x21f   : > { %v1009_v48 = vpop.permute.xlu0 %1008  ;;  %1081 = vst.msk [vmem:[#allocation3 + $0xa0] sm:$0xff] %vm1060_vm5, %v1005_v32 }
 0x220   : > { %1274 = vst.msk [vmem:[#allocation3 + $0xa0] sm:$0xff] %vm1253_vm6, %v1198_v60  ;;  %v1891_v60 = vld [vmem:[#allocation2 + $0x159] sm:$0xff] }
 0x221   : > { %1467 = vst.msk [vmem:[#allocation3 + $0xa0] sm:$0xff] %vm1446_vm7, %v1391_v56 }
 0x223   : > { %2137 = vrot.lane.b32.xlu2 %v3769_v26, %s3191_s19 }
 0x224   : > { %1944 = vrot.lane.b32.xlu1 %v3729_v15, %s3189_s17  ;;  %1948 = vrot.lane.b32.xlu0 %v3839_v54, %s3189_s17 }
 0x225   : > { %v1202_v40 = vpop.permute.xlu2 %1201 }
 0x226   : > { %v1389_v43 = vpop.permute.xlu1 %1388 }
 0x227   : > { %v1393_v36 = vpop.permute.xlu0 %1392  ;;  %1466 = vst.msk [vmem:[#allocation3 + $0x98] sm:$0xff] %vm1446_vm7, %v1389_v43 }
 0x22b   : > { %1946 = vrot.lane.b32.xlu2 %v3748_v42, %s3189_s17 }
 0x22c   : > { %1753 = vrot.lane.b32.xlu1 %v3706_v46, %s3190_s18  ;;  %1757 = vrot.lane.b32.xlu0 %v3778_v21, %s3190_s18 }
 0x22d   : > { %v1013_v4 = vpop.permute.xlu2 %1012 }
 0x22e   : > { %v816_v31 = vpop.permute.xlu1 %815 }
 0x22f   : > { %v820_v39 = vpop.permute.xlu0 %819  ;;  %890 = vst.msk [vmem:[#allocation3 + $0xb0] sm:$0xff] %vm867_vm4, %v816_v31  ;;  %v1698_v31 = vld [vmem:[#allocation2 + $0x158] sm:$0xff] }
 0x230   : > { %892 = vst.msk [vmem:[#allocation3 + $0xc0] sm:$0xff] %vm867_vm4, %v820_v39  ;;  %v4878_v39 = vld [vmem:[#allocation40_spill] sm:$0xff] }
 0x231   : > { %1085 = vst.msk [vmem:[#allocation3 + $0xc0] sm:$0xff] %vm1060_vm5, %v1013_v4 }
 0x232   : > { %1083 = vst.msk [vmem:[#allocation3 + $0xb0] sm:$0xff] %vm1060_vm5, %v1009_v48 }
 0x233   : > { %1755 = vrot.lane.b32.xlu2 %v3715_v59, %s3190_s18  ;;  %1276 = vst.msk [vmem:[#allocation3 + $0xb0] sm:$0xff] %vm1253_vm6, %v1202_v40 }
 0x234   : > { %1561 = vrot.lane.b32.xlu1 %v3769_v26, %s3188_s16  ;;  %1565 = vrot.lane.b32.xlu0 %v3765_v57, %s3188_s16 }
 0x235   : > { %v1935_v15 = vpop.permute.xlu2 %1934 }
 0x236   : > { %v1011_v46 = vpop.permute.xlu1 %1010 }
 0x237   : > { %v1015_v42 = vpop.permute.xlu0 %1014  ;;  %1084 = vst.msk [vmem:[#allocation3 + $0xb8] sm:$0xff] %vm1060_vm5, %v1011_v46 }
 0x23b   : > { %1563 = vrot.lane.b32.xlu2 %v3822_v34, %s3188_s16 }
 0x23c   : > { %2141 = vrot.lane.b32.xlu1 %v3765_v57, %s3191_s19  ;;  %2145 = vrot.lane.b32.xlu0 %v3872_v62, %s3191_s19 }
 0x23d   : > { %v824_v21 = vpop.permute.xlu2 %823 }
 0x23e   : > { %894 = vst.msk [vmem:[#allocation3 + $0xd0] sm:$0xff] %vm867_vm4, %v824_v21  ;;  %v1200_v59 = vpop.permute.xlu1 %1199  ;;  %v2084_v21 = vld [vmem:[#allocation2 + $0x15a] sm:$0xff] }
 0x23f   : > { %v1204_v26 = vpop.permute.xlu0 %1203  ;;  %1275 = vst.msk [vmem:[#allocation3 + $0xa8] sm:$0xff] %vm1253_vm6, %v1200_v59  ;;  %v1892_v59 = vld [vmem:[#allocation2 + $0x169] sm:$0xff] }
 0x240   : > { %1277 = vst.msk [vmem:[#allocation3 + $0xb8] sm:$0xff] %vm1253_vm6, %v1204_v26 }
 0x241   : > { %1468 = vst.msk [vmem:[#allocation3 + $0xa8] sm:$0xff] %vm1446_vm7, %v1393_v36 }
 0x243   : > { %2143 = vrot.lane.b32.xlu2 %v3884_v44, %s3191_s19 }
 0x244   : > { %1950 = vrot.lane.b32.xlu1 %v3827_v7, %s3189_s17  ;;  %1954 = vrot.lane.b32.xlu0 %v3908_v63, %s3189_s17 }
 0x245   : > { %v1208_v34 = vpop.permute.xlu2 %1207 }
 0x246   : > { %v822_v57 = vpop.permute.xlu1 %821 }
 0x247   : > { %v1548_v54 = vpop.permute.xlu0 %1547  ;;  %893 = vst.msk [vmem:[#allocation3 + $0xc8] sm:$0xff] %vm867_vm4, %v822_v57 }
 0x248   : > { %1642 = vst.msk [vmem:[#allocation3 + $0x10] sm:$0xff] %vm1639_vm8, %v1548_v54 }
 0x249   : > { %1086 = vst.msk [vmem:[#allocation3 + $0xc8] sm:$0xff] %vm1060_vm5, %v1015_v42 }
 0x24a   : > { %1279 = vst.msk [vmem:[#allocation3 + $0xc8] sm:$0xff] %vm1253_vm6, %v1208_v34 }
 0x24b   : > { %1952 = vrot.lane.b32.xlu2 %v3845_v12, %s3189_s17 }
 0x24c   : > { %1759 = vrot.lane.b32.xlu1 %v3780_v55, %s3190_s18  ;;  %1763 = vrot.lane.b32.xlu0 %v3836_v1, %s3190_s18 }
 0x24d   : > { %v1744_v37 = vpop.permute.xlu2 %1743 }
 0x24e   : > { %v1742_v7 = vpop.permute.xlu1 %1741 }
 0x24f   : > { %v2128_v63 = vpop.permute.xlu0 %2127  ;;  %1836 = vst.msk [vmem:[#allocation3 + $0x10] sm:$0xff] %vm1833_vm9, %v1742_v7 }
 0x250   : > { %2029 = vst.msk [vmem:[#allocation3 + $0x10] sm:$0xff] %vm2026_vm10, %v1935_v15 }
 0x251   : > { %2222 = vst.msk [vmem:[#allocation3 + $0x10] sm:$0xff] %vm2219_vm11, %v2128_v63 }
 0x253   : > { %1761 = vrot.lane.b32.xlu2 %v3767_v23, %s3190_s18 }
 0x254   : > { %1567 = vrot.lane.b32.xlu1 %v3884_v44, %s3188_s16  ;;  %1571 = vrot.lane.b32.xlu0 %v3880_v16, %s3188_s16 }
 0x255   : > { %v1552_v50 = vpop.permute.xlu2 %1551 }
 0x256   : > { %1644 = vst.msk [vmem:[#allocation3 + $0x20] sm:$0xff] %vm1639_vm8, %v1552_v50  ;;  %v1017_v55 = vpop.permute.xlu1 %1016  ;;  %v4880_v50 = vld [vmem:[#allocation39_spill] sm:$0xff] }
 0x257   : > { %v1937_v1 = vpop.permute.xlu0 %1936  ;;  %1087 = vst.msk [vmem:[#allocation3 + $0xd0] sm:$0xff] %vm1060_vm5, %v1017_v55  ;;  %v1699_v55 = vld [vmem:[#allocation2 + $0x168] sm:$0xff] }
 0x258   : > { %1280 = vst.msk [vmem:[#allocation3 + $0xd0] sm:$0xff] %vm1253_vm6, %v3679_v13  ;;  %v2254_v12 = vld [vmem:[#allocation3 + $0x10] sm:$0xff] }
 0x259   : > { %3081 = vmatmul.msk.f32.gmra.mxu1 %vm2293_vm12, %v2254_v12 }
 0x25b   : > { %1569 = vrot.lane.b32.xlu2 %v3872_v62, %s3188_s16 }
 0x25c   : > { %2147 = vrot.lane.b32.xlu1 %v3880_v16, %s3191_s19  ;;  %2151 = vrot.lane.b32.xlu0 %v3957_v19, %s3191_s19 }
 0x25d   : > { %v2132_v23 = vpop.permute.xlu2 %2131 }
 0x25e   : > { %v1206_v44 = vpop.permute.xlu1 %1205 }
 0x25f   : > { %v1746_v61 = vpop.permute.xlu0 %1745  ;;  %1278 = vst.msk [vmem:[#allocation3 + $0xc0] sm:$0xff] %vm1253_vm6, %v1206_v44 }
 0x260   : > { %1838 = vst.msk [vmem:[#allocation3 + $0x20] sm:$0xff] %vm1833_vm9, %v1746_v61  ;;  %v2085_v61 = vld [vmem:[#allocation2 + $0x16a] sm:$0xff] }
 0x263   : > { %2149 = vrot.lane.b32.xlu2 %v3927_v41, %s3191_s19 }
 0x264   : > { %1956 = vrot.lane.b32.xlu1 %v3899_v11, %s3189_s17  ;;  %1960 = vrot.lane.b32.xlu0 %v3971_v3, %s3189_s17 }
 0x265   : > { %v1941_v13 = vpop.permute.xlu2 %1940 }
 0x266   : > { %v1550_v62 = vpop.permute.xlu1 %1549 }
 0x267   : > { %v1554_v16 = vpop.permute.xlu0 %1553  ;;  %1643 = vst.msk [vmem:[#allocation3 + $0x18] sm:$0xff] %vm1639_vm8, %v1550_v62 }
 0x268   : > { %1645 = vst.msk [vmem:[#allocation3 + $0x28] sm:$0xff] %vm1639_vm8, %v1554_v16 }
 0x269   : > { %1837 = vst.msk [vmem:[#allocation3 + $0x18] sm:$0xff] %vm1833_vm9, %v1744_v37  ;;  %v4879_v37 = vld [vmem:[#allocation37_spill] sm:$0xff] }
 0x26a   : > { %2030 = vst.msk [vmem:[#allocation3 + $0x18] sm:$0xff] %vm2026_vm10, %v1937_v1 }
 0x26b   : > { %1958 = vrot.lane.b32.xlu2 %v3912_v52, %s3189_s17 }
 0x26c   : > { %1765 = vrot.lane.b32.xlu1 %v3874_v24, %s3190_s18  ;;  %1398 = vrot.lane.b32.xlu0 %v4084_v47, %s3186_s14 }
 0x26d   : > { %v1750_v51 = vpop.permute.xlu2 %1749 }
 0x26e   : > { %v2130_v11 = vpop.permute.xlu1 %2129 }
 0x26f   : > { %v2134_v3 = vpop.permute.xlu0 %2133  ;;  %2223 = vst.msk [vmem:[#allocation3 + $0x18] sm:$0xff] %vm2219_vm11, %v2130_v11 }
 0x273   : > { %1767 = vrot.lane.b32.xlu2 %v3882_v8, %s3190_s18  ;;  %v1890_v8 = vld [vmem:[#allocation2 + $0x151] sm:$0xff] }
 0x274   : > { %1573 = vrot.lane.b32.xlu1 %v3927_v41, %s3188_s16  ;;  %1962 = vrot.lane.b32.xlu0 %v3961_v28, %s3189_s17 }
 0x275   : > { %v1558_v29 = vpop.permute.xlu2 %1557 }
 0x276   : > { %1647 = vst.msk [vmem:[#allocation3 + $0x38] sm:$0xff] %vm1639_vm8, %v1558_v29  ;;  %v1939_v52 = vpop.permute.xlu1 %1938  ;;  %v2255_v24 = vld [vmem:[#allocation3 + $0x18] sm:$0xff]  ;;  %v1700_v29 = vld [vmem:[#allocation2 + $0x170] sm:$0xff] }
 0x277   : > { %v1943_v49 = vpop.permute.xlu0 %1942  ;;  %2031 = vst.msk [vmem:[#allocation3 + $0x20] sm:$0xff] %vm2026_vm10, %v1939_v52  ;;  %3082 = vmatmul.msk.f32.gmra.mxu1 %vm2293_vm12, %v2255_v24  ;;  %v4881_v24 = vld [vmem:[#allocation41_spill] sm:$0xff] }
 0x278   : > { %2224 = vst.msk [vmem:[#allocation3 + $0x20] sm:$0xff] %vm2219_vm11, %v2132_v23 }
 0x27b   : > { %1575 = vrot.lane.b32.xlu2 %v3957_v19, %s3188_s16  ;;  %v4280_v19 = vld [vmem:[#allocation2 + $0x141] sm:$0xff] }
 0x27c   : > { %2153 = vrot.lane.b32.xlu1 %v3924_v18, %s3191_s19  ;;  %1978 = vrot.lane.b32.xlu0 %v1890_v8, %s3189_s17 }
 0x27d   : > { %v2138_v47 = vpop.permute.xlu2 %2137 }
 0x27e   : > { %v1748_v41 = vpop.permute.xlu1 %1747 }
 0x27f   : > { %v1752_v28 = vpop.permute.xlu0 %1751  ;;  %1839 = vst.msk [vmem:[#allocation3 + $0x28] sm:$0xff] %vm1833_vm9, %v1748_v41  ;;  %v2256_v38 = vld [vmem:[#allocation3 + $0x20] sm:$0xff] }
 0x280   : > { %1841 = vst.msk [vmem:[#allocation3 + $0x38] sm:$0xff] %vm1833_vm9, %v1752_v28  ;;  %3083 = vmatmul.msk.f32.gmra.mxu1 %vm2293_vm12, %v2256_v38  ;;  %v1499_v28 = vld [vmem:[#allocation2 + $0x10a] sm:$0xff]  ;;  %v2086_v38 = vld [vmem:[#allocation2 + $0x172] sm:$0xff] }
 0x281   : > { %2032 = vst.msk [vmem:[#allocation3 + $0x28] sm:$0xff] %vm2026_vm10, %v1941_v13  ;;  %v1893_v13 = vld [vmem:[#allocation2 + $0x171] sm:$0xff] }
 0x282   : > { %2225 = vst.msk [vmem:[#allocation3 + $0x28] sm:$0xff] %vm2219_vm11, %v2134_v3 }
 0x283   : > { %1591 = vrot.lane.b32.xlu2 %v4090_v0, %s3188_s16 }
 0x284   : > { %1769 = vrot.lane.b32.xlu1 %v3937_v5, %s3190_s18  ;;  %1400 = vrot.lane.b32.xlu0 %v4280_v19, %s3186_s14  ;;  %v1697_v5 = vld [vmem:[#allocation2 + $0x150] sm:$0xff] }
 0x285   : > { %v1947_v25 = vpop.permute.xlu2 %1946 }
 0x286   : > { %v1556_v10 = vpop.permute.xlu1 %1555 }
 0x287   : > { %v1560_v20 = vpop.permute.xlu0 %1559  ;;  %1646 = vst.msk [vmem:[#allocation3 + $0x30] sm:$0xff] %vm1639_vm8, %v1556_v10 }
 0x288   : > { %1648 = vst.msk [vmem:[#allocation3 + $0x40] sm:$0xff] %vm1639_vm8, %v1560_v20 }
 0x289   : > { %1840 = vst.msk [vmem:[#allocation3 + $0x30] sm:$0xff] %vm1833_vm9, %v1750_v51  ;;  %v2257_v22 = vld [vmem:[#allocation3 + $0x28] sm:$0xff] }
 0x28a   : > { %2033 = vst.msk [vmem:[#allocation3 + $0x30] sm:$0xff] %vm2026_vm10, %v1943_v49  ;;  %3084 = vmatmul.msk.f32.gmra.mxu1 %vm2293_vm12, %v2257_v22 }
 0x28b   : > { %2155 = vrot.lane.b32.xlu2 %v4004_v33, %s3191_s19 }
 0x28c   : > { %1785 = vrot.lane.b32.xlu1 %v1697_v5, %s3190_s18  ;;  %1964 = vrot.lane.b32.xlu0 %v3977_v17, %s3189_s17  ;;  %v4305_v17 = vld [vmem:[#allocation2 + $0x142] sm:$0xff] }
 0x28d   : > { %v1756_v0 = vpop.permute.xlu2 %1755 }
 0x28e   : > { %v2136_v27 = vpop.permute.xlu1 %2135 }
 0x28f   : > { %v2140_v56 = vpop.permute.xlu0 %2139  ;;  %2226 = vst.msk [vmem:[#allocation3 + $0x30] sm:$0xff] %vm2219_vm11, %v2136_v27  ;;  %v4882_v27 = vld [vmem:[#allocation38_spill] sm:$0xff] }
 0x293   : > { %1577 = vrot.lane.b32.xlu2 %v3924_v18, %s3188_s16 }
 0x294   : > { %2171 = vrot.lane.b32.xlu1 %v2083_v30, %s3191_s19  ;;  %1980 = vrot.lane.b32.xlu0 %v1891_v60, %s3189_s17 }
 0x295   : > { %v1564_v6 = vpop.permute.xlu2 %1563 }
 0x296   : > { %1650 = vst.msk [vmem:[#allocation3 + $0x50] sm:$0xff] %vm1639_vm8, %v1564_v6  ;;  %v1945_v32 = vpop.permute.xlu1 %1944  ;;  %v2258_v48 = vld [vmem:[#allocation3 + $0x30] sm:$0xff] }
 0x297   : > { %v1949_v40 = vpop.permute.xlu0 %1948  ;;  %2034 = vst.msk [vmem:[#allocation3 + $0x38] sm:$0xff] %vm2026_vm10, %v1945_v32  ;;  %3085 = vmatmul.msk.f32.gmra.mxu1 %vm2293_vm12, %v2258_v48  ;;  %v1701_v6 = vld [vmem:[#allocation2 + $0x180] sm:$0xff] }
 0x298   : > { %2227 = vst.msk [vmem:[#allocation3 + $0x38] sm:$0xff] %vm2219_vm11, %v2138_v47  ;;  %v4883_v48 = vld [vmem:[#allocation42_spill] sm:$0xff] }
 0x29b   : > { %1593 = vrot.lane.b32.xlu2 %v4305_v17, %s3188_s16 }
 0x29c   : > { %1771 = vrot.lane.b32.xlu1 %v3939_v35, %s3190_s18  ;;  %1402 = vrot.lane.b32.xlu0 %v1890_v8, %s3186_s14 }
 0x29d   : > { %v2144_v18 = vpop.permute.xlu2 %2143 }
 0x29e   : > { %v1754_v43 = vpop.permute.xlu1 %1753 }
 0x29f   : > { %v1758_v36 = vpop.permute.xlu0 %1757  ;;  %1842 = vst.msk [vmem:[#allocation3 + $0x40] sm:$0xff] %vm1833_vm9, %v1754_v43  ;;  %v2259_v4 = vld [vmem:[#allocation3 + $0x38] sm:$0xff]  ;;  %v1500_v43 = vld [vmem:[#allocation2 + $0x112] sm:$0xff] }
 0x2a0   : > { %1844 = vst.msk [vmem:[#allocation3 + $0x50] sm:$0xff] %vm1833_vm9, %v1758_v36  ;;  %3086 = vmatmul.msk.f32.gmra.mxu1 %vm2293_vm12, %v2259_v4  ;;  %v2087_v36 = vld [vmem:[#allocation2 + $0x182] sm:$0xff] }
 0x2a1   : > { %2035 = vst.msk [vmem:[#allocation3 + $0x40] sm:$0xff] %vm2026_vm10, %v1947_v25  ;;  %v4376_v25 = vld [vmem:[#allocation2 + $0x181] sm:$0xff] }
 0x2a2   : > { %2228 = vst.msk [vmem:[#allocation3 + $0x40] sm:$0xff] %vm2219_vm11, %v2140_v56 }
 0x2a3   : > { %2157 = vrot.lane.b32.xlu2 %v3994_v2, %s3191_s19 }
 0x2a4   : > { %1787 = vrot.lane.b32.xlu1 %v1698_v31, %s3190_s18  ;;  %1966 = vrot.lane.b32.xlu0 %v4878_v39, %s3189_s17 }
 0x2a5   : > { %v1953_v35 = vpop.permute.xlu2 %1952 }
 0x2a6   : > { %v1562_v15 = vpop.permute.xlu1 %1561 }
 0x2a7   : > { %v1566_v46 = vpop.permute.xlu0 %1565  ;;  %1649 = vst.msk [vmem:[#allocation3 + $0x48] sm:$0xff] %vm1639_vm8, %v1562_v15 }
 0x2a8   : > { %1651 = vst.msk [vmem:[#allocation3 + $0x58] sm:$0xff] %vm1639_vm8, %v1566_v46 }
 0x2a9   : > { %1843 = vst.msk [vmem:[#allocation3 + $0x48] sm:$0xff] %vm1833_vm9, %v1756_v0  ;;  %v2260_v42 = vld [vmem:[#allocation3 + $0x40] sm:$0xff] }
 0x2aa   : > { %2036 = vst.msk [vmem:[#allocation3 + $0x48] sm:$0xff] %vm2026_vm10, %v1949_v40  ;;  %3087 = vmatmul.msk.f32.gmra.mxu1 %vm2293_vm12, %v2260_v42 }
 0x2ab   : > { %1579 = vrot.lane.b32.xlu2 %v4004_v33, %s3188_s16 }
 0x2ac   : > { %2173 = vrot.lane.b32.xlu1 %v2084_v21, %s3191_s19  ;;  %1982 = vrot.lane.b32.xlu0 %v1892_v59, %s3189_s17 }
 0x2ad   : > { %v1762_v26 = vpop.permute.xlu2 %1761 }
 0x2ae   : > { %v2142_v34 = vpop.permute.xlu1 %2141 }
 0x2af   : > { %v2146_v57 = vpop.permute.xlu0 %2145  ;;  %2229 = vst.msk [vmem:[#allocation3 + $0x48] sm:$0xff] %vm2219_vm11, %v2142_v34 }
 0x2b3   : > { %1595 = vrot.lane.b32.xlu2 %v2083_v30, %s3188_s16 }
 0x2b4   : > { %1773 = vrot.lane.b32.xlu1 %v4879_v37, %s3190_s18  ;;  %1404 = vrot.lane.b32.xlu0 %v1891_v60, %s3186_s14 }
 0x2b5   : > { %v1570_v54 = vpop.permute.xlu2 %1569 }
 0x2b6   : > { %1653 = vst.msk [vmem:[#allocation3 + $0x68] sm:$0xff] %vm1639_vm8, %v1570_v54  ;;  %v1951_v33 = vpop.permute.xlu1 %1950  ;;  %v2261_v7 = vld [vmem:[#allocation3 + $0x48] sm:$0xff] }
 0x2b7   : > { %v1955_v63 = vpop.permute.xlu0 %1954  ;;  %2037 = vst.msk [vmem:[#allocation3 + $0x50] sm:$0xff] %vm2026_vm10, %v1951_v33  ;;  %3088 = vmatmul.msk.f32.gmra.mxu1 %vm2293_vm12, %v2261_v7  ;;  %v4422_v7 = vld [vmem:[#allocation2 + $0x12a] sm:$0xff] }
 0x2b8   : > { %2230 = vst.msk [vmem:[#allocation3 + $0x50] sm:$0xff] %vm2219_vm11, %v2144_v18 }
 0x2bb   : > { %2159 = vrot.lane.b32.xlu2 %v4880_v50, %s3191_s19  ;;  %v1702_v50 = vld [vmem:[#allocation2 + $0x188] sm:$0xff] }
 0x2bc   : > { %1789 = vrot.lane.b32.xlu1 %v1699_v55, %s3190_s18  ;;  %1968 = vrot.lane.b32.xlu0 %v4017_v9, %s3189_s17 }
 0x2bd   : > { %v2150_v1 = vpop.permute.xlu2 %2149 }
 0x2be   : > { %v1760_v12 = vpop.permute.xlu1 %1759 }
 0x2bf   : > { %v1764_v23 = vpop.permute.xlu0 %1763  ;;  %1845 = vst.msk [vmem:[#allocation3 + $0x58] sm:$0xff] %vm1833_vm9, %v1760_v12  ;;  %v2262_v44 = vld [vmem:[#allocation3 + $0x50] sm:$0xff] }
 0x2c0   : > { %1847 = vst.msk [vmem:[#allocation3 + $0x68] sm:$0xff] %vm1833_vm9, %v1764_v23  ;;  %3089 = vmatmul.msk.f32.gmra.mxu1 %vm2293_vm12, %v2262_v44 }
 0x2c1   : > { %2038 = vst.msk [vmem:[#allocation3 + $0x58] sm:$0xff] %vm2026_vm10, %v1953_v35 }
 0x2c2   : > { %2231 = vst.msk [vmem:[#allocation3 + $0x58] sm:$0xff] %vm2219_vm11, %v2146_v57 }
 0x2c3   : > { %1581 = vrot.lane.b32.xlu2 %v3994_v2, %s3188_s16 }
 0x2c4   : > { %2175 = vrot.lane.b32.xlu1 %v2085_v61, %s3191_s19  ;;  %1984 = vrot.lane.b32.xlu0 %v1893_v13, %s3189_s17 }
 0x2c5   : > { %v1959_v62 = vpop.permute.xlu2 %1958 }
 0x2c6   : > { %v1568_v9 = vpop.permute.xlu1 %1567 }
 0x2c7   : > { %v1572_v16 = vpop.permute.xlu0 %1571  ;;  %1652 = vst.msk [vmem:[#allocation3 + $0x60] sm:$0xff] %vm1639_vm8, %v1568_v9  ;;  %v2081_v9 = vld [vmem:[#allocation2 + $0x13a] sm:$0xff] }
 0x2c8   : > { %1654 = vst.msk [vmem:[#allocation3 + $0x70] sm:$0xff] %vm1639_vm8, %v1572_v16 }
 0x2c9   : > { %1846 = vst.msk [vmem:[#allocation3 + $0x60] sm:$0xff] %vm1833_vm9, %v1762_v26  ;;  %v2263_v51 = vld [vmem:[#allocation3 + $0x58] sm:$0xff] }
 0x2ca   : > { %2039 = vst.msk [vmem:[#allocation3 + $0x60] sm:$0xff] %vm2026_vm10, %v1955_v63  ;;  %3090 = vmatmul.msk.f32.gmra.mxu1 %vm2293_vm12, %v2263_v51 }
 0x2cb   : > { %1597 = vrot.lane.b32.xlu2 %v2084_v21, %s3188_s16  ;;  %v1694_v21 = vld [vmem:[#allocation2 + $0x128] sm:$0xff] }
 0x2cc   : > { %1775 = vrot.lane.b32.xlu1 %v3968_v53, %s3190_s18  ;;  %1406 = vrot.lane.b32.xlu0 %v1892_v59, %s3186_s14  ;;  %v1501_v59 = vld [vmem:[#allocation2 + $0x122] sm:$0xff] }
 0x2cd   : > { %v1768_v2 = vpop.permute.xlu2 %1767 }
 0x2ce   : > { %v2148_v11 = vpop.permute.xlu1 %2147 }
 0x2cf   : > { %v2152_v3 = vpop.permute.xlu0 %2151  ;;  %2232 = vst.msk [vmem:[#allocation3 + $0x60] sm:$0xff] %vm2219_vm11, %v2148_v11 }
 0x2d3   : > { %2161 = vrot.lane.b32.xlu2 %v4042_v14, %s3191_s19 }
 0x2d4   : > { %1791 = vrot.lane.b32.xlu1 %v1700_v29, %s3190_s18  ;;  %1970 = vrot.lane.b32.xlu0 %v4881_v24, %s3189_s17  ;;  %v1309_v29 = vld [vmem:[#allocation2 + $0x129] sm:$0xff] }
 0x2d5   : > { %v1576_v52 = vpop.permute.xlu2 %1575 }
 0x2d6   : > { %1656 = vst.msk [vmem:[#allocation3 + $0x80] sm:$0xff] %vm1639_vm8, %v1576_v52  ;;  %v1957_v49 = vpop.permute.xlu1 %1956  ;;  %v2416_v53 = vpop.f32.mrf.mxu1  ;;  %v2264_v8 = vld [vmem:[#allocation3 + $0x60] sm:$0xff] }
 0x2d7   : > { %v1961_v47 = vpop.permute.xlu0 %1960  ;;  %2040 = vst.msk [vmem:[#allocation3 + $0x68] sm:$0xff] %vm2026_vm10, %v1957_v49  ;;  %v2417_v41 = vadd.f32 %v4100_v45, %v2416_v53  ;;  %3091 = vmatmul.msk.f32.gmra.mxu1 %vm2293_vm12, %v2264_v8 }
 0x2d8   : > { %2233 = vst.msk [vmem:[#allocation3 + $0x68] sm:$0xff] %vm2219_vm11, %v2150_v1 }
 0x2d9   : > { %v2508_v14 = vmax.f32 %v2417_v41, 0.0  ;;  %v1703_v41 = vld [vmem:[#allocation2 + $0x198] sm:$0xff] }
 0x2db   : > { %1583 = vrot.lane.b32.xlu2 %v1499_v28, %s3188_s16  ;;  %3114 = vmatmul.msk.f32.gmra.mxu2 %vm319_vm1, %v2508_v14  ;;  %v1888_v28 = vld [vmem:[#allocation2 + $0x139] sm:$0xff] }
 0x2dc   : > { %2177 = vrot.lane.b32.xlu1 %v2086_v38, %s3191_s19  ;;  %1986 = vrot.lane.b32.xlu0 %v4376_v25, %s3189_s17 }
 0x2dd   : > { %v1592_v10 = vpop.permute.xlu2 %1591 }
 0x2de   : > { %v1766_v20 = vpop.permute.xlu1 %1765 }
 0x2df   : > { %v1399_v22 = vpop.permute.xlu0 %1398  ;;  %1848 = vst.msk [vmem:[#allocation3 + $0x70] sm:$0xff] %vm1833_vm9, %v1766_v20  ;;  %v2265_v5 = vld [vmem:[#allocation3 + $0x68] sm:$0xff] }
 0x2e0   : > { %1471 = vst.msk [vmem:[#allocation3 + $0xc0] sm:$0xff] %vm1446_vm7, %v1399_v22  ;;  %3092 = vmatmul.msk.f32.gmra.mxu1 %vm2293_vm12, %v2265_v5 }
 0x2e1   : > { %1664 = vst.msk [vmem:[#allocation3 + $0xc0] sm:$0xff] %vm1639_vm8, %v1592_v10 }
 0x2e2   : > { %2041 = vst.msk [vmem:[#allocation3 + $0x70] sm:$0xff] %vm2026_vm10, %v1959_v62  ;;  %v4434_v62 = vld [vmem:[#allocation2 + $0x18a] sm:$0xff] }
 0x2e3   : > { %1599 = vrot.lane.b32.xlu2 %v2085_v61, %s3188_s16  ;;  %2234 = vst.msk [vmem:[#allocation3 + $0x70] sm:$0xff] %vm2219_vm11, %v2152_v3  ;;  %v1308_v61 = vld [vmem:[#allocation2 + $0x121] sm:$0xff]  ;;  %v1695_v3 = vld [vmem:[#allocation2 + $0x138] sm:$0xff] }
 0x2e4   : > { %1777 = vrot.lane.b32.xlu1 %v4882_v27, %s3190_s18  ;;  %1408 = vrot.lane.b32.xlu0 %v1893_v13, %s3186_s14 }
 0x2e5   : > { %v2156_v0 = vpop.permute.xlu2 %2155 }
 0x2e6   : > { %v1574_v56 = vpop.permute.xlu1 %1573 }
 0x2e7   : > { %v1963_v30 = vpop.permute.xlu0 %1962  ;;  %1655 = vst.msk [vmem:[#allocation3 + $0x78] sm:$0xff] %vm1639_vm8, %v1574_v56  ;;  %v1896_v56 = vld [vmem:[#allocation2 + $0x199] sm:$0xff] }
 0x2e8   : > { %1849 = vst.msk [vmem:[#allocation3 + $0x78] sm:$0xff] %vm1833_vm9, %v1768_v2 }
 0x2e9   : > { %2042 = vst.msk [vmem:[#allocation3 + $0x78] sm:$0xff] %vm2026_vm10, %v1961_v47 }
 0x2ea   : > { %v2266_v60 = vld [vmem:[#allocation3 + $0x70] sm:$0xff] }
 0x2eb   : > { %2163 = vrot.lane.b32.xlu2 %v4057_v58, %s3191_s19  ;;  %3093 = vmatmul.msk.f32.gmra.mxu1 %vm2293_vm12, %v2266_v60  ;;  %v4403_v58 = vld [vmem:[#allocation2 + $0x189] sm:$0xff] }
 0x2ec   : > { %1793 = vrot.lane.b32.xlu1 %v1701_v6, %s3190_s18  ;;  %1972 = vrot.lane.b32.xlu0 %v4883_v48, %s3189_s17 }
 0x2ed   : > { %v1578_v32 = vpop.permute.xlu2 %1577 }
 0x2ee   : > { %1657 = vst.msk [vmem:[#allocation3 + $0x88] sm:$0xff] %vm1639_vm8, %v1578_v32  ;;  %v2154_v40 = vpop.permute.xlu1 %2153 }
 0x2ef   : > { %v1979_v18 = vpop.permute.xlu0 %1978  ;;  %2235 = vst.msk [vmem:[#allocation3 + $0x78] sm:$0xff] %vm2219_vm11, %v2154_v40 }
 0x2f3   : > { %1585 = vrot.lane.b32.xlu2 %v1500_v43, %s3188_s16 }
 0x2f4   : > { %2179 = vrot.lane.b32.xlu1 %v2087_v36, %s3191_s19  ;;  %v2419_v31 = vpop.f32.mrf.mxu1  ;;  %1988 = vrot.lane.b32.xlu0 %v4403_v58, %s3189_s17 }
 0x2f5   : > { %v1594_v4 = vpop.permute.xlu2 %1593  ;;  %v2420_v35 = vadd.f32 %v4100_v45, %v2419_v31 }
 0x2f6   : > { %v1770_v39 = vpop.permute.xlu1 %1769  ;;  %v2267_v15 = vld [vmem:[#allocation3 + $0x78] sm:$0xff] }
 0x2f7   : > { %v2509_v46 = vmax.f32 %v2420_v35, 0.0  ;;  %v1401_v42 = vpop.permute.xlu0 %1400  ;;  %1850 = vst.msk [vmem:[#allocation3 + $0x80] sm:$0xff] %vm1833_vm9, %v1770_v39  ;;  %3094 = vmatmul.msk.f32.gmra.mxu1 %vm2293_vm12, %v2267_v15 }
 0x2f8   : > { %1472 = vst.msk [vmem:[#allocation3 + $0xc8] sm:$0xff] %vm1446_vm7, %v1401_v42 }
 0x2f9   : > { %1665 = vst.msk [vmem:[#allocation3 + $0xc8] sm:$0xff] %vm1639_vm8, %v1594_v4  ;;  %3115 = vmatmul.msk.f32.gmra.mxu2 %vm319_vm1, %v2509_v46  ;;  %v4885_v46 = vld [vmem:[#allocation8_spill] sm:$0xff] }
 0x2fa   : > { %2043 = vst.msk [vmem:[#allocation3 + $0x80] sm:$0xff] %vm2026_vm10, %v1963_v30  ;;  %v1704_v30 = vld [vmem:[#allocation2 + $0x1a0] sm:$0xff] }
 0x2fb   : > { %1601 = vrot.lane.b32.xlu2 %v2086_v38, %s3188_s16  ;;  %2236 = vst.msk [vmem:[#allocation3 + $0x80] sm:$0xff] %vm2219_vm11, %v2156_v0  ;;  %v2089_v0 = vld [vmem:[#allocation2 + $0x19a] sm:$0xff] }
 0x2fc   : > { %1779 = vrot.lane.b32.xlu1 %v1694_v21, %s3190_s18  ;;  %1587 = vrot.lane.b32.xlu0 %v1501_v59, %s3188_s16 }
 0x2fd   : > { %v2158_v26 = vpop.permute.xlu2 %2157  ;;  %v2422_v34 = vpop.f32.mrf.mxu1 }
 0x2fe   : > { %v2423_v57 = vadd.f32 %v4100_v45, %v2422_v34  ;;  %v1786_v54 = vpop.permute.xlu1 %1785 }
 0x2ff   : > { %v1965_v37 = vpop.permute.xlu0 %1964  ;;  %1858 = vst.msk [vmem:[#allocation3 + $0xc0] sm:$0xff] %vm1833_vm9, %v1786_v54 }
 0x300   : > { %v2510_v33 = vmax.f32 %v2423_v57, 0.0  ;;  %2051 = vst.msk [vmem:[#allocation3 + $0xc0] sm:$0xff] %vm2026_vm10, %v1979_v18  ;;  %v4886_v57 = vld [vmem:[#allocation12_spill] sm:$0xff] }
 0x302   : > { %v2268_v63 = vld [vmem:[#allocation3 + $0x80] sm:$0xff]  ;;  %3116 = vmatmul.msk.f32.gmra.mxu2 %vm319_vm1, %v2510_v33 }
 0x303   : > { %2165 = vrot.lane.b32.xlu2 %v4422_v7, %s3191_s19  ;;  %3095 = vmatmul.msk.f32.gmra.mxu1 %vm2293_vm12, %v2268_v63 }
 0x304   : > { %1795 = vrot.lane.b32.xlu1 %v1702_v50, %s3190_s18  ;;  %1603 = vrot.lane.b32.xlu0 %v2087_v36, %s3188_s16  ;;  %v2090_v36 = vld [vmem:[#allocation2 + $0x1a2] sm:$0xff] }
 0x305   : > { %v1580_v55 = vpop.permute.xlu2 %1579 }
 0x306   : > { %1658 = vst.msk [vmem:[#allocation3 + $0x90] sm:$0xff] %vm1639_vm8, %v1580_v55  ;;  %v2172_v1 = vpop.permute.xlu1 %2171  ;;  %v4888_v55 = vld [vmem:[#allocation4_spill] sm:$0xff] }
 0x307   : > { %v1981_v12 = vpop.permute.xlu0 %1980  ;;  %2244 = vst.msk [vmem:[#allocation3 + $0xc0] sm:$0xff] %vm2219_vm11, %v2172_v1  ;;  %v2425_v23 = vpop.f32.mrf.mxu1  ;;  %v4889_v1 = vld [vmem:[#allocation17_spill] sm:$0xff] }
 0x308   : > { %v2426_v44 = vadd.f32 %v4100_v45, %v2425_v23 }
 0x30a   : > { %v2511_v13 = vmax.f32 %v2426_v44, 0.0 }
 0x30b   : > { %1394 = vrot.lane.b32.xlu2 %v1308_v61, %s3186_s14  ;;  %v4516_v61 = vld [vmem:[%s4796_s4] ss:$0 sm:$0xff] }
 0x30c   : > { %3117 = vmatmul.msk.f32.gmra.mxu2 %vm319_vm1, %v2511_v13  ;;  %2181 = vrot.lane.b32.xlu1 %v4434_v62, %s3191_s19 }
 0x30d   : > { %v1596_v16 = vpop.permute.xlu2 %1595  ;;  %2167 = vrot.lane.b32.xlu0 %v2081_v9, %s3191_s19 }
 0x30e   : > { %v1772_v51 = vpop.permute.xlu1 %1771  ;;  %v2276_v2 = vld [vmem:[#allocation3 + $0xc0] sm:$0xff] }
 0x30f   : > { %v1403_v11 = vpop.permute.xlu0 %1402  ;;  %1851 = vst.msk [vmem:[#allocation3 + $0x88] sm:$0xff] %vm1833_vm9, %v1772_v51  ;;  %3103 = vmatmul.msk.f32.vlgmr.msrb.gmra.mxu3 %vm2293_vm12, %v2276_v2  ;;  %v4891_v2 = vld [vmem:[#allocation10_spill] sm:$0xff] }
 0x310   : > { %1473 = vst.msk [vmem:[#allocation3 + $0xd0] sm:$0xff] %vm1446_vm7, %v1403_v11  ;;  %v4892_v11 = vld [vmem:[#allocation20_spill] sm:$0xff] }
 0x311   : > { %1666 = vst.msk [vmem:[#allocation3 + $0xd0] sm:$0xff] %vm1639_vm8, %v1596_v16  ;;  %v4890_v16 = vld [vmem:[#allocation11_spill] sm:$0xff] }
 0x312   : > { %2044 = vst.msk [vmem:[#allocation3 + $0x88] sm:$0xff] %vm2026_vm10, %v1965_v37 }
 0x313   : > { %1781 = vrot.lane.b32.xlu2 %v1695_v3, %s3190_s18  ;;  %2237 = vst.msk [vmem:[#allocation3 + $0x88] sm:$0xff] %vm2219_vm11, %v2158_v26 }
 0x314   : > { %1410 = vrot.lane.b32.xlu1 %v4376_v25, %s3186_s14  ;;  %v2428_v24 = vpop.f32.mrf.mxu1  ;;  %v4884_v25 = vld [vmem:[#allocation36_spill] sm:$0xff] }
 0x315   : > { %v2160_v52 = vpop.permute.xlu2 %2159  ;;  %1396 = vrot.lane.b32.xlu0 %v1309_v29, %s3186_s14  ;;  %v2429_v49 = vadd.f32 %v4100_v45, %v2428_v24 }
 0x316   : > { %v1788_v53 = vpop.permute.xlu1 %1787 }
 0x317   : > { %v2512_v8 = vmax.f32 %v2429_v49, 0.0  ;;  %v1967_v47 = vpop.permute.xlu0 %1966  ;;  %1859 = vst.msk [vmem:[#allocation3 + $0xc8] sm:$0xff] %vm1833_vm9, %v1788_v53  ;;  %v4894_v49 = vld [vmem:[#allocation14_spill] sm:$0xff] }
 0x318   : > { %2052 = vst.msk [vmem:[#allocation3 + $0xc8] sm:$0xff] %vm2026_vm10, %v1981_v12 }
 0x319   : > { %3118 = vmatmul.msk.f32.gmra.mxu2 %vm319_vm1, %v2512_v8  ;;  %v4895_v8 = vld [vmem:[#allocation25_spill] sm:$0xff] }
 0x31a   : > { %v2269_v14 = vld [vmem:[#allocation3 + $0x88] sm:$0xff] }
 0x31b   : > { %1797 = vrot.lane.b32.xlu2 %v1703_v41, %s3190_s18  ;;  %3096 = vmatmul.msk.f32.gmra.mxu1 %vm2293_vm12, %v2269_v14 }
 0x31c   : > { %1974 = vrot.lane.b32.xlu1 %v1888_v28, %s3189_s17 }
 0x31d   : > { %v1582_v38 = vpop.permute.xlu2 %1581  ;;  %1783 = vrot.lane.b32.xlu0 %v4884_v25, %s3190_s18  ;;  %v2431_v10 = vpop.f32.mrf.mxu1  ;;  %v4896_v25 = vld [vmem:[#allocation19_spill] sm:$0xff] }
 0x31e   : > { %1659 = vst.msk [vmem:[#allocation3 + $0x98] sm:$0xff] %vm1639_vm8, %v1582_v38  ;;  %v2432_v20 = vadd.f32 %v4100_v45, %v2431_v10  ;;  %v2174_v22 = vpop.permute.xlu1 %2173 }
 0x31f   : > { %v1983_v5 = vpop.permute.xlu0 %1982  ;;  %2245 = vst.msk [vmem:[#allocation3 + $0xc8] sm:$0xff] %vm2219_vm11, %v2174_v22  ;;  %v4898_v22 = vld [vmem:[#allocation28_spill] sm:$0xff] }
 0x320   : > { %v2513_v27 = vmax.f32 %v2432_v20, 0.0  ;;  %v4897_v20 = vld [vmem:[#allocation18_spill] sm:$0xff] }
 0x322   : > { %3119 = vmatmul.msk.f32.gmra.mxu2 %vm319_vm1, %v2513_v27 }
 0x323   : > { %2183 = vrot.lane.b32.xlu2 %v2089_v0, %s3191_s19 }
 0x324   : > { %1990 = vrot.lane.b32.xlu1 %v1896_v56, %s3189_s17 }
 0x325   : > { %v1598_v60 = vpop.permute.xlu2 %1597  ;;  %1799 = vrot.lane.b32.xlu0 %v1704_v30, %s3190_s18 }
 0x326   : > { %v1774_v6 = vpop.permute.xlu1 %1773  ;;  %v2277_v32 = vld [vmem:[#allocation3 + $0xc8] sm:$0xff] }
 0x327   : > { %v1405_v48 = vpop.permute.xlu0 %1404  ;;  %1852 = vst.msk [vmem:[#allocation3 + $0x90] sm:$0xff] %vm1833_vm9, %v1774_v6  ;;  %v2434_v40 = vpop.f32.mrf.mxu1  ;;  %3104 = vmatmul.msk.f32.gmra.mxu3 %vm2293_vm12, %v2277_v32  ;;  %v4899_v6 = vld [vmem:[#allocation24_spill] sm:$0xff] }
 0x328   : > { %1474 = vst.msk [vmem:[#allocation3 + $0xd8] sm:$0xff] %vm1446_vm7, %v1405_v48  ;;  %v2435_v18 = vadd.f32 %v4100_v45, %v2434_v40  ;;  %v4900_v48 = vld [vmem:[#allocation22_spill] sm:$0xff]  ;;  %v4901_v40 = vld [vmem:[#allocation31_spill] sm:$0xff] }
 0x329   : > { %1667 = vst.msk [vmem:[#allocation3 + $0xd8] sm:$0xff] %vm1639_vm8, %v1598_v60 }
 0x32a   : > { %2045 = vst.msk [vmem:[#allocation3 + $0x90] sm:$0xff] %vm2026_vm10, %v1967_v47  ;;  %v2514_v43 = vmax.f32 %v2435_v18, 0.0 }
 0x32b   : > { %1412 = vrot.lane.b32.xlu2 %v4403_v58, %s3186_s14  ;;  %2238 = vst.msk [vmem:[#allocation3 + $0x90] sm:$0xff] %vm2219_vm11, %v2160_v52  ;;  %v4893_v52 = vld [vmem:[#allocation15_spill] sm:$0xff] }
 0x32c   : > { %3120 = vmatmul.msk.f32.gmra.mxu2 %vm319_vm1, %v2514_v43  ;;  %1589 = vrot.lane.b32.xlu1 %v4422_v7, %s3188_s16 }
 0x32d   : > { %v2162_v4 = vpop.permute.xlu2 %2161  ;;  %2185 = vrot.lane.b32.xlu0 %v2090_v36, %s3191_s19  ;;  %v4562_v36 = vpop.f32.mrf.mxu2 }
 0x32e   : > { %v1790_v31 = vpop.permute.xlu1 %1789 }
 0x32f   : > { %v1969_v35 = vpop.permute.xlu0 %1968  ;;  %1860 = vst.msk [vmem:[#allocation3 + $0xd0] sm:$0xff] %vm1833_vm9, %v1790_v31 }
 0x330   : > { %2053 = vst.msk [vmem:[#allocation3 + $0xd0] sm:$0xff] %vm2026_vm10, %v1983_v5 }
 0x332   : > { %v2270_v39 = vld [vmem:[#allocation3 + $0x90] sm:$0xff] }
 0x333   : > { %1976 = vrot.lane.b32.xlu2 %v4280_v19, %s3189_s17  ;;  %3097 = vmatmul.msk.f32.gmra.mxu1 %vm2293_vm12, %v2270_v39  ;;  %v1897_v19 = vld [vmem:[#allocation2 + $0x1a1] sm:$0xff] }
 0x334   : > { %1605 = vrot.lane.b32.xlu1 %v4434_v62, %s3188_s16  ;;  %v2437_v15 = vpop.f32.mrf.mxu1 }
 0x335   : > { %v1584_v58 = vpop.permute.xlu2 %1583  ;;  %2791 = vrot.lane.b32.xlu0 %v4885_v46, %s3192_s10  ;;  %v2438_v42 = vadd.f32 %v4100_v45, %v2437_v15  ;;  %v4903_v15 = vld [vmem:[#allocation26_spill] sm:$0xff] }
 0x336   : > { %1660 = vst.msk [vmem:[#allocation3 + $0xa0] sm:$0xff] %vm1639_vm8, %v1584_v58  ;;  %v2176_v21 = vpop.permute.xlu1 %2175  ;;  %v4904_v46 = vld [vmem:[#allocation34_spill] sm:$0xff] }
 0x337   : > { %v2515_v59 = vmax.f32 %v2438_v42, 0.0  ;;  %v1985_v26 = vpop.permute.xlu0 %1984  ;;  %2246 = vst.msk [vmem:[#allocation3 + $0xd0] sm:$0xff] %vm2219_vm11, %v2176_v21 }
 0x339   : > { %3121 = vmatmul.msk.f32.gmra.mxu2 %vm319_vm1, %v2515_v59 }
 0x33b   : > { %1992 = vrot.lane.b32.xlu2 %v1897_v19, %s3189_s17  ;;  %v4905_v19 = vld [vmem:[#allocation30_spill] sm:$0xff] }
 0x33c   : > { %2169 = vrot.lane.b32.xlu1 %v4305_v17, %s3191_s19  ;;  %v4887_v17 = vld [vmem:[#allocation6_spill] sm:$0xff]  ;;  %s4641_s19 = scalar_lea.vmem %s4799_s7, %s3042_s29 }
 0x33d   : > { %v1600_v34 = vpop.permute.xlu2 %1599  ;;  %2797 = vrot.lane.b32.xlu0 %v4886_v57, %s3192_s10  ;;  %v2440_v54 = vpop.f32.mrf.mxu1  ;;  %v4906_v57 = vld [vmem:[#allocation29_spill] sm:$0xff] }
 0x33e   : > { %v2441_v37 = vadd.f32 %v4100_v45, %v2440_v54  ;;  %v1776_v33 = vpop.permute.xlu1 %1775  ;;  %v2278_v7 = vld [vmem:[#allocation3 + $0xd0] sm:$0xff] }
 0x33f   : > { %v1407_v63 = vpop.permute.xlu0 %1406  ;;  %1853 = vst.msk [vmem:[#allocation3 + $0x98] sm:$0xff] %vm1833_vm9, %v1776_v33  ;;  %3105 = vmatmul.msk.f32.gmra.mxu3 %vm2293_vm12, %v2278_v7 }
 0x340   : > { %v2516_v50 = vmax.f32 %v2441_v37, 0.0  ;;  %1475 = vst.msk [vmem:[#allocation3 + $0xe0] sm:$0xff] %vm1446_vm7, %v1407_v63  ;;  %v4907_v37 = vld [vmem:[#allocation7_spill] sm:$0xff] }
 0x341   : > { %1668 = vst.msk [vmem:[#allocation3 + $0xe0] sm:$0xff] %vm1639_vm8, %v1600_v34 }
 0x342   : > { %2046 = vst.msk [vmem:[#allocation3 + $0x98] sm:$0xff] %vm2026_vm10, %v1969_v35  ;;  %3122 = vmatmul.msk.f32.gmra.mxu2 %vm319_vm1, %v2516_v50  ;;  %v4902_v35 = vld [vmem:[#allocation27_spill] sm:$0xff] }
 0x343   : > { %2789 = vrot.lane.b32.xlu2 %v4887_v17, %s3192_s10  ;;  %2239 = vst.msk [vmem:[#allocation3 + $0x98] sm:$0xff] %vm2219_vm11, %v2162_v4 }
 0x344   : > { %2787 = vrot.lane.b32.xlu1 %v4888_v55, %s3192_s10  ;;  %v4908_v55 = vld [vmem:[#allocation33_spill] sm:$0xff] }
 0x345   : > { %v2164_v45 = vpop.permute.xlu2 %2163  ;;  %2803 = vrot.lane.b32.xlu0 %v4889_v1, %s3192_s10 }
 0x346   : > { %v1792_v12 = vpop.permute.xlu1 %1791 }
 0x347   : > { %v1971_v23 = vpop.permute.xlu0 %1970  ;;  %1861 = vst.msk [vmem:[#allocation3 + $0xd8] sm:$0xff] %vm1833_vm9, %v1792_v12  ;;  %v2443_v44 = vpop.f32.mrf.mxu1  ;;  %v4909_v12 = vld [vmem:[#allocation32_spill] sm:$0xff] }
 0x348   : > { %2054 = vst.msk [vmem:[#allocation3 + $0xd8] sm:$0xff] %vm2026_vm10, %v1985_v26  ;;  %v2444_v13 = vadd.f32 %v4516_v61, %v2443_v44  ;;  %v4576_v26 = vpop.f32.mrf.mxu2 }
 0x34a   : > { %v2517_v62 = vmax.f32 %v2444_v13, 0.0  ;;  %v2271_v9 = vld [vmem:[#allocation3 + $0x98] sm:$0xff] }
 0x34b   : > { %2795 = vrot.lane.b32.xlu2 %v4890_v16, %s3192_s10  ;;  %3098 = vmatmul.msk.f32.gmra.mxu1 %vm2293_vm12, %v2271_v9 }
 0x34c   : > { %3123 = vmatmul.msk.f32.gmra.mxu2 %vm319_vm1, %v2517_v62  ;;  %2793 = vrot.lane.b32.xlu1 %v4891_v2, %s3192_s10 }
 0x34d   : > { %v1586_v51 = vpop.permute.xlu2 %1585  ;;  %2809 = vrot.lane.b32.xlu0 %v4892_v11, %s3192_s10 }
 0x34e   : > { %1661 = vst.msk [vmem:[#allocation3 + $0xa8] sm:$0xff] %vm1639_vm8, %v1586_v51  ;;  %v2178_v3 = vpop.permute.xlu1 %2177  ;;  %v4911_v51 = vld [vmem:[#allocation5_spill] sm:$0xff] }
 0x34f   : > { %v1987_v29 = vpop.permute.xlu0 %1986  ;;  %2247 = vst.msk [vmem:[#allocation3 + $0xd8] sm:$0xff] %vm2219_vm11, %v2178_v3  ;;  %v4912_v3 = vld [vmem:[#allocation35_spill] sm:$0xff] }
 0x353   : > { %2801 = vrot.lane.b32.xlu2 %v4893_v52, %s3192_s10 }
 0x354   : > { %2799 = vrot.lane.b32.xlu1 %v4894_v49, %s3192_s10  ;;  %v2446_v53 = vpop.f32.mrf.mxu1  ;;  %v4913_v49 = vld [vmem:[#allocation13_spill] sm:$0xff] }
 0x355   : > { %v1602_v24 = vpop.permute.xlu2 %1601  ;;  %2815 = vrot.lane.b32.xlu0 %v4895_v8, %s3192_s10  ;;  %v2447_v47 = vadd.f32 %v4516_v61, %v2446_v53 }
 0x356   : > { %v1778_v41 = vpop.permute.xlu1 %1777  ;;  %v2279_v14 = vld [vmem:[#allocation3 + $0xd8] sm:$0xff] }
 0x357   : > { %v2518_v28 = vmax.f32 %v2447_v47, 0.0  ;;  %v1409_v38 = vpop.permute.xlu0 %1408  ;;  %1854 = vst.msk [vmem:[#allocation3 + $0xa0] sm:$0xff] %vm1833_vm9, %v1778_v41  ;;  %3106 = vmatmul.msk.f32.gmra.mxu3 %vm2293_vm12, %v2279_v14  ;;  %v4914_v47 = vld [vmem:[#allocation9_spill] sm:$0xff] }
 0x358   : > { %1476 = vst.msk [vmem:[#allocation3 + $0xe8] sm:$0xff] %vm1446_vm7, %v1409_v38 }
 0x359   : > { %1669 = vst.msk [vmem:[#allocation3 + $0xe8] sm:$0xff] %vm1639_vm8, %v1602_v24  ;;  %3124 = vmatmul.msk.f32.gmra.mxu2 %vm319_vm1, %v2518_v28  ;;  %v4915_v28 = vld [vmem:[#allocation23_spill] sm:$0xff] }
 0x35a   : > { %2047 = vst.msk [vmem:[#allocation3 + $0xa0] sm:$0xff] %vm2026_vm10, %v1971_v23  ;;  %v4910_v23 = vld [vmem:[#allocation16_spill] sm:$0xff] }
 0x35b   : > { %2807 = vrot.lane.b32.xlu2 %v4896_v25, %s3192_s10  ;;  %2240 = vst.msk [vmem:[#allocation3 + $0xa0] sm:$0xff] %vm2219_vm11, %v2164_v45  ;;  %v4916_v25 = vld [vmem:[#allocation21_spill] sm:$0xff] }
 0x35c   : > { %2805 = vrot.lane.b32.xlu1 %v4897_v20, %s3192_s10 }
 0x35d   : > { %v2166_v10 = vpop.permute.xlu2 %2165  ;;  %2821 = vrot.lane.b32.xlu0 %v4898_v22, %s3192_s10  ;;  %v2449_v5 = vpop.f32.mrf.mxu1 }
 0x35e   : > { %v2450_v0 = vadd.f32 %v4516_v61, %v2449_v5  ;;  %v1794_v27 = vpop.permute.xlu1 %1793  ;;  %v4590_v17 = vpop.f32.mrf.mxu2 }
 0x35f   : > { %v1973_v56 = vpop.permute.xlu0 %1972  ;;  %1862 = vst.msk [vmem:[#allocation3 + $0xe0] sm:$0xff] %vm1833_vm9, %v1794_v27  ;;  %v4630_v27 = vld [vmem:[%s4798_s6] ss:$0 sm:$0xff] }
 0x360   : > { %v2519_v30 = vmax.f32 %v2450_v0, 0.0  ;;  %2055 = vst.msk [vmem:[#allocation3 + $0xe0] sm:$0xff] %vm2026_vm10, %v1987_v29 }
 0x362   : > { %v2272_v60 = vld [vmem:[#allocation3 + $0xa0] sm:$0xff]  ;;  %3125 = vmatmul.msk.f32.gmra.mxu2 %vm319_vm1, %v2519_v30  ;;  %v2663_v30 = vadd.f32 %v4630_v27, %v4576_v26 }
 0x363   : > { %2813 = vrot.lane.b32.xlu2 %v4899_v6, %s3192_s10  ;;  %3099 = vmatmul.msk.f32.gmra.mxu1 %vm2293_vm12, %v2272_v60 }
 0x364   : > { %2811 = vrot.lane.b32.xlu1 %v4900_v48, %s3192_s10 }
 0x365   : > { %v1395_v32 = vpop.permute.xlu2 %1394  ;;  %2827 = vrot.lane.b32.xlu0 %v4901_v40, %s3192_s10 }
 0x366   : > { %1469 = vst.msk [vmem:[#allocation3 + $0xb0] sm:$0xff] %vm1446_vm7, %v1395_v32  ;;  %v2180_v18 = vpop.permute.xlu1 %2179 }
 0x367   : > { %v1989_v43 = vpop.permute.xlu0 %1988  ;;  %2248 = vst.msk [vmem:[#allocation3 + $0xe0] sm:$0xff] %vm2219_vm11, %v2180_v18 }
 0x368   : > { %v2452_v4 = vpop.f32.mrf.mxu1 }
 0x369   : > { %v2453_v31 = vadd.f32 %v4516_v61, %v2452_v4 }
 0x36b   : > { %2819 = vrot.lane.b32.xlu2 %v4902_v35, %s3192_s10  ;;  %v2520_v39 = vmax.f32 %v2453_v31, 0.0 }
 0x36c   : > { %2817 = vrot.lane.b32.xlu1 %v4903_v15, %s3192_s10 }
 0x36d   : > { %v1782_v58 = vpop.permute.xlu2 %1781  ;;  %3126 = vmatmul.msk.f32.gmra.mxu2 %vm319_vm1, %v2520_v39  ;;  %2833 = vrot.lane.b32.xlu0 %v4904_v46, %s3192_s10 }
 0x36e   : > { %v1780_v42 = vpop.permute.xlu1 %1779  ;;  %v2280_v21 = vld [vmem:[#allocation3 + $0xe0] sm:$0xff] }
 0x36f   : > { %v1588_v59 = vpop.permute.xlu0 %1587  ;;  %1855 = vst.msk [vmem:[#allocation3 + $0xa8] sm:$0xff] %vm1833_vm9, %v1780_v42  ;;  %3107 = vmatmul.msk.f32.gmra.mxu3 %vm2293_vm12, %v2280_v21 }
 0x370   : > { %1662 = vst.msk [vmem:[#allocation3 + $0xb0] sm:$0xff] %vm1639_vm8, %v1588_v59 }
 0x371   : > { %1856 = vst.msk [vmem:[#allocation3 + $0xb0] sm:$0xff] %vm1833_vm9, %v1782_v58  ;;  %v2666_v58 = vadd.f32 %v4630_v27, %v4590_v17 }
 0x372   : > { %2048 = vst.msk [vmem:[#allocation3 + $0xa8] sm:$0xff] %vm2026_vm10, %v1973_v56 }
 0x373   : > { %2825 = vrot.lane.b32.xlu2 %v4905_v19, %s3192_s10  ;;  %2241 = vst.msk [vmem:[#allocation3 + $0xa8] sm:$0xff] %vm2219_vm11, %v2166_v10 }
 0x374   : > { %2823 = vrot.lane.b32.xlu1 %v4906_v57, %s3192_s10  ;;  %v2455_v54 = vpop.f32.mrf.mxu1 }
 0x375   : > { %v1798_v34 = vpop.permute.xlu2 %1797  ;;  %2839 = vrot.lane.b32.xlu0 %v4907_v37, %s3192_s10  ;;  %v2456_v33 = vadd.f32 %v4516_v61, %v2455_v54 }
 0x376   : > { %v1796_v7 = vpop.permute.xlu1 %1795 }
 0x377   : > { %v2521_v63 = vmax.f32 %v2456_v33, 0.0  ;;  %v1604_v50 = vpop.permute.xlu0 %1603  ;;  %1863 = vst.msk [vmem:[#allocation3 + $0xe8] sm:$0xff] %vm1833_vm9, %v1796_v7 }
 0x378   : > { %2056 = vst.msk [vmem:[#allocation3 + $0xe8] sm:$0xff] %vm2026_vm10, %v1989_v43 }
 0x379   : > { %3127 = vmatmul.msk.f32.gmra.mxu2 %vm319_vm1, %v2521_v63 }
 0x37a   : > { %v2273_v45 = vld [vmem:[#allocation3 + $0xa8] sm:$0xff] }
 0x37b   : > { %2831 = vrot.lane.b32.xlu2 %v4908_v55, %s3192_s10  ;;  %3100 = vmatmul.msk.f32.gmra.mxu1 %vm2293_vm12, %v2273_v45 }
 0x37c   : > { %2829 = vrot.lane.b32.xlu1 %v4909_v12, %s3192_s10  ;;  %v4601_v16 = vpop.f32.mrf.mxu2 }
 0x37d   : > { %v2184_v1 = vpop.permute.xlu2 %2183  ;;  %2845 = vrot.lane.b32.xlu0 %v4910_v23, %s3192_s10 }
 0x37e   : > { %v2182_v44 = vpop.permute.xlu1 %2181 }
 0x37f   : > { %v2168_v13 = vpop.permute.xlu0 %2167  ;;  %2249 = vst.msk [vmem:[#allocation3 + $0xe8] sm:$0xff] %vm2219_vm11, %v2182_v44 }
 0x380   : > { %v2458_v62 = vpop.f32.mrf.mxu1 }
 0x381   : > { %v2459_v9 = vadd.f32 %v4516_v61, %v2458_v62 }
 0x383   : > { %2837 = vrot.lane.b32.xlu2 %v4911_v51, %s3192_s10  ;;  %v2522_v2 = vmax.f32 %v2459_v9, 0.0 }
 0x384   : > { %2835 = vrot.lane.b32.xlu1 %v4912_v3, %s3192_s10 }
 0x385   : > { %v1413_v11 = vpop.permute.xlu2 %1412  ;;  %3128 = vmatmul.msk.f32.gmra.mxu2 %vm319_vm1, %v2522_v2  ;;  %v2671_v53 = vpop.f32.mrf.mxu2 }
 0x386   : > { %1478 = vst.msk [vmem:[#allocation3 + $0xf8] sm:$0xff] %vm1446_vm7, %v1413_v11  ;;  %v1411_v29 = vpop.permute.xlu1 %1410  ;;  %v2281_v52 = vld [vmem:[#allocation3 + $0xe8] sm:$0xff]  ;;  %v2672_v31 = vadd.f32 %v4630_v27, %v2671_v53  ;;  %v2669_v53 = vadd.f32 %v4630_v27, %v4601_v16 }
 0x387   : > { %v1397_v24 = vpop.permute.xlu0 %1396  ;;  %1477 = vst.msk [vmem:[#allocation3 + $0xf0] sm:$0xff] %vm1446_vm7, %v1411_v29  ;;  %3108 = vmatmul.msk.f32.gmra.mxu3 %vm2293_vm12, %v2281_v52 }
 0x388   : > { %1470 = vst.msk [vmem:[#allocation3 + $0xb8] sm:$0xff] %vm1446_vm7, %v1397_v24 }
 0x389   : > { %1670 = vst.msk [vmem:[#allocation3 + $0xf0] sm:$0xff] %vm1639_vm8, %v1604_v50 }
 0x38a   : > { %1864 = vst.msk [vmem:[#allocation3 + $0xf0] sm:$0xff] %vm1833_vm9, %v1798_v34 }
 0x38b   : > { %2843 = vrot.lane.b32.xlu2 %v4913_v49, %s3192_s10 }
 0x38c   : > { %2841 = vrot.lane.b32.xlu1 %v4914_v47, %s3192_s10 }
 0x38d   : > { %v1977_v8 = vpop.permute.xlu2 %1976 }
 0x38e   : > { %v1975_v41 = vpop.permute.xlu1 %1974 }
 0x38f   : > { %v1784_v14 = vpop.permute.xlu0 %1783  ;;  %2049 = vst.msk [vmem:[#allocation3 + $0xb0] sm:$0xff] %vm2026_vm10, %v1975_v41  ;;  %v2674_v10 = vpop.f32.mrf.mxu2 }
 0x390   : > { %2242 = vst.msk [vmem:[#allocation3 + $0xb0] sm:$0xff] %vm2219_vm11, %v2168_v13  ;;  %v2675_v37 = vadd.f32 %v4630_v27, %v2674_v10  ;;  %v2660_v13 = vadd.f32 %v4630_v27, %v4562_v36 }
 0x392   : > { %v4658_v26 = vpop.f32.mrf.mxu3 }
 0x393   : > { %2849 = vrot.lane.b32.xlu2 %v4915_v28, %s3192_s10 }
 0x394   : > { %2847 = vrot.lane.b32.xlu1 %v4916_v25, %s3192_s10 }
 0x395   : > { %v1993_v38 = vpop.permute.xlu2 %1992 }
 0x396   : > { %v1991_v20 = vpop.permute.xlu1 %1990 }
 0x397   : > { %v1800_v22 = vpop.permute.xlu0 %1799  ;;  %2057 = vst.msk [vmem:[#allocation3 + $0xf0] sm:$0xff] %vm2026_vm10, %v1991_v20  ;;  %v2274_v5 = vld [vmem:[#allocation3 + $0xb0] sm:$0xff] }
 0x398   : > { %2250 = vst.msk [vmem:[#allocation3 + $0xf0] sm:$0xff] %vm2219_vm11, %v2184_v1  ;;  %v2461_v0 = vpop.f32.mrf.mxu1  ;;  %3101 = vmatmul.msk.f32.gmra.mxu1 %vm2293_vm12, %v2274_v5 }
 0x399   : > { %v2462_v56 = vadd.f32 %v4516_v61, %v2461_v0 }
 0x39b   : > { %v2523_v60 = vmax.f32 %v2462_v56, 0.0 }
 0x39c   : > { %v4643_v48 = vpop.f32.mrf.mxu2 }
 0x39d   : > { %v2790_v6 = vpop.permute.xlu2 %2789  ;;  %3129 = vmatmul.msk.f32.gmra.mxu2 %vm319_vm1, %v2523_v60 }
 0x39e   : > { %v2884_v32 = vadd.f32 %v2790_v6, %v2663_v30  ;;  %v1590_v40 = vpop.permute.xlu1 %1589 }
 0x39f   : > { %v2186_v43 = vpop.permute.xlu0 %2185  ;;  %1663 = vst.msk [vmem:[#allocation3 + $0xb8] sm:$0xff] %vm1639_vm8, %v1590_v40  ;;  %v2282_v4 = vld [vmem:[#allocation3 + $0xf0] sm:$0xff] }
 0x3a0   : > { %v2916_v18 = vmax.f32 %v2884_v32, 0.0  ;;  %1857 = vst.msk [vmem:[#allocation3 + $0xb8] sm:$0xff] %vm1833_vm9, %v1784_v14  ;;  %3109 = vmatmul.msk.f32.gmra.mxu3 %vm2293_vm12, %v2282_v4 }
 0x3a1   : > { %2050 = vst.msk [vmem:[#allocation3 + $0xb8] sm:$0xff] %vm2026_vm10, %v1977_v8 }
 0x3a2   : > { %2949 = vst.msk [vmem:[%s4641_s19 + $0x8] sm:$0xff] %vm2947_vm13, %v2916_v18 }
 0x3a5   : > { %v2796_v35 = vpop.permute.xlu2 %2795  ;;  %v2680_v21 = vpop.f32.mrf.mxu2 }
 0x3a6   : > { %v2887_v39 = vadd.f32 %v2796_v35, %v2672_v31  ;;  %v1606_v15 = vpop.permute.xlu1 %1605  ;;  %v2681_v34 = vadd.f32 %v4630_v27, %v2680_v21 }
 0x3a7   : > { %v2792_v42 = vpop.permute.xlu0 %2791  ;;  %1671 = vst.msk [vmem:[#allocation3 + $0xf8] sm:$0xff] %vm1639_vm8, %v1606_v15 }
 0x3a8   : > { %v2919_v46 = vmax.f32 %v2887_v39, 0.0  ;;  %v2885_v59 = vadd.f32 %v2792_v42, %v2666_v58  ;;  %1865 = vst.msk [vmem:[#allocation3 + $0xf8] sm:$0xff] %vm1833_vm9, %v1800_v22 }
 0x3a9   : > { %2058 = vst.msk [vmem:[#allocation3 + $0xf8] sm:$0xff] %vm2026_vm10, %v1993_v38  ;;  %v2678_v38 = vadd.f32 %v4630_v27, %v4643_v48 }
 0x3aa   : > { %2952 = vst.msk [vmem:[%s4641_s19 + $0x20] sm:$0xff] %vm2947_vm13, %v2919_v46  ;;  %v2917_v19 = vmax.f32 %v2885_v59, 0.0  ;;  %v2485_v55 = vpop.f32.mrf.mxu3 }
 0x3ab   : > { %2251 = vst.msk [vmem:[#allocation3 + $0xf8] sm:$0xff] %vm2219_vm11, %v2186_v43  ;;  %v2486_v62 = vadd.f32 %v4516_v61, %v2485_v55 }
 0x3ac   : > { %2950 = vst.msk [vmem:[%s4641_s19 + $0x10] sm:$0xff] %vm2947_vm13, %v2917_v19 }
 0x3ad   : > { %v2802_v57 = vpop.permute.xlu2 %2801  ;;  %v2531_v52 = vmax.f32 %v2486_v62, 0.0 }
 0x3ae   : > { %v2890_v54 = vadd.f32 %v2802_v57, %v2681_v34  ;;  %v2170_v33 = vpop.permute.xlu1 %2169 }
 0x3af   : > { %v2798_v63 = vpop.permute.xlu0 %2797  ;;  %2243 = vst.msk [vmem:[#allocation3 + $0xb8] sm:$0xff] %vm2219_vm11, %v2170_v33  ;;  %v2683_v44 = vpop.f32.mrf.mxu2 }
 0x3b0   : > { %v2922_v7 = vmax.f32 %v2890_v54, 0.0  ;;  %v2888_v50 = vadd.f32 %v2798_v63, %v2675_v37  ;;  %v2464_v17 = vpop.f32.mrf.mxu1  ;;  %v2684_v9 = vadd.f32 %v4630_v27, %v2683_v44 }
 0x3b1   : > { %v2465_v45 = vadd.f32 %v4516_v61, %v2464_v17 }
 0x3b2   : > { %2955 = vst.msk [vmem:[%s4641_s19 + $0x38] sm:$0xff] %vm2947_vm13, %v2922_v7  ;;  %v2920_v1 = vmax.f32 %v2888_v50, 0.0  ;;  %v2283_v12 = vld [vmem:[#allocation3 + $0xf8] sm:$0xff] }
 0x3b3   : > { %v2524_v23 = vmax.f32 %v2465_v45, 0.0  ;;  %3110 = vmatmul.msk.f32.gmra.mxu3 %vm2293_vm12, %v2283_v12 }
 0x3b4   : > { %2953 = vst.msk [vmem:[%s4641_s19 + $0x28] sm:$0xff] %vm2947_vm13, %v2920_v1 }
 0x3b5   : > { %3130 = vmatmul.msk.f32.gmra.mxu2 %vm319_vm1, %v2524_v23  ;;  %v2808_v5 = vpop.permute.xlu2 %2807 }
 0x3b6   : > { %v2788_v51 = vpop.permute.xlu1 %2787  ;;  %v2275_v2 = vld [vmem:[#allocation3 + $0xb8] sm:$0xff] }
 0x3b7   : > { %v2804_v11 = vpop.permute.xlu0 %2803  ;;  %v2883_v3 = vadd.f32 %v2788_v51, %v2660_v13  ;;  %3102 = vmatmul.msk.f32.gmra.mxu1 %vm2293_vm12, %v2275_v2 }
 0x3b8   : > { %v2891_v29 = vadd.f32 %v2804_v11, %v2684_v9 }
 0x3b9   : > { %v2915_v24 = vmax.f32 %v2883_v3, 0.0 }
 0x3ba   : > { %v2923_v49 = vmax.f32 %v2891_v29, 0.0 }
 0x3bb   : > { %2948 = vst.msk [vmem:[%s4641_s19] sm:$0xff] %vm2947_vm13, %v2915_v24  ;;  %3137 = vmatmul.msk.f32.vlgmr.msra.gmra.mxu3 %vm319_vm1, %v2531_v52 }
 0x3bc   : > { %2956 = vst.msk [vmem:[%s4641_s19 + $0x40] sm:$0xff] %vm2947_vm13, %v2923_v49  ;;  %v2686_v36 = vpop.f32.mrf.mxu2 }
 0x3bd   : > { %v2687_v48 = vadd.f32 %v4630_v27, %v2686_v36  ;;  %v2814_v50 = vpop.permute.xlu2 %2813 }
 0x3be   : > { %v2794_v8 = vpop.permute.xlu1 %2793 }
 0x3bf   : > { %v2886_v47 = vadd.f32 %v2794_v8, %v2669_v53  ;;  %v2810_v31 = vpop.permute.xlu0 %2809 }
 0x3c1   : > { %v2918_v41 = vmax.f32 %v2886_v47, 0.0 }
 0x3c2   : > { %v2488_v14 = vpop.f32.mrf.mxu3 }
 0x3c3   : > { %2951 = vst.msk [vmem:[%s4641_s19 + $0x18] sm:$0xff] %vm2947_vm13, %v2918_v41  ;;  %v2489_v28 = vadd.f32 %v4516_v61, %v2488_v14 }
 0x3c5   : > { %v2532_v25 = vmax.f32 %v2489_v28, 0.0  ;;  %v2689_v10 = vpop.f32.mrf.mxu2  ;;  %v2820_v8 = vpop.permute.xlu2 %2819 }
 0x3c6   : > { %v2690_v20 = vadd.f32 %v4630_v27, %v2689_v10  ;;  %v2800_v22 = vpop.permute.xlu1 %2799 }
 0x3c7   : > { %v2889_v16 = vadd.f32 %v2800_v22, %v2678_v38  ;;  %3138 = vmatmul.msk.f32.gmra.mxu3 %vm319_vm1, %v2532_v25  ;;  %v2816_v12 = vpop.permute.xlu0 %2815 }
 0x3c8   : > { %v2893_v0 = vadd.f32 %v2808_v5, %v2690_v20  ;;  %v2467_v56 = vpop.f32.mrf.mxu1 }
 0x3c9   : > { %v2921_v30 = vmax.f32 %v2889_v16, 0.0  ;;  %v2468_v60 = vadd.f32 %v4516_v61, %v2467_v56 }
 0x3ca   : > { %v2925_v6 = vmax.f32 %v2893_v0, 0.0 }
 0x3cb   : > { %2954 = vst.msk [vmem:[%s4641_s19 + $0x30] sm:$0xff] %vm2947_vm13, %v2921_v30  ;;  %v2525_v32 = vmax.f32 %v2468_v60, 0.0 }
 0x3cc   : > { %2958 = vst.msk [vmem:[%s4641_s19 + $0x50] sm:$0xff] %vm2947_vm13, %v2925_v6 }
 0x3cd   : > { %3131 = vmatmul.msk.f32.gmra.mxu2 %vm319_vm1, %v2525_v32  ;;  %v2826_v32 = vpop.permute.xlu2 %2825 }
 0x3ce   : > { %v2806_v40 = vpop.permute.xlu1 %2805 }
 0x3cf   : > { %v2892_v18 = vadd.f32 %v2806_v40, %v2687_v48  ;;  %v2692_v43 = vpop.f32.mrf.mxu2  ;;  %v2822_v16 = vpop.permute.xlu0 %2821 }
 0x3d0   : > { %v2693_v4 = vadd.f32 %v4630_v27, %v2692_v43 }
 0x3d1   : > { %v2924_v35 = vmax.f32 %v2892_v18, 0.0 }
 0x3d2   : > { %v2894_v39 = vadd.f32 %v2810_v31, %v2693_v4 }
 0x3d3   : > { %2957 = vst.msk [vmem:[%s4641_s19 + $0x48] sm:$0xff] %vm2947_vm13, %v2924_v35 }
 0x3d4   : > { %v2926_v58 = vmax.f32 %v2894_v39, 0.0 }
 0x3d5   : > { %v4738_v18 = vpop.permute.xlu2 %2831 }
 0x3d6   : > { %2959 = vst.msk [vmem:[%s4641_s19 + $0x58] sm:$0xff] %vm2947_vm13, %v2926_v58  ;;  %v2812_v19 = vpop.permute.xlu1 %2811 }
 0x3d7   : > { %v2828_v35 = vpop.permute.xlu0 %2827 }
 0x3da   : > { %v2491_v15 = vpop.f32.mrf.mxu3 }
 0x3db   : > { %v2492_v46 = vadd.f32 %v4516_v61, %v2491_v15 }
 0x3dc   : > { %v2695_v42 = vpop.f32.mrf.mxu2 }
 0x3dd   : > { %v2533_v21 = vmax.f32 %v2492_v46, 0.0  ;;  %v2696_v59 = vadd.f32 %v4630_v27, %v2695_v42  ;;  %v2483_v42 = vadd.f32 %v4516_v61, %v4658_v26 }
 0x3de   : > { %v2818_v52 = vpop.permute.xlu1 %2817 }
 0x3df   : > { %v2895_v34 = vadd.f32 %v2812_v19, %v2696_v59  ;;  %3139 = vmatmul.msk.f32.gmra.mxu3 %vm319_vm1, %v2533_v21 }
 0x3e0   : > { %v2470_v57 = vpop.f32.mrf.mxu1 }
 0x3e1   : > { %v2927_v54 = vmax.f32 %v2895_v34, 0.0  ;;  %v2471_v37 = vadd.f32 %v4516_v61, %v2470_v57  ;;  %v2530_v34 = vmax.f32 %v2483_v42, 0.0 }
 0x3e3   : > { %2960 = vst.msk [vmem:[%s4641_s19 + $0x60] sm:$0xff] %vm2947_vm13, %v2927_v54  ;;  %v2526_v33 = vmax.f32 %v2471_v37, 0.0  ;;  %v2838_v54 = vpop.permute.xlu2 %2837 }
 0x3e5   : > { %3132 = vmatmul.msk.f32.gmra.mxu2 %vm319_vm1, %v2526_v33  ;;  %v2698_v7 = vpop.f32.mrf.mxu2  ;;  %v2834_v33 = vpop.permute.xlu0 %2833 }
 0x3e6   : > { %v2699_v63 = vadd.f32 %v4630_v27, %v2698_v7  ;;  %v2824_v46 = vpop.permute.xlu1 %2823 }
 0x3e8   : > { %v2896_v17 = vadd.f32 %v2814_v50, %v2699_v63 }
 0x3ea   : > { %v2928_v45 = vmax.f32 %v2896_v17, 0.0 }
 0x3ec   : > { %2961 = vst.msk [vmem:[%s4641_s19 + $0x68] sm:$0xff] %vm2947_vm13, %v2928_v45 }
 0x3ed   : > { %v2840_v63 = vpop.permute.xlu0 %2839 }
 0x3ee   : > { %v2830_v45 = vpop.permute.xlu1 %2829 }
 0x3f0   : > { %v2701_v55 = vpop.f32.mrf.mxu2 }
 0x3f1   : > { %v2702_v1 = vadd.f32 %v4630_v27, %v2701_v55 }
 0x3f2   : > { %v2494_v23 = vpop.f32.mrf.mxu3 }
 0x3f3   : > { %v2897_v44 = vadd.f32 %v2816_v12, %v2702_v1  ;;  %v2495_v13 = vadd.f32 %v4516_v61, %v2494_v23 }
 0x3f5   : > { %v2929_v62 = vmax.f32 %v2897_v44, 0.0  ;;  %v2534_v9 = vmax.f32 %v2495_v13, 0.0 }
 0x3f6   : > { %v2836_v44 = vpop.permute.xlu1 %2835 }
 0x3f7   : > { %2962 = vst.msk [vmem:[%s4641_s19 + $0x70] sm:$0xff] %vm2947_vm13, %v2929_v62  ;;  %3140 = vmatmul.msk.f32.gmra.mxu3 %vm319_vm1, %v2534_v9 }
 0x3f8   : > { %v2473_v51 = vpop.f32.mrf.mxu1 }
 0x3f9   : > { %v2474_v2 = vadd.f32 %v4516_v61, %v2473_v51 }
 0x3fb   : > { %v2527_v11 = vmax.f32 %v2474_v2, 0.0 }
 0x3fc   : > { %v2704_v3 = vpop.f32.mrf.mxu2 }
 0x3fd   : > { %3133 = vmatmul.msk.f32.gmra.mxu2 %vm319_vm1, %v2527_v11  ;;  %v2705_v29 = vadd.f32 %v4630_v27, %v2704_v3 }
 0x3fe   : > { %v2842_v9 = vpop.permute.xlu1 %2841 }
 0x3ff   : > { %v2898_v24 = vadd.f32 %v2818_v52, %v2705_v29 }
 0x401   : > { %v2930_v49 = vmax.f32 %v2898_v24, 0.0 }
 0x403   : > { %2963 = vst.msk [vmem:[%s4641_s19 + $0x78] sm:$0xff] %vm2947_vm13, %v2930_v49 }
 0x408   : > { %v2707_v36 = vpop.f32.mrf.mxu2 }
 0x409   : > { %v2708_v53 = vadd.f32 %v4630_v27, %v2707_v36  ;;  %v2844_v36 = vpop.permute.xlu2 %2843 }
 0x40a   : > { %v2497_v47 = vpop.f32.mrf.mxu3 }
 0x40b   : > { %v2899_v41 = vadd.f32 %v2820_v8, %v2708_v53  ;;  %v2498_v14 = vadd.f32 %v4516_v61, %v2497_v47 }
 0x40d   : > { %v2931_v28 = vmax.f32 %v2899_v41, 0.0  ;;  %v2535_v38 = vmax.f32 %v2498_v14, 0.0 }
 0x40f   : > { %2964 = vst.msk [vmem:[%s4641_s19 + $0x80] sm:$0xff] %vm2947_vm13, %v2931_v28  ;;  %3141 = vmatmul.msk.f32.gmra.mxu3 %vm319_vm1, %v2535_v38 }
 0x415   : > { %v2476_v25 = vpop.f32.mrf.mxu1 }
 0x416   : > { %v2477_v10 = vadd.f32 %v4516_v61, %v2476_v25 }
 0x418   : > { %v2528_v20 = vmax.f32 %v2477_v10, 0.0  ;;  %v2846_v10 = vpop.permute.xlu0 %2845 }
 0x41a   : > { %3134 = vmatmul.msk.f32.gmra.mxu2 %vm319_vm1, %v2528_v20 }
 0x420   : > { %v2710_v22 = vpop.f32.mrf.mxu2 }
 0x421   : > { %v2711_v5 = vadd.f32 %v4630_v27, %v2710_v22 }
 0x423   : > { %v2900_v0 = vadd.f32 %v2822_v16, %v2711_v5  ;;  %v2500_v56 = vpop.f32.mrf.mxu3 }
 0x424   : > { %v2501_v30 = vadd.f32 %v4516_v61, %v2500_v56 }
 0x425   : > { %v2932_v60 = vmax.f32 %v2900_v0, 0.0 }
 0x426   : > { %v2536_v6 = vmax.f32 %v2501_v30, 0.0 }
 0x427   : > { %2965 = vst.msk [vmem:[%s4641_s19 + $0x88] sm:$0xff] %vm2947_vm13, %v2932_v60 }
 0x428   : > { %3142 = vmatmul.msk.f32.gmra.mxu3 %vm319_vm1, %v2536_v6  ;;  %v2848_v6 = vpop.permute.xlu1 %2847 }
 0x434   : > { %v2479_v48 = vpop.f32.mrf.mxu1 }
 0x435   : > { %v2480_v40 = vadd.f32 %v4516_v61, %v2479_v48 }
 0x436   : > { %v2503_v43 = vpop.f32.mrf.mxu3 }
 0x437   : > { %v2529_v4 = vmax.f32 %v2480_v40, 0.0  ;;  %v2504_v31 = vadd.f32 %v4516_v61, %v2503_v43 }
 0x438   : > { %v2713_v39 = vpop.f32.mrf.mxu2 }
 0x439   : > { %v2537_v58 = vmax.f32 %v2504_v31, 0.0  ;;  %v2714_v15 = vadd.f32 %v4630_v27, %v2713_v39  ;;  %3135 = vmatmul.msk.f32.gmra.mxu2 %vm319_vm1, %v2529_v4 }
 0x43b   : > { %v2901_v21 = vadd.f32 %v2824_v46, %v2714_v15  ;;  %3143 = vmatmul.msk.f32.gmra.mxu3 %vm319_vm1, %v2537_v58 }
 0x43d   : > { %v2933_v59 = vmax.f32 %v2901_v21, 0.0 }
 0x43e   : > { %v2734_v19 = vpop.f32.mrf.mxu3 }
 0x43f   : > { %2966 = vst.msk [vmem:[%s4641_s19 + $0x90] sm:$0xff] %vm2947_vm13, %v2933_v59  ;;  %v2735_v57 = vadd.f32 %v4630_v27, %v2734_v19 }
 0x441   : > { %v2908_v37 = vadd.f32 %v2838_v54, %v2735_v57  ;;  %3136 = vmatmul.msk.f32.gmra.mxu2 %vm319_vm1, %v2530_v34 }
 0x443   : > { %v2940_v7 = vmax.f32 %v2908_v37, 0.0 }
 0x445   : > { %2973 = vst.msk [vmem:[%s4641_s19 + $0xc8] sm:$0xff] %vm2947_vm13, %v2940_v7 }
 0x44a   : > { %v2737_v61 = vpop.f32.mrf.mxu3 }
 0x44b   : > { %v2738_v26 = vadd.f32 %v4630_v27, %v2737_v61 }
 0x44d   : > { %v2909_v50 = vadd.f32 %v2840_v63, %v2738_v26 }
 0x44f   : > { %v2941_v17 = vmax.f32 %v2909_v50, 0.0 }
 0x450   : > { %v2716_v55 = vpop.f32.mrf.mxu2 }
 0x451   : > { %2974 = vst.msk [vmem:[%s4641_s19 + $0xd0] sm:$0xff] %vm2947_vm13, %v2941_v17  ;;  %v2717_v1 = vadd.f32 %v4630_v27, %v2716_v55 }
 0x453   : > { %v2902_v12 = vadd.f32 %v2826_v32, %v2717_v1 }
 0x455   : > { %v2934_v23 = vmax.f32 %v2902_v12, 0.0 }
 0x457   : > { %2967 = vst.msk [vmem:[%s4641_s19 + $0x98] sm:$0xff] %vm2947_vm13, %v2934_v23 }
 0x462   : > { %v2740_v13 = vpop.f32.mrf.mxu3 }
 0x463   : > { %v2741_v62 = vadd.f32 %v4630_v27, %v2740_v13 }
 0x465   : > { %v2910_v51 = vadd.f32 %v2842_v9, %v2741_v62 }
 0x467   : > { %v2942_v2 = vmax.f32 %v2910_v51, 0.0 }
 0x468   : > { %v2719_v11 = vpop.f32.mrf.mxu2 }
 0x469   : > { %2975 = vst.msk [vmem:[%s4641_s19 + $0xd8] sm:$0xff] %vm2947_vm13, %v2942_v2  ;;  %v2720_v3 = vadd.f32 %v4630_v27, %v2719_v11 }
 0x46b   : > { %v2903_v29 = vadd.f32 %v2828_v35, %v2720_v3  ;;  %v2850_v35 = vpop.permute.xlu2 %2849 }
 0x46d   : > { %v2935_v52 = vmax.f32 %v2903_v29, 0.0 }
 0x46f   : > { %2968 = vst.msk [vmem:[%s4641_s19 + $0xa0] sm:$0xff] %vm2947_vm13, %v2935_v52 }
 0x47a   : > { %v2743_v24 = vpop.f32.mrf.mxu3 }
 0x47b   : > { %v2744_v49 = vadd.f32 %v4630_v27, %v2743_v24 }
 0x47d   : > { %v2911_v53 = vadd.f32 %v2844_v36, %v2744_v49 }
 0x47f   : > { %v2943_v8 = vmax.f32 %v2911_v53, 0.0 }
 0x480   : > { %v2722_v47 = vpop.f32.mrf.mxu2 }
 0x481   : > { %2976 = vst.msk [vmem:[%s4641_s19 + $0xe0] sm:$0xff] %vm2947_vm13, %v2943_v8  ;;  %v2723_v41 = vadd.f32 %v4630_v27, %v2722_v47 }
 0x483   : > { %v2904_v14 = vadd.f32 %v2830_v45, %v2723_v41 }
 0x485   : > { %v2936_v28 = vmax.f32 %v2904_v14, 0.0 }
 0x487   : > { %2969 = vst.msk [vmem:[%s4641_s19 + $0xa8] sm:$0xff] %vm2947_vm13, %v2936_v28 }
 0x492   : > { %v2746_v38 = vpop.f32.mrf.mxu3 }
 0x493   : > { %v2747_v25 = vadd.f32 %v4630_v27, %v2746_v38 }
 0x495   : > { %v2912_v20 = vadd.f32 %v2846_v10, %v2747_v25 }
 0x497   : > { %v2944_v22 = vmax.f32 %v2912_v20, 0.0 }
 0x499   : > { %2977 = vst.msk [vmem:[%s4641_s19 + $0xe8] sm:$0xff] %vm2947_vm13, %v2944_v22 }
 0x49d   : > { %v2725_v5 = vpop.f32.mrf.mxu2 }
 0x49e   : > { %v2726_v16 = vadd.f32 %v4630_v27, %v2725_v5 }
 0x4a0   : > { %v2905_v0 = vadd.f32 %v4738_v18, %v2726_v16 }
 0x4a2   : > { %v2937_v56 = vmax.f32 %v2905_v0, 0.0 }
 0x4a4   : > { %2970 = vst.msk [vmem:[%s4641_s19 + $0xb0] sm:$0xff] %vm2947_vm13, %v2937_v56 }
 0x4ab   : > { %v2749_v30 = vpop.f32.mrf.mxu3 }
 0x4ac   : > { %v2750_v60 = vadd.f32 %v4630_v27, %v2749_v30 }
 0x4ae   : > { %v2913_v32 = vadd.f32 %v2848_v6, %v2750_v60 }
 0x4b0   : > { %v2945_v48 = vmax.f32 %v2913_v32, 0.0 }
 0x4b2   : > { %2978 = vst.msk [vmem:[%s4641_s19 + $0xf0] sm:$0xff] %vm2947_vm13, %v2945_v48 }
 0x4bc   : > { %v2728_v40 = vpop.f32.mrf.mxu2 }
 0x4bd   : > { %v2729_v43 = vadd.f32 %v4630_v27, %v2728_v40 }
 0x4be   : > { %v2752_v4 = vpop.f32.mrf.mxu3 }
 0x4bf   : > { %v2906_v31 = vadd.f32 %v2834_v33, %v2729_v43  ;;  %v2753_v18 = vadd.f32 %v4630_v27, %v2752_v4 }
 0x4c1   : > { %v2938_v39 = vmax.f32 %v2906_v31, 0.0  ;;  %v2914_v58 = vadd.f32 %v2850_v35, %v2753_v18 }
 0x4c3   : > { %2971 = vst.msk [vmem:[%s4641_s19 + $0xb8] sm:$0xff] %vm2947_vm13, %v2938_v39  ;;  %v2946_v15 = vmax.f32 %v2914_v58, 0.0 }
 0x4c4   : > { %v2731_v46 = vpop.f32.mrf.mxu2 }
 0x4c5   : > { %2979 = vst.msk [vmem:[%s4641_s19 + $0xf8] sm:$0xff] %vm2947_vm13, %v2946_v15  ;;  %v2732_v42 = vadd.f32 %v4630_v27, %v2731_v46 }
 0x4c7   : > { %v2907_v21 = vadd.f32 %v2836_v44, %v2732_v42 }
 0x4c9   : > { %v2939_v59 = vmax.f32 %v2907_v21, 0.0 }
 0x4cb   : > { %2972 = vst.msk [vmem:[%s4641_s19 + $0xc0] sm:$0xff] %vm2947_vm13, %v2939_v59 }
 0x4cc PF: > { %s17_s24 = sadd.s32 1, %s3181_s24  }
 0x4cd   : > { %p14_p4 = scmp.ge.s32.totalorder %s17_s24, 4  }
 0x4cf   :  { %16 = sbr.rel (!%p14_p4) target bundleno = 1 (0x1), region = 81 }

</bundles_post_ra>
